<compile_context>
chip_gen: v5e
topology: v5e:2x2
jax: 0.10.0
libtpu: 0.0.40
codegen_flags: <defaults>
</compile_context>

<pallas_src>
import functools

import jax
import jax.numpy as jnp
from jax.experimental import pallas as pl
from jax.experimental.pallas import tpu as pltpu


_EPS = 1e-5


# ---------------------------------------------------------------------------
# In-kernel helpers (pure 2-D GEMMs + elementwise; no reshapes/concats/transposes)
# ---------------------------------------------------------------------------
def _conv_t(x, a_ref, c_ref, b_row):
    """ConvTranspose2d(3x3) + bias + ReLU as 3 accumulated GEMM pairs.

    x:      (N*Hin, Win*Cin)   activation matrix (rows=(n,y), lanes=(x,c))
    a_ref:  (3, N*Hout, N*Hin) 0/1 row maps (H dilation + padding + ki tap)
    c_ref:  (3, Win*Cin, Wout*Cout) band matrices (W dilation + padding + weights)
    b_row:  (1, Wout*Cout)     bias broadcast over the lane axis
    """
    acc = None
    for ki in range(3):
        y = jnp.dot(x, c_ref[ki], preferred_element_type=jnp.float32)
        y = jnp.dot(a_ref[ki], y, preferred_element_type=jnp.float32)
        acc = y if acc is None else acc + y
    return jnp.maximum(acc + b_row, 0.0)


def _batchnorm(act, s_ref, st_ref, gamma, beta, eps=_EPS):
    """Training-mode BatchNorm2d on the (N*H, W*C) activation matrix.

    Per-channel sums via ones-row GEMM + channel-grouping matrix S (L, C);
    var = E[x^2] - mean^2; applied as a single fused scale+shift.
    """
    c = gamma.shape[1]
    rows, lanes = act.shape
    cnt = float(rows * (lanes // c))                    # N * Hout * Wout
    ones = jnp.ones((1, rows), jnp.float32)
    col_sum = jnp.dot(ones, act, preferred_element_type=jnp.float32)
    col_sq = jnp.dot(ones, act * act, preferred_element_type=jnp.float32)
    mean = jnp.dot(col_sum, s_ref[...], preferred_element_type=jnp.float32) / cnt
    ex2 = jnp.dot(col_sq, s_ref[...], preferred_element_type=jnp.float32) / cnt
    var = jnp.maximum(ex2 - mean * mean, 0.0)
    s_c = gamma * jax.lax.rsqrt(var + eps)              # (1, C)
    t_c = beta - mean * s_c                             # (1, C)
    s_row = jnp.dot(s_c, st_ref[...], preferred_element_type=jnp.float32)
    t_row = jnp.dot(t_c, st_ref[...], preferred_element_type=jnp.float32)
    return act * s_row + t_row


def _decoder_kernel(x_ref,
                    a1_ref, c1_ref, b1_ref, s1_ref, t1_ref, g1_ref, be1_ref,
                    a2_ref, c2_ref, b2_ref, s2_ref, t2_ref, g2_ref, be2_ref,
                    a3_ref, c3_ref, b3_ref,
                    o_ref):
    a = x_ref[...].astype(jnp.float32)                          # (N*7, 28)

    # layer 1: ConvTranspose2d(4, 8, 3, stride=2, padding=1) + ReLU + BN -> 13x13x8
    a = _conv_t(a, a1_ref, c1_ref, b1_ref[...])                 # (N*13, 13*8)
    a = _batchnorm(a, s1_ref, t1_ref, g1_ref[...], be1_ref[...])

    # layer 2: ConvTranspose2d(8, 16, 3, stride=2, padding=1, output_padding=1)
    #          + ReLU + BN -> 26x26x16
    a = _conv_t(a, a2_ref, c2_ref, b2_ref[...])                 # (N*26, 26*16)
    a = _batchnorm(a, s2_ref, t2_ref, g2_ref[...], be2_ref[...])

    # layer 3: ConvTranspose2d(16, 1, 3) + ReLU -> 28x28x1
    a = _conv_t(a, a3_ref, c3_ref, b3_ref[...])                 # (N*28, 28)

    o_ref[...] = a.astype(o_ref.dtype)                          # lane-dense store


# ---------------------------------------------------------------------------
# Constant builders (run in the XLA wrapper, tiny)
# ---------------------------------------------------------------------------
def _row_map(ki, h_in, h_out, stride, lo, n):
    """A_ki[(n,oy),(m,iy)] = [n==m] * [oy + ki == lo + stride*iy]."""
    oy = jnp.arange(h_out)[:, None]
    iy = jnp.arange(h_in)[None, :]
    m = ((oy + ki) == (lo + stride * iy)).astype(jnp.float32)   # (h_out, h_in)
    return jnp.kron(jnp.eye(n, dtype=jnp.float32), m)           # (n*h_out, n*h_in)


def _col_map(wf, ki, w_in, w_out, stride, lo):
    """C_ki[(w,ci),(ox,co)] = Wf[ki, lo + stride*w - ox, ci, co] if tap in [0,2]."""
    cin, cout = wf.shape[2], wf.shape[3]
    w = jnp.arange(w_in)[:, None]
    ox = jnp.arange(w_out)[None, :]
    kj = lo + stride * w - ox                                    # (w_in, w_out)
    valid = (kj >= 0) & (kj <= 2)
    vals = wf[ki, jnp.clip(kj, 0, 2)]                            # (w_in, w_out, cin, cout)
    vals = jnp.where(valid[..., None, None], vals, 0.0)
    return jnp.transpose(vals, (0, 2, 1, 3)).reshape(w_in * cin, w_out * cout)


def _layer_constants(wf, b, n, h_in, w_in, h_out, w_out, stride, lo):
    a = jnp.stack([_row_map(ki, h_in, h_out, stride, lo, n) for ki in range(3)])
    c = jnp.stack([_col_map(wf, ki, w_in, w_out, stride, lo) for ki in range(3)])
    b_row = jnp.tile(b.reshape(1, -1), (1, w_out))               # (1, w_out*cout)
    return a, c, b_row


def _chan_group(w_out, cout):
    """S[(ox,co), c] = [co == c]  (and its transpose for the broadcast-back)."""
    s = jnp.tile(jnp.eye(cout, dtype=jnp.float32), (w_out, 1))   # (w_out*cout, cout)
    return s, s.T


@functools.partial(jax.jit, static_argnums=2)
def decoder_forward(x, params, batch_size):
    n = batch_size
    # x.view(n, 4, 7, 7) (NCHW) -> GEMM layout rows=(n,y), lanes=(x,c): (N*7, 28).
    xm = jnp.transpose(x.reshape(n, 4, 7, 7), (0, 2, 3, 1)).reshape(n * 7, 7 * 4)

    a1, c1, b1 = _layer_constants(params["w1"], params["b1"], n, 7, 7, 13, 13, 2, 1)
    a2, c2, b2 = _layer_constants(params["w2"], params["b2"], n, 13, 13, 26, 26, 2, 1)
    a3, c3, b3 = _layer_constants(params["w3"], params["b3"], n, 26, 26, 28, 28, 1, 2)
    s1, t1 = _chan_group(13, 8)
    s2, t2 = _chan_group(26, 16)

    vmem = pl.BlockSpec(memory_space=pltpu.MemorySpace.VMEM)
    out = pl.pallas_call(
        _decoder_kernel,
        out_shape=jax.ShapeDtypeStruct((n * 28, 28), jnp.float32),
        in_specs=[vmem] * 18,
        out_specs=vmem,
    )(xm,
      a1, c1, b1, s1, t1, params["g1"], params["be1"],
      a2, c2, b2, s2, t2, params["g2"], params["be2"],
      a3, c3, b3)

    # (N*28, 28) -> NCHW (N, 1, 28, 28): pure reshape, no transpose.
    return out.reshape(n, 1, 28, 28)


# ---------------------------------------------------------------------------
# Parameter init (matches PyTorch ConvTranspose2d / BatchNorm2d semantics)
# ---------------------------------------------------------------------------
def ct_to_conv_weight(w_ct):
    # PyTorch ConvTranspose2d weight (Cin, Cout, kH, kW) -> HWIO conv weight,
    # spatially flipped (the stride-1-conv-over-dilated-input equivalent).
    return jnp.transpose(w_ct[:, :, ::-1, ::-1], (2, 3, 0, 1))


def init_params(key):
    ks = jax.random.split(key, 6)
    w1_ct = 0.2 * jax.random.normal(ks[0], (4, 8, 3, 3), jnp.float32)
    w2_ct = 0.2 * jax.random.normal(ks[1], (8, 16, 3, 3), jnp.float32)
    w3_ct = 0.2 * jax.random.normal(ks[2], (16, 1, 3, 3), jnp.float32)
    return {
        "w1": ct_to_conv_weight(w1_ct),
        "b1": 0.1 * jax.random.normal(ks[3], (1, 8), jnp.float32),
        "g1": jnp.ones((1, 8), jnp.float32),
        "be1": jnp.zeros((1, 8), jnp.float32),
        "w2": ct_to_conv_weight(w2_ct),
        "b2": 0.1 * jax.random.normal(ks[4], (1, 16), jnp.float32),
        "g2": jnp.ones((1, 16), jnp.float32),
        "be2": jnp.zeros((1, 16), jnp.float32),
        "w3": ct_to_conv_weight(w3_ct),
        "b3": 0.1 * jax.random.normal(ks[5], (1, 1), jnp.float32),
    }


# ---------------------------------------------------------------------------
# Pure-JAX reference (independent conv path) for verification
# ---------------------------------------------------------------------------
def _ref_layer(x, w, b, gamma, beta, *, stride, pad, out_pad, apply_bn, eps=_EPS):
    lo = 3 - 1 - pad
    hi = 3 - 1 - pad + out_pad
    y = jax.lax.conv_general_dilated(
        x, w, window_strides=(1, 1), padding=((lo, hi), (lo, hi)),
        lhs_dilation=(stride, stride),
        dimension_numbers=("NHWC", "HWIO", "NHWC"))
    y = y + b.reshape(1, 1, 1, -1)
    y = jnp.maximum(y, 0.0)
    if apply_bn:
        mean = jnp.mean(y, axis=(0, 1, 2), keepdims=True)
        var = jnp.mean((y - mean) ** 2, axis=(0, 1, 2), keepdims=True)
        y = (y - mean) * jax.lax.rsqrt(var + eps)
        y = y * gamma.reshape(1, 1, 1, -1) + beta.reshape(1, 1, 1, -1)
    return y


def reference_forward(x, params, batch_size):
    x = jnp.transpose(x.reshape(batch_size, 4, 7, 7), (0, 2, 3, 1))
    x = _ref_layer(x, params["w1"], params["b1"], params["g1"], params["be1"],
                   stride=2, pad=1, out_pad=0, apply_bn=True)
    x = _ref_layer(x, params["w2"], params["b2"], params["g2"], params["be2"],
                   stride=2, pad=1, out_pad=1, apply_bn=True)
    x = _ref_layer(x, params["w3"], params["b3"], None, None,
                   stride=1, pad=0, out_pad=0, apply_bn=False)
    return jnp.transpose(x, (0, 3, 1, 2))


if __name__ == "__main__":
    batch_size = 2
    key = jax.random.PRNGKey(0)
    k_in, k_par = jax.random.split(key)

    # Latent input: forward() does x.view(batch_size, 4, 7, 7)
    x = jax.random.normal(k_in, (batch_size, 4 * 7 * 7), jnp.float32)
    params = init_params(k_par)

    out = jax.block_until_ready(decoder_forward(x, params, batch_size))
    assert out.shape == (batch_size, 1, 28, 28), out.shape

    ref = jax.block_until_ready(reference_forward(x, params, batch_size))
    max_err = float(jnp.max(jnp.abs(out - ref)))
    assert jnp.allclose(out, ref, rtol=3e-3, atol=3e-3), max_err

    print("KERNEL_OK")
</pallas_src>

<mosaic_0001>
module attributes {stable_mosaic.version = 11 : i64} {
  func.func @_decoder_kernel(%arg0: memref<14x28xf32, #tpu.memory_space<vmem>>, %arg1: memref<3x26x14xf32, #tpu.memory_space<vmem>>, %arg2: memref<3x28x104xf32, #tpu.memory_space<vmem>>, %arg3: memref<1x104xf32, #tpu.memory_space<vmem>>, %arg4: memref<104x8xf32, #tpu.memory_space<vmem>>, %arg5: memref<8x104xf32, #tpu.memory_space<vmem>>, %arg6: memref<1x8xf32, #tpu.memory_space<vmem>>, %arg7: memref<1x8xf32, #tpu.memory_space<vmem>>, %arg8: memref<3x52x26xf32, #tpu.memory_space<vmem>>, %arg9: memref<3x104x416xf32, #tpu.memory_space<vmem>>, %arg10: memref<1x416xf32, #tpu.memory_space<vmem>>, %arg11: memref<416x16xf32, #tpu.memory_space<vmem>>, %arg12: memref<16x416xf32, #tpu.memory_space<vmem>>, %arg13: memref<1x16xf32, #tpu.memory_space<vmem>>, %arg14: memref<1x16xf32, #tpu.memory_space<vmem>>, %arg15: memref<3x56x52xf32, #tpu.memory_space<vmem>>, %arg16: memref<3x416x28xf32, #tpu.memory_space<vmem>>, %arg17: memref<1x28xf32, #tpu.memory_space<vmem>>, %arg18: memref<56x28xf32, #tpu.memory_space<vmem>>) attributes {dimension_semantics = [], scalar_prefetch = 0 : i64, scratch_operands = 0 : i64, tpu.core_type = #tpu.core_type<tc>} {
    %c0 = arith.constant 0 : index
    %c0_0 = arith.constant 0 : index
    %0 = vector.load %arg0[%c0, %c0_0] : memref<14x28xf32, #tpu.memory_space<vmem>>, vector<14x28xf32>
    %c0_1 = arith.constant 0 : index
    %c0_2 = arith.constant 0 : index
    %1 = vector.load %arg3[%c0_1, %c0_2] : memref<1x104xf32, #tpu.memory_space<vmem>>, vector<1x104xf32>
    %c0_3 = arith.constant 0 : index
    %c0_4 = arith.constant 0 : index
    %c0_5 = arith.constant 0 : index
    %2 = vector.load %arg2[%c0_3, %c0_4, %c0_5] : memref<3x28x104xf32, #tpu.memory_space<vmem>>, vector<1x28x104xf32>
    %3 = vector.shape_cast %2 : vector<1x28x104xf32> to vector<28x104xf32>
    %cst = arith.constant dense<0.000000e+00> : vector<14x104xf32>
    %4 = tpu.matmul %0, %3, %cst {dimension_numbers = #tpu.dot_dimension_numbers<[1], [0], [0], [1], [0, 0, 1, 1], [], []>} : vector<14x28xf32>, vector<28x104xf32>, vector<14x104xf32> -> vector<14x104xf32>
    %c0_6 = arith.constant 0 : index
    %c0_7 = arith.constant 0 : index
    %c0_8 = arith.constant 0 : index
    %5 = vector.load %arg1[%c0_6, %c0_7, %c0_8] : memref<3x26x14xf32, #tpu.memory_space<vmem>>, vector<1x26x14xf32>
    %6 = vector.shape_cast %5 : vector<1x26x14xf32> to vector<26x14xf32>
    %cst_9 = arith.constant dense<0.000000e+00> : vector<26x104xf32>
    %7 = tpu.matmul %6, %4, %cst_9 {dimension_numbers = #tpu.dot_dimension_numbers<[1], [0], [0], [1], [0, 0, 1, 1], [], []>} : vector<26x14xf32>, vector<14x104xf32>, vector<26x104xf32> -> vector<26x104xf32>
    %c1 = arith.constant 1 : index
    %c0_10 = arith.constant 0 : index
    %c0_11 = arith.constant 0 : index
    %8 = vector.load %arg2[%c1, %c0_10, %c0_11] : memref<3x28x104xf32, #tpu.memory_space<vmem>>, vector<1x28x104xf32>
    %9 = vector.shape_cast %8 : vector<1x28x104xf32> to vector<28x104xf32>
    %cst_12 = arith.constant dense<0.000000e+00> : vector<14x104xf32>
    %10 = tpu.matmul %0, %9, %cst_12 {dimension_numbers = #tpu.dot_dimension_numbers<[1], [0], [0], [1], [0, 0, 1, 1], [], []>} : vector<14x28xf32>, vector<28x104xf32>, vector<14x104xf32> -> vector<14x104xf32>
    %c1_13 = arith.constant 1 : index
    %c0_14 = arith.constant 0 : index
    %c0_15 = arith.constant 0 : index
    %11 = vector.load %arg1[%c1_13, %c0_14, %c0_15] : memref<3x26x14xf32, #tpu.memory_space<vmem>>, vector<1x26x14xf32>
    %12 = vector.shape_cast %11 : vector<1x26x14xf32> to vector<26x14xf32>
    %cst_16 = arith.constant dense<0.000000e+00> : vector<26x104xf32>
    %13 = tpu.matmul %12, %10, %cst_16 {dimension_numbers = #tpu.dot_dimension_numbers<[1], [0], [0], [1], [0, 0, 1, 1], [], []>} : vector<26x14xf32>, vector<14x104xf32>, vector<26x104xf32> -> vector<26x104xf32>
    %14 = arith.addf %7, %13 : vector<26x104xf32>
    %c2 = arith.constant 2 : index
    %c0_17 = arith.constant 0 : index
    %c0_18 = arith.constant 0 : index
    %15 = vector.load %arg2[%c2, %c0_17, %c0_18] : memref<3x28x104xf32, #tpu.memory_space<vmem>>, vector<1x28x104xf32>
    %16 = vector.shape_cast %15 : vector<1x28x104xf32> to vector<28x104xf32>
    %cst_19 = arith.constant dense<0.000000e+00> : vector<14x104xf32>
    %17 = tpu.matmul %0, %16, %cst_19 {dimension_numbers = #tpu.dot_dimension_numbers<[1], [0], [0], [1], [0, 0, 1, 1], [], []>} : vector<14x28xf32>, vector<28x104xf32>, vector<14x104xf32> -> vector<14x104xf32>
    %c2_20 = arith.constant 2 : index
    %c0_21 = arith.constant 0 : index
    %c0_22 = arith.constant 0 : index
    %18 = vector.load %arg1[%c2_20, %c0_21, %c0_22] : memref<3x26x14xf32, #tpu.memory_space<vmem>>, vector<1x26x14xf32>
    %19 = vector.shape_cast %18 : vector<1x26x14xf32> to vector<26x14xf32>
    %cst_23 = arith.constant dense<0.000000e+00> : vector<26x104xf32>
    %20 = tpu.matmul %19, %17, %cst_23 {dimension_numbers = #tpu.dot_dimension_numbers<[1], [0], [0], [1], [0, 0, 1, 1], [], []>} : vector<26x14xf32>, vector<14x104xf32>, vector<26x104xf32> -> vector<26x104xf32>
    %21 = arith.addf %14, %20 : vector<26x104xf32>
    %22 = vector.broadcast %1 : vector<1x104xf32> to vector<26x104xf32>
    %23 = arith.addf %21, %22 : vector<26x104xf32>
    %cst_24 = arith.constant 0.000000e+00 : f32
    %24 = vector.broadcast %cst_24 : f32 to vector<26x104xf32>
    %25 = arith.maximumf %23, %24 : vector<26x104xf32>
    %c0_25 = arith.constant 0 : index
    %c0_26 = arith.constant 0 : index
    %26 = vector.load %arg6[%c0_25, %c0_26] : memref<1x8xf32, #tpu.memory_space<vmem>>, vector<1x8xf32>
    %c0_27 = arith.constant 0 : index
    %c0_28 = arith.constant 0 : index
    %27 = vector.load %arg7[%c0_27, %c0_28] : memref<1x8xf32, #tpu.memory_space<vmem>>, vector<1x8xf32>
    %cst_29 = arith.constant 1.000000e+00 : f32
    %28 = vector.broadcast %cst_29 : f32 to vector<1x26xf32>
    %cst_30 = arith.constant dense<0.000000e+00> : vector<1x104xf32>
    %29 = tpu.matmul %28, %25, %cst_30 {dimension_numbers = #tpu.dot_dimension_numbers<[1], [0], [0], [1], [0, 0, 1, 1], [], []>} : vector<1x26xf32>, vector<26x104xf32>, vector<1x104xf32> -> vector<1x104xf32>
    %30 = arith.mulf %25, %25 : vector<26x104xf32>
    %cst_31 = arith.constant dense<0.000000e+00> : vector<1x104xf32>
    %31 = tpu.matmul %28, %30, %cst_31 {dimension_numbers = #tpu.dot_dimension_numbers<[1], [0], [0], [1], [0, 0, 1, 1], [], []>} : vector<1x26xf32>, vector<26x104xf32>, vector<1x104xf32> -> vector<1x104xf32>
    %c0_32 = arith.constant 0 : index
    %c0_33 = arith.constant 0 : index
    %32 = vector.load %arg4[%c0_32, %c0_33] : memref<104x8xf32, #tpu.memory_space<vmem>>, vector<104x8xf32>
    %cst_34 = arith.constant dense<0.000000e+00> : vector<1x8xf32>
    %33 = tpu.matmul %29, %32, %cst_34 {dimension_numbers = #tpu.dot_dimension_numbers<[1], [0], [0], [1], [0, 0, 1, 1], [], []>} : vector<1x104xf32>, vector<104x8xf32>, vector<1x8xf32> -> vector<1x8xf32>
    %cst_35 = arith.constant 3.380000e+02 : f32
    %34 = vector.broadcast %cst_35 : f32 to vector<1x8xf32>
    %35 = arith.divf %33, %34 : vector<1x8xf32>
    %c0_36 = arith.constant 0 : index
    %c0_37 = arith.constant 0 : index
    %36 = vector.load %arg4[%c0_36, %c0_37] : memref<104x8xf32, #tpu.memory_space<vmem>>, vector<104x8xf32>
    %cst_38 = arith.constant dense<0.000000e+00> : vector<1x8xf32>
    %37 = tpu.matmul %31, %36, %cst_38 {dimension_numbers = #tpu.dot_dimension_numbers<[1], [0], [0], [1], [0, 0, 1, 1], [], []>} : vector<1x104xf32>, vector<104x8xf32>, vector<1x8xf32> -> vector<1x8xf32>
    %cst_39 = arith.constant 3.380000e+02 : f32
    %38 = vector.broadcast %cst_39 : f32 to vector<1x8xf32>
    %39 = arith.divf %37, %38 : vector<1x8xf32>
    %40 = arith.mulf %35, %35 : vector<1x8xf32>
    %41 = arith.subf %39, %40 : vector<1x8xf32>
    %cst_40 = arith.constant 0.000000e+00 : f32
    %42 = vector.broadcast %cst_40 : f32 to vector<1x8xf32>
    %43 = arith.maximumf %41, %42 : vector<1x8xf32>
    %cst_41 = arith.constant 9.99999974E-6 : f32
    %44 = vector.broadcast %cst_41 : f32 to vector<1x8xf32>
    %45 = arith.addf %43, %44 : vector<1x8xf32>
    %46 = math.rsqrt %45 : vector<1x8xf32>
    %47 = arith.mulf %26, %46 : vector<1x8xf32>
    %48 = arith.mulf %35, %47 : vector<1x8xf32>
    %49 = arith.subf %27, %48 : vector<1x8xf32>
    %c0_42 = arith.constant 0 : index
    %c0_43 = arith.constant 0 : index
    %50 = vector.load %arg5[%c0_42, %c0_43] : memref<8x104xf32, #tpu.memory_space<vmem>>, vector<8x104xf32>
    %cst_44 = arith.constant dense<0.000000e+00> : vector<1x104xf32>
    %51 = tpu.matmul %47, %50, %cst_44 {dimension_numbers = #tpu.dot_dimension_numbers<[1], [0], [0], [1], [0, 0, 1, 1], [], []>} : vector<1x8xf32>, vector<8x104xf32>, vector<1x104xf32> -> vector<1x104xf32>
    %c0_45 = arith.constant 0 : index
    %c0_46 = arith.constant 0 : index
    %52 = vector.load %arg5[%c0_45, %c0_46] : memref<8x104xf32, #tpu.memory_space<vmem>>, vector<8x104xf32>
    %cst_47 = arith.constant dense<0.000000e+00> : vector<1x104xf32>
    %53 = tpu.matmul %49, %52, %cst_47 {dimension_numbers = #tpu.dot_dimension_numbers<[1], [0], [0], [1], [0, 0, 1, 1], [], []>} : vector<1x8xf32>, vector<8x104xf32>, vector<1x104xf32> -> vector<1x104xf32>
    %54 = vector.broadcast %51 : vector<1x104xf32> to vector<26x104xf32>
    %55 = arith.mulf %25, %54 : vector<26x104xf32>
    %56 = vector.broadcast %53 : vector<1x104xf32> to vector<26x104xf32>
    %57 = arith.addf %55, %56 : vector<26x104xf32>
    %c0_48 = arith.constant 0 : index
    %c0_49 = arith.constant 0 : index
    %58 = vector.load %arg10[%c0_48, %c0_49] : memref<1x416xf32, #tpu.memory_space<vmem>>, vector<1x416xf32>
    %c0_50 = arith.constant 0 : index
    %c0_51 = arith.constant 0 : index
    %c0_52 = arith.constant 0 : index
    %59 = vector.load %arg9[%c0_50, %c0_51, %c0_52] : memref<3x104x416xf32, #tpu.memory_space<vmem>>, vector<1x104x416xf32>
    %60 = vector.shape_cast %59 : vector<1x104x416xf32> to vector<104x416xf32>
    %cst_53 = arith.constant dense<0.000000e+00> : vector<26x416xf32>
    %61 = tpu.matmul %57, %60, %cst_53 {dimension_numbers = #tpu.dot_dimension_numbers<[1], [0], [0], [1], [0, 0, 1, 1], [], []>} : vector<26x104xf32>, vector<104x416xf32>, vector<26x416xf32> -> vector<26x416xf32>
    %c0_54 = arith.constant 0 : index
    %c0_55 = arith.constant 0 : index
    %c0_56 = arith.constant 0 : index
    %62 = vector.load %arg8[%c0_54, %c0_55, %c0_56] : memref<3x52x26xf32, #tpu.memory_space<vmem>>, vector<1x52x26xf32>
    %63 = vector.shape_cast %62 : vector<1x52x26xf32> to vector<52x26xf32>
    %cst_57 = arith.constant dense<0.000000e+00> : vector<52x416xf32>
    %64 = tpu.matmul %63, %61, %cst_57 {dimension_numbers = #tpu.dot_dimension_numbers<[1], [0], [0], [1], [0, 0, 1, 1], [], []>} : vector<52x26xf32>, vector<26x416xf32>, vector<52x416xf32> -> vector<52x416xf32>
    %c1_58 = arith.constant 1 : index
    %c0_59 = arith.constant 0 : index
    %c0_60 = arith.constant 0 : index
    %65 = vector.load %arg9[%c1_58, %c0_59, %c0_60] : memref<3x104x416xf32, #tpu.memory_space<vmem>>, vector<1x104x416xf32>
    %66 = vector.shape_cast %65 : vector<1x104x416xf32> to vector<104x416xf32>
    %cst_61 = arith.constant dense<0.000000e+00> : vector<26x416xf32>
    %67 = tpu.matmul %57, %66, %cst_61 {dimension_numbers = #tpu.dot_dimension_numbers<[1], [0], [0], [1], [0, 0, 1, 1], [], []>} : vector<26x104xf32>, vector<104x416xf32>, vector<26x416xf32> -> vector<26x416xf32>
    %c1_62 = arith.constant 1 : index
    %c0_63 = arith.constant 0 : index
    %c0_64 = arith.constant 0 : index
    %68 = vector.load %arg8[%c1_62, %c0_63, %c0_64] : memref<3x52x26xf32, #tpu.memory_space<vmem>>, vector<1x52x26xf32>
    %69 = vector.shape_cast %68 : vector<1x52x26xf32> to vector<52x26xf32>
    %cst_65 = arith.constant dense<0.000000e+00> : vector<52x416xf32>
    %70 = tpu.matmul %69, %67, %cst_65 {dimension_numbers = #tpu.dot_dimension_numbers<[1], [0], [0], [1], [0, 0, 1, 1], [], []>} : vector<52x26xf32>, vector<26x416xf32>, vector<52x416xf32> -> vector<52x416xf32>
    %71 = arith.addf %64, %70 : vector<52x416xf32>
    %c2_66 = arith.constant 2 : index
    %c0_67 = arith.constant 0 : index
    %c0_68 = arith.constant 0 : index
    %72 = vector.load %arg9[%c2_66, %c0_67, %c0_68] : memref<3x104x416xf32, #tpu.memory_space<vmem>>, vector<1x104x416xf32>
    %73 = vector.shape_cast %72 : vector<1x104x416xf32> to vector<104x416xf32>
    %cst_69 = arith.constant dense<0.000000e+00> : vector<26x416xf32>
    %74 = tpu.matmul %57, %73, %cst_69 {dimension_numbers = #tpu.dot_dimension_numbers<[1], [0], [0], [1], [0, 0, 1, 1], [], []>} : vector<26x104xf32>, vector<104x416xf32>, vector<26x416xf32> -> vector<26x416xf32>
    %c2_70 = arith.constant 2 : index
    %c0_71 = arith.constant 0 : index
    %c0_72 = arith.constant 0 : index
    %75 = vector.load %arg8[%c2_70, %c0_71, %c0_72] : memref<3x52x26xf32, #tpu.memory_space<vmem>>, vector<1x52x26xf32>
    %76 = vector.shape_cast %75 : vector<1x52x26xf32> to vector<52x26xf32>
    %cst_73 = arith.constant dense<0.000000e+00> : vector<52x416xf32>
    %77 = tpu.matmul %76, %74, %cst_73 {dimension_numbers = #tpu.dot_dimension_numbers<[1], [0], [0], [1], [0, 0, 1, 1], [], []>} : vector<52x26xf32>, vector<26x416xf32>, vector<52x416xf32> -> vector<52x416xf32>
    %78 = arith.addf %71, %77 : vector<52x416xf32>
    %79 = vector.broadcast %58 : vector<1x416xf32> to vector<52x416xf32>
    %80 = arith.addf %78, %79 : vector<52x416xf32>
    %cst_74 = arith.constant 0.000000e+00 : f32
    %81 = vector.broadcast %cst_74 : f32 to vector<52x416xf32>
    %82 = arith.maximumf %80, %81 : vector<52x416xf32>
    %c0_75 = arith.constant 0 : index
    %c0_76 = arith.constant 0 : index
    %83 = vector.load %arg13[%c0_75, %c0_76] : memref<1x16xf32, #tpu.memory_space<vmem>>, vector<1x16xf32>
    %c0_77 = arith.constant 0 : index
    %c0_78 = arith.constant 0 : index
    %84 = vector.load %arg14[%c0_77, %c0_78] : memref<1x16xf32, #tpu.memory_space<vmem>>, vector<1x16xf32>
    %cst_79 = arith.constant 1.000000e+00 : f32
    %85 = vector.broadcast %cst_79 : f32 to vector<1x52xf32>
    %cst_80 = arith.constant dense<0.000000e+00> : vector<1x416xf32>
    %86 = tpu.matmul %85, %82, %cst_80 {dimension_numbers = #tpu.dot_dimension_numbers<[1], [0], [0], [1], [0, 0, 1, 1], [], []>} : vector<1x52xf32>, vector<52x416xf32>, vector<1x416xf32> -> vector<1x416xf32>
    %87 = arith.mulf %82, %82 : vector<52x416xf32>
    %cst_81 = arith.constant dense<0.000000e+00> : vector<1x416xf32>
    %88 = tpu.matmul %85, %87, %cst_81 {dimension_numbers = #tpu.dot_dimension_numbers<[1], [0], [0], [1], [0, 0, 1, 1], [], []>} : vector<1x52xf32>, vector<52x416xf32>, vector<1x416xf32> -> vector<1x416xf32>
    %c0_82 = arith.constant 0 : index
    %c0_83 = arith.constant 0 : index
    %89 = vector.load %arg11[%c0_82, %c0_83] : memref<416x16xf32, #tpu.memory_space<vmem>>, vector<416x16xf32>
    %cst_84 = arith.constant dense<0.000000e+00> : vector<1x16xf32>
    %90 = tpu.matmul %86, %89, %cst_84 {dimension_numbers = #tpu.dot_dimension_numbers<[1], [0], [0], [1], [0, 0, 1, 1], [], []>} : vector<1x416xf32>, vector<416x16xf32>, vector<1x16xf32> -> vector<1x16xf32>
    %cst_85 = arith.constant 1.352000e+03 : f32
    %91 = vector.broadcast %cst_85 : f32 to vector<1x16xf32>
    %92 = arith.divf %90, %91 : vector<1x16xf32>
    %c0_86 = arith.constant 0 : index
    %c0_87 = arith.constant 0 : index
    %93 = vector.load %arg11[%c0_86, %c0_87] : memref<416x16xf32, #tpu.memory_space<vmem>>, vector<416x16xf32>
    %cst_88 = arith.constant dense<0.000000e+00> : vector<1x16xf32>
    %94 = tpu.matmul %88, %93, %cst_88 {dimension_numbers = #tpu.dot_dimension_numbers<[1], [0], [0], [1], [0, 0, 1, 1], [], []>} : vector<1x416xf32>, vector<416x16xf32>, vector<1x16xf32> -> vector<1x16xf32>
    %cst_89 = arith.constant 1.352000e+03 : f32
    %95 = vector.broadcast %cst_89 : f32 to vector<1x16xf32>
    %96 = arith.divf %94, %95 : vector<1x16xf32>
    %97 = arith.mulf %92, %92 : vector<1x16xf32>
    %98 = arith.subf %96, %97 : vector<1x16xf32>
    %cst_90 = arith.constant 0.000000e+00 : f32
    %99 = vector.broadcast %cst_90 : f32 to vector<1x16xf32>
    %100 = arith.maximumf %98, %99 : vector<1x16xf32>
    %cst_91 = arith.constant 9.99999974E-6 : f32
    %101 = vector.broadcast %cst_91 : f32 to vector<1x16xf32>
    %102 = arith.addf %100, %101 : vector<1x16xf32>
    %103 = math.rsqrt %102 : vector<1x16xf32>
    %104 = arith.mulf %83, %103 : vector<1x16xf32>
    %105 = arith.mulf %92, %104 : vector<1x16xf32>
    %106 = arith.subf %84, %105 : vector<1x16xf32>
    %c0_92 = arith.constant 0 : index
    %c0_93 = arith.constant 0 : index
    %107 = vector.load %arg12[%c0_92, %c0_93] : memref<16x416xf32, #tpu.memory_space<vmem>>, vector<16x416xf32>
    %cst_94 = arith.constant dense<0.000000e+00> : vector<1x416xf32>
    %108 = tpu.matmul %104, %107, %cst_94 {dimension_numbers = #tpu.dot_dimension_numbers<[1], [0], [0], [1], [0, 0, 1, 1], [], []>} : vector<1x16xf32>, vector<16x416xf32>, vector<1x416xf32> -> vector<1x416xf32>
    %c0_95 = arith.constant 0 : index
    %c0_96 = arith.constant 0 : index
    %109 = vector.load %arg12[%c0_95, %c0_96] : memref<16x416xf32, #tpu.memory_space<vmem>>, vector<16x416xf32>
    %cst_97 = arith.constant dense<0.000000e+00> : vector<1x416xf32>
    %110 = tpu.matmul %106, %109, %cst_97 {dimension_numbers = #tpu.dot_dimension_numbers<[1], [0], [0], [1], [0, 0, 1, 1], [], []>} : vector<1x16xf32>, vector<16x416xf32>, vector<1x416xf32> -> vector<1x416xf32>
    %111 = vector.broadcast %108 : vector<1x416xf32> to vector<52x416xf32>
    %112 = arith.mulf %82, %111 : vector<52x416xf32>
    %113 = vector.broadcast %110 : vector<1x416xf32> to vector<52x416xf32>
    %114 = arith.addf %112, %113 : vector<52x416xf32>
    %c0_98 = arith.constant 0 : index
    %c0_99 = arith.constant 0 : index
    %115 = vector.load %arg17[%c0_98, %c0_99] : memref<1x28xf32, #tpu.memory_space<vmem>>, vector<1x28xf32>
    %c0_100 = arith.constant 0 : index
    %c0_101 = arith.constant 0 : index
    %c0_102 = arith.constant 0 : index
    %116 = vector.load %arg16[%c0_100, %c0_101, %c0_102] : memref<3x416x28xf32, #tpu.memory_space<vmem>>, vector<1x416x28xf32>
    %117 = vector.shape_cast %116 : vector<1x416x28xf32> to vector<416x28xf32>
    %cst_103 = arith.constant dense<0.000000e+00> : vector<52x28xf32>
    %118 = tpu.matmul %114, %117, %cst_103 {dimension_numbers = #tpu.dot_dimension_numbers<[1], [0], [0], [1], [0, 0, 1, 1], [], []>} : vector<52x416xf32>, vector<416x28xf32>, vector<52x28xf32> -> vector<52x28xf32>
    %c0_104 = arith.constant 0 : index
    %c0_105 = arith.constant 0 : index
    %c0_106 = arith.constant 0 : index
    %119 = vector.load %arg15[%c0_104, %c0_105, %c0_106] : memref<3x56x52xf32, #tpu.memory_space<vmem>>, vector<1x56x52xf32>
    %120 = vector.shape_cast %119 : vector<1x56x52xf32> to vector<56x52xf32>
    %cst_107 = arith.constant dense<0.000000e+00> : vector<56x28xf32>
    %121 = tpu.matmul %120, %118, %cst_107 {dimension_numbers = #tpu.dot_dimension_numbers<[1], [0], [0], [1], [0, 0, 1, 1], [], []>} : vector<56x52xf32>, vector<52x28xf32>, vector<56x28xf32> -> vector<56x28xf32>
    %c1_108 = arith.constant 1 : index
    %c0_109 = arith.constant 0 : index
    %c0_110 = arith.constant 0 : index
    %122 = vector.load %arg16[%c1_108, %c0_109, %c0_110] : memref<3x416x28xf32, #tpu.memory_space<vmem>>, vector<1x416x28xf32>
    %123 = vector.shape_cast %122 : vector<1x416x28xf32> to vector<416x28xf32>
    %cst_111 = arith.constant dense<0.000000e+00> : vector<52x28xf32>
    %124 = tpu.matmul %114, %123, %cst_111 {dimension_numbers = #tpu.dot_dimension_numbers<[1], [0], [0], [1], [0, 0, 1, 1], [], []>} : vector<52x416xf32>, vector<416x28xf32>, vector<52x28xf32> -> vector<52x28xf32>
    %c1_112 = arith.constant 1 : index
    %c0_113 = arith.constant 0 : index
    %c0_114 = arith.constant 0 : index
    %125 = vector.load %arg15[%c1_112, %c0_113, %c0_114] : memref<3x56x52xf32, #tpu.memory_space<vmem>>, vector<1x56x52xf32>
    %126 = vector.shape_cast %125 : vector<1x56x52xf32> to vector<56x52xf32>
    %cst_115 = arith.constant dense<0.000000e+00> : vector<56x28xf32>
    %127 = tpu.matmul %126, %124, %cst_115 {dimension_numbers = #tpu.dot_dimension_numbers<[1], [0], [0], [1], [0, 0, 1, 1], [], []>} : vector<56x52xf32>, vector<52x28xf32>, vector<56x28xf32> -> vector<56x28xf32>
    %128 = arith.addf %121, %127 : vector<56x28xf32>
    %c2_116 = arith.constant 2 : index
    %c0_117 = arith.constant 0 : index
    %c0_118 = arith.constant 0 : index
    %129 = vector.load %arg16[%c2_116, %c0_117, %c0_118] : memref<3x416x28xf32, #tpu.memory_space<vmem>>, vector<1x416x28xf32>
    %130 = vector.shape_cast %129 : vector<1x416x28xf32> to vector<416x28xf32>
    %cst_119 = arith.constant dense<0.000000e+00> : vector<52x28xf32>
    %131 = tpu.matmul %114, %130, %cst_119 {dimension_numbers = #tpu.dot_dimension_numbers<[1], [0], [0], [1], [0, 0, 1, 1], [], []>} : vector<52x416xf32>, vector<416x28xf32>, vector<52x28xf32> -> vector<52x28xf32>
    %c2_120 = arith.constant 2 : index
    %c0_121 = arith.constant 0 : index
    %c0_122 = arith.constant 0 : index
    %132 = vector.load %arg15[%c2_120, %c0_121, %c0_122] : memref<3x56x52xf32, #tpu.memory_space<vmem>>, vector<1x56x52xf32>
    %133 = vector.shape_cast %132 : vector<1x56x52xf32> to vector<56x52xf32>
    %cst_123 = arith.constant dense<0.000000e+00> : vector<56x28xf32>
    %134 = tpu.matmul %133, %131, %cst_123 {dimension_numbers = #tpu.dot_dimension_numbers<[1], [0], [0], [1], [0, 0, 1, 1], [], []>} : vector<56x52xf32>, vector<52x28xf32>, vector<56x28xf32> -> vector<56x28xf32>
    %135 = arith.addf %128, %134 : vector<56x28xf32>
    %136 = vector.broadcast %115 : vector<1x28xf32> to vector<56x28xf32>
    %137 = arith.addf %135, %136 : vector<56x28xf32>
    %cst_124 = arith.constant 0.000000e+00 : f32
    %138 = vector.broadcast %cst_124 : f32 to vector<56x28xf32>
    %139 = arith.maximumf %137, %138 : vector<56x28xf32>
    %c0_125 = arith.constant 0 : index
    %c0_126 = arith.constant 0 : index
    %140 = vector.load %arg18[%c0_125, %c0_126] : memref<56x28xf32, #tpu.memory_space<vmem>>, vector<56x28xf32>
    tpu.vector_store %arg18[%c0_125, %c0_126], %139 {strides = array<i32>} : memref<56x28xf32, #tpu.memory_space<vmem>>, vector<56x28xf32>,
    return
  }
}

</mosaic_0001>

<bundles_post_ra>
// kernel: tile.44
= control target key start
LH: loop header
LB: loop body
LE: loop exit
PB: predicated region body
PF: predicated region fallthrough
CT: control target
= control target key end

     0   :  { %vm6_vm0 = vcmask 1043458   ;;  %vm10_vm1 = vcmask 1045508   ;;  %vm14_vm2 = vcmask 1047558   ;;  %s19_s6 = smov 3  ;;  %s22_s7 = smov 12  ;;  %vm16_vm3 = vcmask 64512   ;;  %s601_s0 = inlined_call_operand.vmem [shape: f32[13,8,8], index: 0, kind: input, shape index: {}]   ;;  %s602_s1 = inlined_call_operand.vmem [shape: f32[104,8], index: 1, kind: output, shape index: {}]  }
   0x1   :  { %v282_v0 = vld [vmem:[%s601_s0 + $0xc] ss:$16 sm:%s19_s6]   ;;  %s27_s12 = smov 48  ;;  %s32_s13 = smov 192  ;;  %vm38_vm4 = vcmask 851712   ;;  %vm60_vm5 = vcmask 786112  }
   0x2   :  { %v283_v1 = vld [vmem:[%s601_s0 + $0xc] ss:$16 sm:%s22_s7]   ;;  %s63_s18 = smov 3  ;;  %s66_s21 = smov 12  ;;  %vm82_vm6 = vcmask 720512   ;;  %vm104_vm7 = vcmask 654912  }
   0x3   :  { %v25_v2 = vsel %vm6_vm0, %v283_v1, %v282_v0  ;;  %v284_v3 = vld [vmem:[%s601_s0 + $0xc] ss:$16 sm:%s27_s12]   ;;  %v290_v6 = vld [vmem:[%s601_s0 + $0xa] ss:$16 sm:%s63_s18]   ;;  %s71_s22 = smov 48  ;;  %s76_s27 = smov 192 }
   0x4   :  { %v285_v4 = vld [vmem:[%s601_s0 + $0xc] ss:$16 sm:%s32_s13]   ;;  %v30_v5 = vsel %vm10_vm1, %v284_v3, %v25_v2  ;;  %v291_v8 = vld [vmem:[%s601_s0 + $0xa] ss:$16 sm:%s66_s21]   ;;  %s342_s28 = smov 96   ;;  %s41_s2 = smov 3 }
   0x5   :  { %v35_v7 = vsel %vm14_vm2, %v285_v4, %v30_v5  ;;  %v292_v9 = vld [vmem:[%s601_s0 + $0xa] ss:$16 sm:%s71_s22]   ;;  %v69_v10 = vsel %vm6_vm0, %v291_v8, %v290_v6  ;;  %s44_s3 = smov 12  ;;  %v286_v13 = vld [vmem:[%s601_s0 + $0xb] ss:$16 sm:%s41_s2]   ;;  %s49_s8 = smov 48 }
   0x6   :  { %36 = vrot.lane.b32.xlu0 %v35_v7, %s342_s28  ;;  %v293_v11 = vld [vmem:[%s601_s0 + $0xa] ss:$16 sm:%s76_s27]   ;;  %v74_v12 = vsel %vm10_vm1, %v292_v9, %v69_v10  ;;  %s54_s9 = smov 192  ;;  %s85_s14 = smov 3  ;;  %vm126_vm8 = vcmask 589312   ;;  %vm148_vm9 = vcmask 523712  }
   0x7   :  { %v287_v14 = vld [vmem:[%s601_s0 + $0xb] ss:$16 sm:%s44_s3]   ;;  %v79_v15 = vsel %vm14_vm2, %v293_v11, %v74_v12  ;;  %s343_s15 = smov 80   ;;  %v294_v20 = vld [vmem:[%s601_s0 + $0x9] ss:$16 sm:%s85_s14]   ;;  %s88_s18 = smov 12 }
   0x8   :  { %v47_v16 = vsel %vm6_vm0, %v287_v14, %v286_v13  ;;  %v288_v17 = vld [vmem:[%s601_s0 + $0xb] ss:$16 sm:%s49_s8]   ;;  %80 = vrot.lane.b32.xlu1 %v79_v15, %s343_s15  ;;  %s93_s19 = smov 48  ;;  %s98_s24 = smov 192  ;;  %vm170_vm10 = vcmask 458112   ;;  %vm192_vm11 = vcmask 392512  }
   0x9   :  { %v289_v18 = vld [vmem:[%s601_s0 + $0xb] ss:$16 sm:%s54_s9]   ;;  %v52_v19 = vsel %vm10_vm1, %v288_v17, %v47_v16  ;;  %v295_v21 = vld [vmem:[%s601_s0 + $0x9] ss:$16 sm:%s88_s18]   ;;  %s151_s27 = smov 3  ;;  %s154_s28 = smov 12 }
   0xa   :  { %v296_v22 = vld [vmem:[%s601_s0 + $0x9] ss:$16 sm:%s93_s19]   ;;  %v57_v23 = vsel %vm14_vm2, %v289_v18, %v52_v19  ;;  %v91_v24 = vsel %vm6_vm0, %v295_v21, %v294_v20  ;;  %v306_v27 = vld [vmem:[%s601_s0 + $0x6] ss:$16 sm:%s151_s27]   ;;  %s159_s4 = smov 48  ;;  %s164_s7 = smov 192 }
   0xb   :  { %v297_v25 = vld [vmem:[%s601_s0 + $0x9] ss:$16 sm:%s98_s24]   ;;  %v96_v26 = vsel %vm10_vm1, %v296_v22, %v91_v24  ;;  %v307_v28 = vld [vmem:[%s601_s0 + $0x6] ss:$16 sm:%s154_s28]   ;;  %s173_s8 = smov 3  ;;  %s344_s9 = smov 88  }
   0xc   :  { %v157_v29 = vsel %vm6_vm0, %v307_v28, %v306_v27  ;;  %v308_v30 = vld [vmem:[%s601_s0 + $0x6] ss:$16 sm:%s159_s4]   ;;  %v101_v31 = vsel %vm14_vm2, %v297_v25, %v96_v26  ;;  %v310_v32 = vld [vmem:[%s601_s0 + $0x5] ss:$16 sm:%s173_s8]   ;;  %s176_s12 = smov 12  ;;  %s181_s13 = smov 48 }
   0xd   :  { %v311_v33 = vld [vmem:[%s601_s0 + $0x5] ss:$16 sm:%s176_s12]   ;;  %s186_s16 = smov 192  ;;  %v162_v34 = vsel %vm10_vm1, %v308_v30, %v157_v29  ;;  %v309_v35 = vld [vmem:[%s601_s0 + $0x6] ss:$16 sm:%s164_s7]   ;;  %s217_s21 = smov 3 }
   0xe   :  { %58 = vrot.lane.b32.xlu0 %v57_v23, %s344_s9  ;;  %v179_v36 = vsel %vm6_vm0, %v311_v33, %v310_v32  ;;  %v312_v37 = vld [vmem:[%s601_s0 + $0x5] ss:$16 sm:%s181_s13]   ;;  %s220_s22 = smov 12  ;;  %s345_s23 = smov 72   ;;  %v167_v40 = vsel %vm14_vm2, %v309_v35, %v162_v34  ;;  %vm214_vm12 = vcmask 326912   ;;  %vm236_vm13 = vcmask 261312  }
   0xf   :  { %s225_s24 = smov 48  ;;  %v318_v38 = vld [vmem:[%s601_s0 + $0x3] ss:$16 sm:%s217_s21]   ;;  %s230_s29 = smov 192  ;;  %v184_v41 = vsel %vm10_vm1, %v312_v37, %v179_v36  ;;  %v313_v42 = vld [vmem:[%s601_s0 + $0x5] ss:$16 sm:%s186_s16]  }
  0x10   :  { %102 = vrot.lane.b32.xlu1 %v101_v31, %s345_s23  ;;  %v319_v39 = vld [vmem:[%s601_s0 + $0x3] ss:$16 sm:%s220_s22]   ;;  %s239_s30 = smov 3  ;;  %s242_s4 = smov 12  ;;  %v189_v47 = vsel %vm14_vm2, %v313_v42, %v184_v41  ;;  %vm258_vm14 = vcmask 195712   ;;  %vm280_vm15 = vcmask 130112  }
  0x11   :  { %s247_s5 = smov 48  ;;  %v320_v43 = vld [vmem:[%s601_s0 + $0x3] ss:$16 sm:%s225_s24]   ;;  %s462_s8 = smov 192  ;;  %v223_v44 = vsel %vm6_vm0, %v319_v39, %v318_v38  ;;  %v322_v45 = vld [vmem:[%s601_s0 + $0x2] ss:$16 sm:%s239_s30]  }
  0x12   :  { %v323_v46 = vld [vmem:[%s601_s0 + $0x2] ss:$16 sm:%s242_s4]   ;;  %s107_s13 = smov 3  ;;  %s110_s14 = smov 12  ;;  %v321_v48 = vld [vmem:[%s601_s0 + $0x3] ss:$16 sm:%s230_s29]   ;;  %v228_v53 = vsel %vm10_vm1, %v320_v43, %v223_v44 }
  0x13   :  { %s346_s15 = smov 48   ;;  %v324_v49 = vld [vmem:[%s601_s0 + $0x2] ss:$16 sm:%s247_s5]   ;;  %v298_v50 = vld [vmem:[%s601_s0 + $0x8] ss:$16 sm:%s107_s13]   ;;  %s115_s22 = smov 48  ;;  %v245_v54 = vsel %vm6_vm0, %v323_v46, %v322_v45  ;;  %v233_v63 = vsel %vm14_vm2, %v321_v48, %v228_v53 }
  0x14   :  { %s120_s23 = smov 192  ;;  %v299_v51 = vld [vmem:[%s601_s0 + $0x8] ss:$16 sm:%s110_s14]   ;;  %s129_s28 = smov 3  ;;  %v250_v0 = vsel %vm10_vm1, %v324_v49, %v245_v54  ;;  %v325_v1 = vld [vmem:[%s601_s0 + $0x2] ss:$16 sm:%s462_s8]  }
  0x15   :  { %v300_v52 = vld [vmem:[%s601_s0 + $0x8] ss:$16 sm:%s115_s22]   ;;  %v113_v55 = vsel %vm6_vm0, %v299_v51, %v298_v50  ;;  %v302_v57 = vld [vmem:[%s601_s0 + $0x7] ss:$16 sm:%s129_s28]   ;;  %s132_s4 = smov 12  ;;  %s137_s5 = smov 48  ;;  %v255_v4 = vsel %vm14_vm2, %v325_v1, %v250_v0 }
  0x16   :  { %168 = vrot.lane.b32.xlu0 %v167_v40, %s346_s15  ;;  %v301_v56 = vld [vmem:[%s601_s0 + $0x8] ss:$16 sm:%s120_s23]   ;;  %s347_s6 = smov 40   ;;  %v118_v58 = vsel %vm10_vm1, %v300_v52, %v113_v55  ;;  %s142_s12 = smov 192 }
  0x17   :  { %v303_v59 = vld [vmem:[%s601_s0 + $0x7] ss:$16 sm:%s132_s4]   ;;  %v123_v60 = vsel %vm14_vm2, %v301_v56, %v118_v58  ;;  %s348_s8 = smov 64   ;;  %s195_s15 = smov 3 }
  0x18   :  { %190 = vrot.lane.b32.xlu1 %v189_v47, %s347_s6  ;;  %v135_v61 = vsel %vm6_vm0, %v303_v59, %v302_v57  ;;  %v304_v62 = vld [vmem:[%s601_s0 + $0x7] ss:$16 sm:%s137_s5]   ;;  %124 = vrot.lane.b32.xlu2 %v123_v60, %s348_s8  ;;  %s198_s16 = smov 12  ;;  %s349_s19 = smov 24  }
  0x19   :  { %v140_v2 = vsel %vm10_vm1, %v304_v62, %v135_v61  ;;  %v305_v3 = vld [vmem:[%s601_s0 + $0x7] ss:$16 sm:%s142_s12]   ;;  %v314_v5 = vld [vmem:[%s601_s0 + $0x4] ss:$16 sm:%s195_s15]   ;;  %s203_s24 = smov 48  ;;  %s350_s25 = smov 16  }
  0x1a   :  { %v315_v6 = vld [vmem:[%s601_s0 + $0x4] ss:$16 sm:%s198_s16]   ;;  %v145_v7 = vsel %vm14_vm2, %v305_v3, %v140_v2  ;;  %s208_s28 = smov 192  ;;  %s351_s29 = smov 56  }
  0x1b   :  { %v201_v8 = vsel %vm6_vm0, %v315_v6, %v314_v5  ;;  %v316_v9 = vld [vmem:[%s601_s0 + $0x4] ss:$16 sm:%s203_s24]   ;;  %s261_s30 = smov 3  ;;  %s264_s2 = smov 12 }
  0x1c   :  { %v206_v10 = vsel %vm10_vm1, %v316_v9, %v201_v8  ;;  %v317_v11 = vld [vmem:[%s601_s0 + $0x4] ss:$16 sm:%s208_s28]   ;;  %v326_v12 = vld [vmem:[%s601_s0 + $0x1] ss:$16 sm:%s261_s30]   ;;  %s269_s10 = smov 48  ;;  %s274_s13 = smov 192 }
  0x1d   :  { %v327_v13 = vld [vmem:[%s601_s0 + $0x1] ss:$16 sm:%s264_s2]   ;;  %v211_v14 = vsel %vm14_vm2, %v317_v11, %v206_v10  ;;  %s352_s14 = smov 32   ;;  %s353_s16 = smov 8  }
  0x1e   :  { %234 = vrot.lane.b32.xlu0 %v233_v63, %s349_s19  ;;  %v267_v15 = vsel %vm6_vm0, %v327_v13, %v326_v12  ;;  %v328_v16 = vld [vmem:[%s601_s0 + $0x1] ss:$16 sm:%s269_s10]   ;;  %s2_s17 = smov 3  ;;  %s4_s18 = smov 12 }
  0x1f   :  { %v272_v17 = vsel %vm10_vm1, %v328_v16, %v267_v15  ;;  %v329_v18 = vld [vmem:[%s601_s0 + $0x1] ss:$16 sm:%s274_s13]   ;;  %s8_s19 = smov 48  ;;  %s12_s20 = smov 192  ;;  %v3_v20 = vld [vmem:[%s601_s0] ss:$16 sm:%s2_s17]  }
  0x20   :  { %256 = vrot.lane.b32.xlu1 %v255_v4, %s350_s25  ;;  %146 = vrot.lane.b32.xlu2 %v145_v7, %s351_s29  ;;  %v277_v19 = vsel %vm14_vm2, %v329_v18, %v272_v17  ;;  %v5_v21 = vld [vmem:[%s601_s0] ss:$16 sm:%s4_s18]  }
  0x21   :  { %v7_v22 = vsel %vm6_vm0, %v5_v21, %v3_v20  ;;  %v9_v23 = vld [vmem:[%s601_s0] ss:$16 sm:%s8_s19]  }
  0x22   :  { %v11_v24 = vsel %vm10_vm1, %v9_v23, %v7_v22  ;;  %v13_v25 = vld [vmem:[%s601_s0] ss:$16 sm:%s12_s20]  }
  0x23   :  { %v15_v26 = vsel %vm14_vm2, %v13_v25, %v11_v24 }
  0x24   :  { %17 = vst.msk [vmem:[%s602_s1] sm:$0xff] %vm16_vm3, %v15_v26  }
  0x28   :  { %212 = vrot.lane.b32.xlu2 %v211_v14, %s352_s14 }
  0x30   :  { %278 = vrot.lane.b32.xlu2 %v277_v19, %s353_s16 }
  0x72   :  { %v125_v27 = vpop.permute.xlu2 %124  }
  0x78   :  { %v37_v28 = vpop.permute.xlu0 %36  }
  0x79   :  { %39 = vst.msk [vmem:[%s602_s1] sm:$0xff] %vm38_vm4, %v37_v28  }
  0x7a   :  { %v81_v29 = vpop.permute.xlu1 %80   ;;  %v147_v30 = vpop.permute.xlu2 %146  }
  0x80   :  { %v59_v31 = vpop.permute.xlu0 %58  }
  0x81   :  { %61 = vst.msk [vmem:[%s602_s1] sm:$0xff] %vm60_vm5, %v59_v31  }
  0x82   :  { %83 = vst.msk [vmem:[%s602_s1] sm:$0xff] %vm82_vm6, %v81_v29   ;;  %v103_v32 = vpop.permute.xlu1 %102   ;;  %v213_v33 = vpop.permute.xlu2 %212  }
  0x83   :  { %105 = vst.msk [vmem:[%s602_s1] sm:$0xff] %vm104_vm7, %v103_v32  }
  0x84   :  { %127 = vst.msk [vmem:[%s602_s1] sm:$0xff] %vm126_vm8, %v125_v27  }
  0x85   :  { %149 = vst.msk [vmem:[%s602_s1] sm:$0xff] %vm148_vm9, %v147_v30  }
  0x88   :  { %v169_v34 = vpop.permute.xlu0 %168  }
  0x89   :  { %171 = vst.msk [vmem:[%s602_s1] sm:$0xff] %vm170_vm10, %v169_v34  }
  0x8a   :  { %v191_v35 = vpop.permute.xlu1 %190   ;;  %v279_v36 = vpop.permute.xlu2 %278  }
  0x8b   :  { %193 = vst.msk [vmem:[%s602_s1] sm:$0xff] %vm192_vm11, %v191_v35  }
  0x8c   :  { %215 = vst.msk [vmem:[%s602_s1] sm:$0xff] %vm214_vm12, %v213_v33  }
  0x90   :  { %v235_v37 = vpop.permute.xlu0 %234  }
  0x91   :  { %237 = vst.msk [vmem:[%s602_s1] sm:$0xff] %vm236_vm13, %v235_v37  }
  0x92   :  { %v257_v38 = vpop.permute.xlu1 %256  }
  0x93   :  { %259 = vst.msk [vmem:[%s602_s1] sm:$0xff] %vm258_vm14, %v257_v38  }
  0x94   :  { %281 = vst.msk [vmem:[%s602_s1] sm:$0xff] %vm280_vm15, %v279_v36  }

// kernel: tile.49
= control target key start
LH: loop header
LB: loop body
LE: loop exit
PB: predicated region body
PF: predicated region fallthrough
CT: control target
= control target key end

     0   :  { %vm91_vm0 = vcmask 1041409   ;;  %vm95_vm1 = vcmask 1042434   ;;  %vm99_vm2 = vcmask 1043459   ;;  %vm103_vm3 = vcmask 1044484   ;;  %s2045_s25 = smov 112   ;;  %s2046_s3 = smov 96   ;;  %s3745_s0 = inlined_call_operand.vmem [shape: f32[26,16,16], index: 0, kind: input, shape index: {}]   ;;  %s3746_s1 = inlined_call_operand.vmem [shape: f32[416,16], index: 1, kind: output, shape index: {}]  }
   0x1   :  { %vm107_vm4 = vcmask 1045509   ;;  %v1666_v0 = vld [vmem:[%s3745_s0 + $0xf] sm:$0x1]   ;;  %vm111_vm5 = vcmask 1046534   ;;  %vm115_vm6 = vcmask 1047559   ;;  %s2047_s18 = smov 80  }
   0x2   :  { %v1667_v1 = vld [vmem:[%s3745_s0 + $0x2e] sm:$0x2]   ;;  %v1649_v9 = vld [vmem:[%s3745_s0 + $0x7] sm:$0x1]   ;;  %v1710_v52 = vld [vmem:[%s3745_s0 + $0x106] sm:$0x1]  }
   0x3   :  { %v1668_v2 = vld [vmem:[%s3745_s0 + $0x4d] sm:$0x4]   ;;  %v161_v4 = vsel %vm91_vm0, %v1667_v1, %v1666_v0  ;;  %v1650_v10 = vld [vmem:[%s3745_s0 + $0x26] sm:$0x2]   ;;  %v1711_v53 = vld [vmem:[%s3745_s0 + $0x125] sm:$0x2]  }
   0x4   :  { %v1669_v3 = vld [vmem:[%s3745_s0 + $0x6c] sm:$0x8]   ;;  %v165_v7 = vsel %vm95_vm1, %v1668_v2, %v161_v4  ;;  %v92_v12 = vsel %vm91_vm0, %v1650_v10, %v1649_v9  ;;  %v1651_v13 = vld [vmem:[%s3745_s0 + $0x45] sm:$0x4]   ;;  %v335_v56 = vsel %vm91_vm0, %v1711_v53, %v1710_v52  ;;  %v1712_v57 = vld [vmem:[%s3745_s0 + $0x144] sm:$0x4]  }
   0x5   :  { %v1670_v5 = vld [vmem:[%s3745_s0 + $0x8b] sm:$0x10]   ;;  %v169_v11 = vsel %vm99_vm2, %v1669_v3, %v165_v7  ;;  %v1652_v14 = vld [vmem:[%s3745_s0 + $0x64] sm:$0x8]   ;;  %v96_v18 = vsel %vm95_vm1, %v1651_v13, %v92_v12  ;;  %v1713_v58 = vld [vmem:[%s3745_s0 + $0x163] sm:$0x8]   ;;  %v339_v62 = vsel %vm95_vm1, %v1712_v57, %v335_v56 }
   0x6   :  { %v1671_v6 = vld [vmem:[%s3745_s0 + $0xaa] sm:$0x20]   ;;  %v1653_v15 = vld [vmem:[%s3745_s0 + $0x83] sm:$0x10]   ;;  %v173_v16 = vsel %vm103_vm3, %v1670_v5, %v169_v11  ;;  %v100_v22 = vsel %vm99_vm2, %v1652_v14, %v96_v18  ;;  %v1714_v59 = vld [vmem:[%s3745_s0 + $0x182] sm:$0x10]   ;;  %v343_v2 = vsel %vm99_vm2, %v1713_v58, %v339_v62 }
   0x7   :  { %v1672_v8 = vld [vmem:[%s3745_s0 + $0xc9] sm:$0x40]   ;;  %v1654_v19 = vld [vmem:[%s3745_s0 + $0xa2] sm:$0x20]   ;;  %v177_v21 = vsel %vm107_vm4, %v1671_v6, %v173_v16  ;;  %v104_v27 = vsel %vm103_vm3, %v1653_v15, %v100_v22  ;;  %v1715_v63 = vld [vmem:[%s3745_s0 + $0x1a1] sm:$0x20]   ;;  %v347_v7 = vsel %vm103_vm3, %v1714_v59, %v343_v2 }
   0x8   :  { %v1673_v17 = vld [vmem:[%s3745_s0 + $0xe8] sm:$0x80]   ;;  %v1655_v20 = vld [vmem:[%s3745_s0 + $0xc1] sm:$0x40]   ;;  %v181_v26 = vsel %vm111_vm5, %v1672_v8, %v177_v21  ;;  %v108_v33 = vsel %vm107_vm4, %v1654_v19, %v104_v27  ;;  %v1702_v3 = vld [vmem:[%s3745_s0 + $0x6] sm:$0x1]   ;;  %v351_v12 = vsel %vm107_vm4, %v1715_v63, %v347_v7 }
   0x9   :  { %v1675_v23 = vld [vmem:[%s3745_s0 + $0x10f] sm:$0x1]   ;;  %v1656_v28 = vld [vmem:[%s3745_s0 + $0xe0] sm:$0x80]   ;;  %v185_v32 = vsel %vm115_vm6, %v1673_v17, %v181_v26  ;;  %v112_v38 = vsel %vm111_vm5, %v1655_v20, %v108_v33  ;;  %v1703_v4 = vld [vmem:[%s3745_s0 + $0x25] sm:$0x2]  }
   0xa   :  { %v1676_v24 = vld [vmem:[%s3745_s0 + $0x12e] sm:$0x2]   ;;  %v1657_v37 = vld [vmem:[%s3745_s0 + $0x107] sm:$0x1]   ;;  %186 = vrot.lane.b32.xlu1 %v185_v32, %s2045_s25  ;;  %v116_v43 = vsel %vm115_vm6, %v1656_v28, %v112_v38  ;;  %v1704_v5 = vld [vmem:[%s3745_s0 + $0x44] sm:$0x4]   ;;  %v301_v8 = vsel %vm91_vm0, %v1703_v4, %v1702_v3 }
   0xb   :  { %v1677_v25 = vld [vmem:[%s3745_s0 + $0x14d] sm:$0x4]   ;;  %v196_v29 = vsel %vm91_vm0, %v1676_v24, %v1675_v23  ;;  %v1658_v40 = vld [vmem:[%s3745_s0 + $0x126] sm:$0x2]   ;;  %117 = vrot.lane.b32.xlu0 %v116_v43, %s2045_s25  ;;  %v1705_v9 = vld [vmem:[%s3745_s0 + $0x63] sm:$0x8]   ;;  %v305_v14 = vsel %vm95_vm1, %v1704_v5, %v301_v8 }
   0xc   :  { %v1678_v30 = vld [vmem:[%s3745_s0 + $0x16c] sm:$0x8]   ;;  %v200_v34 = vsel %vm95_vm1, %v1677_v25, %v196_v29  ;;  %v1659_v41 = vld [vmem:[%s3745_s0 + $0x145] sm:$0x4]   ;;  %v126_v46 = vsel %vm91_vm0, %v1658_v40, %v1657_v37  ;;  %v1706_v10 = vld [vmem:[%s3745_s0 + $0x82] sm:$0x10]   ;;  %v309_v17 = vsel %vm99_vm2, %v1705_v9, %v305_v14 }
   0xd   :  { %v1679_v31 = vld [vmem:[%s3745_s0 + $0x18b] sm:$0x10]   ;;  %v204_v39 = vsel %vm99_vm2, %v1678_v30, %v200_v34  ;;  %v1660_v42 = vld [vmem:[%s3745_s0 + $0x164] sm:$0x8]   ;;  %v130_v50 = vsel %vm95_vm1, %v1659_v41, %v126_v46  ;;  %v1716_v13 = vld [vmem:[%s3745_s0 + $0x1c0] sm:$0x40]   ;;  %v313_v21 = vsel %vm103_vm3, %v1706_v10, %v309_v17 }
   0xe   :  { %v1680_v35 = vld [vmem:[%s3745_s0 + $0x1aa] sm:$0x20]   ;;  %v208_v44 = vsel %vm103_vm3, %v1679_v31, %v204_v39  ;;  %v1661_v47 = vld [vmem:[%s3745_s0 + $0x183] sm:$0x10]   ;;  %v134_v55 = vsel %vm99_vm2, %v1660_v42, %v130_v50  ;;  %v1707_v15 = vld [vmem:[%s3745_s0 + $0xa1] sm:$0x20]   ;;  %v355_v25 = vsel %vm111_vm5, %v1716_v13, %v351_v12 }
   0xf   :  { %v1681_v36 = vld [vmem:[%s3745_s0 + $0x1c9] sm:$0x40]   ;;  %v1662_v48 = vld [vmem:[%s3745_s0 + $0x1a2] sm:$0x20]   ;;  %v212_v49 = vsel %vm107_vm4, %v1680_v35, %v208_v44  ;;  %v138_v60 = vsel %vm103_vm3, %v1661_v47, %v134_v55  ;;  %v1737_v16 = vld [vmem:[%s3745_s0 + $0x16] sm:$0x1]   ;;  %v317_v27 = vsel %vm107_vm4, %v1707_v15, %v313_v21 }
  0x10   :  { %v1682_v45 = vld [vmem:[%s3745_s0 + $0x1e8] sm:$0x80]   ;;  %v1663_v51 = vld [vmem:[%s3745_s0 + $0x1c1] sm:$0x40]   ;;  %v216_v54 = vsel %vm111_vm5, %v1681_v36, %v212_v49  ;;  %v142_v1 = vsel %vm107_vm4, %v1662_v48, %v138_v60  ;;  %v1738_v18 = vld [vmem:[%s3745_s0 + $0x35] sm:$0x2]  }
  0x11   :  { %v1664_v61 = vld [vmem:[%s3745_s0 + $0x1e0] sm:$0x80]   ;;  %v220_v0 = vsel %vm115_vm6, %v1682_v45, %v216_v54  ;;  %v146_v6 = vsel %vm111_vm5, %v1663_v51, %v142_v1  ;;  %v1739_v19 = vld [vmem:[%s3745_s0 + $0x54] sm:$0x4]   ;;  %v1708_v22 = vld [vmem:[%s3745_s0 + $0xc0] sm:$0x40]   ;;  %v440_v23 = vsel %vm91_vm0, %v1738_v18, %v1737_v16 }
  0x12   :  { %v150_v11 = vsel %vm115_vm6, %v1664_v61, %v146_v6  ;;  %221 = vrot.lane.b32.xlu1 %v220_v0, %s2045_s25  ;;  %v1740_v20 = vld [vmem:[%s3745_s0 + $0x73] sm:$0x8]   ;;  %v1717_v26 = vld [vmem:[%s3745_s0 + $0x1df] sm:$0x80]   ;;  %v444_v28 = vsel %vm95_vm1, %v1739_v19, %v440_v23  ;;  %v1728_v29 = vld [vmem:[%s3745_s0 + $0x10e] sm:$0x1]   ;;  %v321_v36 = vsel %vm111_vm5, %v1708_v22, %v317_v27 }
  0x13   :  { %v1741_v24 = vld [vmem:[%s3745_s0 + $0x92] sm:$0x10]   ;;  %151 = vrot.lane.b32.xlu0 %v150_v11, %s2045_s25  ;;  %v1729_v30 = vld [vmem:[%s3745_s0 + $0x12d] sm:$0x2]   ;;  %v448_v31 = vsel %vm99_vm2, %v1740_v20, %v444_v28  ;;  %v1709_v37 = vld [vmem:[%s3745_s0 + $0xdf] sm:$0x80]   ;;  %v359_v41 = vsel %vm115_vm6, %v1717_v26, %v355_v25 }
  0x14   :  { %v405_v32 = vsel %vm91_vm0, %v1729_v30, %v1728_v29  ;;  %v1730_v33 = vld [vmem:[%s3745_s0 + $0x14c] sm:$0x4]   ;;  %v452_v38 = vsel %vm103_vm3, %v1741_v24, %v448_v31  ;;  %v1742_v39 = vld [vmem:[%s3745_s0 + $0xb1] sm:$0x20]   ;;  %v1684_v44 = vld [vmem:[%s3745_s0 + $0x17] sm:$0x1]   ;;  %v325_v52 = vsel %vm115_vm6, %v1709_v37, %v321_v36 }
  0x15   :  { %v1731_v34 = vld [vmem:[%s3745_s0 + $0x16b] sm:$0x8]   ;;  %v409_v40 = vsel %vm95_vm1, %v1730_v33, %v405_v32  ;;  %v1743_v42 = vld [vmem:[%s3745_s0 + $0xd0] sm:$0x40]   ;;  %v1685_v45 = vld [vmem:[%s3745_s0 + $0x36] sm:$0x2]   ;;  %v456_v53 = vsel %vm107_vm4, %v1742_v39, %v452_v38 }
  0x16   :  { %v1732_v35 = vld [vmem:[%s3745_s0 + $0x18a] sm:$0x10]   ;;  %v413_v43 = vsel %vm99_vm2, %v1731_v34, %v409_v40  ;;  %v1686_v46 = vld [vmem:[%s3745_s0 + $0x55] sm:$0x4]   ;;  %v231_v49 = vsel %vm91_vm0, %v1685_v45, %v1684_v44  ;;  %v1763_v57 = vld [vmem:[%s3745_s0 + $0x105] sm:$0x1]   ;;  %v460_v4 = vsel %vm111_vm5, %v1743_v42, %v456_v53 }
  0x17   :  { %v417_v47 = vsel %vm103_vm3, %v1732_v35, %v413_v43  ;;  %v1733_v48 = vld [vmem:[%s3745_s0 + $0x1a9] sm:$0x20]   ;;  %v1687_v50 = vld [vmem:[%s3745_s0 + $0x74] sm:$0x8]   ;;  %v235_v54 = vsel %vm95_vm1, %v1686_v46, %v231_v49  ;;  %v1764_v59 = vld [vmem:[%s3745_s0 + $0x124] sm:$0x2]  }
  0x18   :  { %v1688_v51 = vld [vmem:[%s3745_s0 + $0x93] sm:$0x10]   ;;  %v239_v58 = vsel %vm99_vm2, %v1687_v50, %v235_v54  ;;  %v1765_v60 = vld [vmem:[%s3745_s0 + $0x143] sm:$0x4]   ;;  %v421_v62 = vsel %vm107_vm4, %v1733_v48, %v417_v47  ;;  %v1734_v63 = vld [vmem:[%s3745_s0 + $0x1c8] sm:$0x40]   ;;  %v544_v2 = vsel %vm91_vm0, %v1764_v59, %v1763_v57 }
  0x19   :  { %v1689_v55 = vld [vmem:[%s3745_s0 + $0xb2] sm:$0x20]   ;;  %v1766_v61 = vld [vmem:[%s3745_s0 + $0x162] sm:$0x8]   ;;  %v243_v0 = vsel %vm103_vm3, %v1688_v51, %v239_v58  ;;  %v1744_v5 = vld [vmem:[%s3745_s0 + $0xef] sm:$0x80]   ;;  %v548_v7 = vsel %vm95_vm1, %v1765_v60, %v544_v2  ;;  %v425_v16 = vsel %vm111_vm5, %v1734_v63, %v421_v62 }
  0x1a   :  { %v1690_v56 = vld [vmem:[%s3745_s0 + $0xd1] sm:$0x40]   ;;  %360 = vrot.lane.b32.xlu1 %v359_v41, %s2046_s3  ;;  %v1767_v3 = vld [vmem:[%s3745_s0 + $0x181] sm:$0x10]   ;;  %v247_v6 = vsel %vm107_vm4, %v1689_v55, %v243_v0  ;;  %v552_v11 = vsel %vm99_vm2, %v1766_v61, %v548_v7  ;;  %v1735_v17 = vld [vmem:[%s3745_s0 + $0x1e7] sm:$0x80]   ;;  %v464_v22 = vsel %vm115_vm6, %v1744_v5, %v460_v4 }
  0x1b   :  { %v1691_v1 = vld [vmem:[%s3745_s0 + $0xf0] sm:$0x80]   ;;  %326 = vrot.lane.b32.xlu0 %v325_v52, %s2046_s3  ;;  %v1755_v8 = vld [vmem:[%s3745_s0 + $0x5] sm:$0x1]   ;;  %v251_v10 = vsel %vm111_vm5, %v1690_v56, %v247_v6  ;;  %v556_v19 = vsel %vm103_vm3, %v1767_v3, %v552_v11  ;;  %v429_v33 = vsel %vm115_vm6, %v1735_v17, %v425_v16  ;;  %v1790_v38 = vld [vmem:[%s3745_s0 + $0x15] sm:$0x1]  }
  0x1c   :  { %v1756_v9 = vld [vmem:[%s3745_s0 + $0x24] sm:$0x2]   ;;  %v255_v18 = vsel %vm115_vm6, %v1691_v1, %v251_v10  ;;  %v1693_v25 = vld [vmem:[%s3745_s0 + $0x117] sm:$0x1]   ;;  %v1791_v40 = vld [vmem:[%s3745_s0 + $0x34] sm:$0x2]  }
  0x1d   :  { %v510_v12 = vsel %vm91_vm0, %v1756_v9, %v1755_v8  ;;  %v1757_v13 = vld [vmem:[%s3745_s0 + $0x43] sm:$0x4]   ;;  %256 = vrot.lane.b32.xlu2 %v255_v18, %s2045_s25  ;;  %v1694_v26 = vld [vmem:[%s3745_s0 + $0x136] sm:$0x2]   ;;  %v1792_v41 = vld [vmem:[%s3745_s0 + $0x53] sm:$0x4]   ;;  %v649_v47 = vsel %vm91_vm0, %v1791_v40, %v1790_v38 }
  0x1e   :  { %v1758_v14 = vld [vmem:[%s3745_s0 + $0x62] sm:$0x8]   ;;  %v514_v21 = vsel %vm95_vm1, %v1757_v13, %v510_v12  ;;  %v1695_v27 = vld [vmem:[%s3745_s0 + $0x155] sm:$0x4]   ;;  %v266_v30 = vsel %vm91_vm0, %v1694_v26, %v1693_v25  ;;  %v1793_v42 = vld [vmem:[%s3745_s0 + $0x72] sm:$0x8]   ;;  %v653_v52 = vsel %vm95_vm1, %v1792_v41, %v649_v47 }
  0x1f   :  { %v1759_v15 = vld [vmem:[%s3745_s0 + $0x81] sm:$0x10]   ;;  %v518_v24 = vsel %vm99_vm2, %v1758_v14, %v514_v21  ;;  %v1696_v31 = vld [vmem:[%s3745_s0 + $0x174] sm:$0x8]   ;;  %v270_v35 = vsel %vm95_vm1, %v1695_v27, %v266_v30  ;;  %v1794_v48 = vld [vmem:[%s3745_s0 + $0x91] sm:$0x10]   ;;  %v657_v56 = vsel %vm99_vm2, %v1793_v42, %v653_v52 }
  0x20   :  { %v1768_v20 = vld [vmem:[%s3745_s0 + $0x1a0] sm:$0x20]   ;;  %v522_v28 = vsel %vm103_vm3, %v1759_v15, %v518_v24  ;;  %v1697_v32 = vld [vmem:[%s3745_s0 + $0x193] sm:$0x10]   ;;  %v274_v39 = vsel %vm99_vm2, %v1696_v31, %v270_v35  ;;  %v1781_v53 = vld [vmem:[%s3745_s0 + $0x10d] sm:$0x1]   ;;  %v661_v0 = vsel %vm103_vm3, %v1794_v48, %v657_v56 }
  0x21   :  { %v1769_v23 = vld [vmem:[%s3745_s0 + $0x1bf] sm:$0x40]   ;;  %v560_v34 = vsel %vm107_vm4, %v1768_v20, %v556_v19  ;;  %v1698_v36 = vld [vmem:[%s3745_s0 + $0x1b2] sm:$0x20]   ;;  %v278_v45 = vsel %vm103_vm3, %v1697_v32, %v274_v39  ;;  %v1782_v54 = vld [vmem:[%s3745_s0 + $0x12c] sm:$0x2]  }
  0x22   :  { %v1760_v29 = vld [vmem:[%s3745_s0 + $0xa0] sm:$0x20]   ;;  %v1699_v37 = vld [vmem:[%s3745_s0 + $0x1d1] sm:$0x40]   ;;  %465 = vrot.lane.b32.xlu1 %v464_v22, %s2046_s3  ;;  %v564_v49 = vsel %vm111_vm5, %v1769_v23, %v560_v34  ;;  %v282_v51 = vsel %vm107_vm4, %v1698_v36, %v278_v45  ;;  %v614_v57 = vsel %vm91_vm0, %v1782_v54, %v1781_v53  ;;  %v1783_v58 = vld [vmem:[%s3745_s0 + $0x14b] sm:$0x4]  }
  0x23   :  { %v526_v43 = vsel %vm107_vm4, %v1760_v29, %v522_v28  ;;  %v1761_v44 = vld [vmem:[%s3745_s0 + $0xbf] sm:$0x40]   ;;  %v1700_v46 = vld [vmem:[%s3745_s0 + $0x1f0] sm:$0x80]   ;;  %430 = vrot.lane.b32.xlu0 %v429_v33, %s2046_s3  ;;  %v286_v55 = vsel %vm111_vm5, %v1699_v37, %v282_v51  ;;  %v1784_v59 = vld [vmem:[%s3745_s0 + $0x16a] sm:$0x8]   ;;  %v618_v2 = vsel %vm95_vm1, %v1783_v58, %v614_v57 }
  0x24   :  { %v1770_v50 = vld [vmem:[%s3745_s0 + $0x1de] sm:$0x80]   ;;  %v1785_v60 = vld [vmem:[%s3745_s0 + $0x189] sm:$0x10]   ;;  %v530_v61 = vsel %vm111_vm5, %v1761_v44, %v526_v43  ;;  %v290_v63 = vsel %vm115_vm6, %v1700_v46, %v286_v55  ;;  %v1795_v1 = vld [vmem:[%s3745_s0 + $0xb0] sm:$0x20]   ;;  %v622_v5 = vsel %vm99_vm2, %v1784_v59, %v618_v2 }
  0x25   :  { %v1762_v62 = vld [vmem:[%s3745_s0 + $0xde] sm:$0x80]   ;;  %v568_v3 = vsel %vm115_vm6, %v1770_v50, %v564_v49  ;;  %291 = vrot.lane.b32.xlu2 %v290_v63, %s2045_s25  ;;  %v1796_v4 = vld [vmem:[%s3745_s0 + $0xcf] sm:$0x40]   ;;  %v1719_v6 = vld [vmem:[%s3745_s0 + $0xe] sm:$0x1]   ;;  %v626_v9 = vsel %vm103_vm3, %v1785_v60, %v622_v5  ;;  %v665_v15 = vsel %vm107_vm4, %v1795_v1, %v661_v0 }
  0x26   :  { %v1720_v7 = vld [vmem:[%s3745_s0 + $0x2d] sm:$0x2]   ;;  %v1786_v10 = vld [vmem:[%s3745_s0 + $0x1a8] sm:$0x20]   ;;  %v534_v14 = vsel %vm115_vm6, %v1762_v62, %v530_v61  ;;  %v1816_v21 = vld [vmem:[%s3745_s0 + $0x104] sm:$0x1]   ;;  %v669_v30 = vsel %vm111_vm5, %v1796_v4, %v665_v15 }
  0x27   :  { %v1721_v8 = vld [vmem:[%s3745_s0 + $0x4c] sm:$0x4]   ;;  %v370_v11 = vsel %vm91_vm0, %v1720_v7, %v1719_v6  ;;  %v1787_v16 = vld [vmem:[%s3745_s0 + $0x1c7] sm:$0x40]   ;;  %v1817_v22 = vld [vmem:[%s3745_s0 + $0x123] sm:$0x2]   ;;  %v630_v24 = vsel %vm107_vm4, %v1786_v10, %v626_v9 }
  0x28   :  { %v1722_v12 = vld [vmem:[%s3745_s0 + $0x6b] sm:$0x8]   ;;  %v374_v17 = vsel %vm95_vm1, %v1721_v8, %v370_v11  ;;  %v1818_v23 = vld [vmem:[%s3745_s0 + $0x142] sm:$0x4]   ;;  %v753_v27 = vsel %vm91_vm0, %v1817_v22, %v1816_v21  ;;  %v1797_v31 = vld [vmem:[%s3745_s0 + $0xee] sm:$0x80]   ;;  %v634_v40 = vsel %vm111_vm5, %v1787_v16, %v630_v24 }
  0x29   :  { %v1723_v13 = vld [vmem:[%s3745_s0 + $0x8a] sm:$0x10]   ;;  %v378_v20 = vsel %vm99_vm2, %v1722_v12, %v374_v17  ;;  %v1819_v28 = vld [vmem:[%s3745_s0 + $0x161] sm:$0x8]   ;;  %v757_v33 = vsel %vm95_vm1, %v1818_v23, %v753_v27  ;;  %v1788_v41 = vld [vmem:[%s3745_s0 + $0x1e6] sm:$0x80]   ;;  %v673_v47 = vsel %vm115_vm6, %v1797_v31, %v669_v30 }
  0x2a   :  { %v1724_v18 = vld [vmem:[%s3745_s0 + $0xa9] sm:$0x20]   ;;  %569 = vrot.lane.b32.xlu1 %v568_v3, %s2047_s18  ;;  %v382_v25 = vsel %vm103_vm3, %v1723_v13, %v378_v20  ;;  %v1820_v29 = vld [vmem:[%s3745_s0 + $0x180] sm:$0x10]   ;;  %v761_v36 = vsel %vm99_vm2, %v1819_v28, %v757_v33  ;;  %v1746_v51 = vld [vmem:[%s3745_s0 + $0x116] sm:$0x1]   ;;  %v638_v58 = vsel %vm115_vm6, %v1788_v41, %v634_v40 }
  0x2b   :  { %v1725_v19 = vld [vmem:[%s3745_s0 + $0xc8] sm:$0x40]   ;;  %535 = vrot.lane.b32.xlu0 %v534_v14, %s2047_s18  ;;  %v386_v32 = vsel %vm107_vm4, %v1724_v18, %v382_v25  ;;  %v1808_v34 = vld [vmem:[%s3745_s0 + $0x4] sm:$0x1]   ;;  %v765_v43 = vsel %vm103_vm3, %v1820_v29, %v761_v36  ;;  %v1747_v52 = vld [vmem:[%s3745_s0 + $0x135] sm:$0x2]  }
  0x2c   :  { %v1726_v26 = vld [vmem:[%s3745_s0 + $0xe7] sm:$0x80]   ;;  %v390_v35 = vsel %vm111_vm5, %v1725_v19, %v386_v32  ;;  %v1809_v37 = vld [vmem:[%s3745_s0 + $0x23] sm:$0x2]   ;;  %v475_v54 = vsel %vm91_vm0, %v1747_v52, %v1746_v51  ;;  %v1748_v55 = vld [vmem:[%s3745_s0 + $0x154] sm:$0x4]  }
  0x2d   :  { %v1810_v38 = vld [vmem:[%s3745_s0 + $0x42] sm:$0x4]   ;;  %v394_v42 = vsel %vm115_vm6, %v1726_v26, %v390_v35  ;;  %v719_v45 = vsel %vm91_vm0, %v1809_v37, %v1808_v34  ;;  %v1749_v56 = vld [vmem:[%s3745_s0 + $0x173] sm:$0x8]   ;;  %v479_v62 = vsel %vm95_vm1, %v1748_v55, %v475_v54  ;;  %v1843_v2 = vld [vmem:[%s3745_s0 + $0x14] sm:$0x1]  }
  0x2e   :  { %v1811_v39 = vld [vmem:[%s3745_s0 + $0x61] sm:$0x8]   ;;  %395 = vrot.lane.b32.xlu2 %v394_v42, %s2046_s3  ;;  %v723_v49 = vsel %vm95_vm1, %v1810_v38, %v719_v45  ;;  %v1750_v57 = vld [vmem:[%s3745_s0 + $0x192] sm:$0x10]   ;;  %v483_v1 = vsel %vm99_vm2, %v1749_v56, %v479_v62  ;;  %v1844_v3 = vld [vmem:[%s3745_s0 + $0x33] sm:$0x2]  }
  0x2f   :  { %v1821_v44 = vld [vmem:[%s3745_s0 + $0x19f] sm:$0x20]   ;;  %v727_v53 = vsel %vm99_vm2, %v1811_v39, %v723_v49  ;;  %v1751_v63 = vld [vmem:[%s3745_s0 + $0x1b1] sm:$0x20]   ;;  %v1845_v4 = vld [vmem:[%s3745_s0 + $0x52] sm:$0x4]   ;;  %v487_v6 = vsel %vm103_vm3, %v1750_v57, %v483_v1  ;;  %v858_v8 = vsel %vm91_vm0, %v1844_v3, %v1843_v2 }
  0x30   :  { %v1812_v46 = vld [vmem:[%s3745_s0 + $0x80] sm:$0x10]   ;;  %v769_v59 = vsel %vm107_vm4, %v1821_v44, %v765_v43  ;;  %v1752_v0 = vld [vmem:[%s3745_s0 + $0x1d0] sm:$0x40]   ;;  %v1846_v9 = vld [vmem:[%s3745_s0 + $0x71] sm:$0x8]   ;;  %v491_v13 = vsel %vm107_vm4, %v1751_v63, %v487_v6  ;;  %v862_v14 = vsel %vm95_vm1, %v1845_v4, %v858_v8 }
  0x31   :  { %v1822_v48 = vld [vmem:[%s3745_s0 + $0x1be] sm:$0x40]   ;;  %v731_v60 = vsel %vm103_vm3, %v1812_v46, %v727_v53  ;;  %v1753_v7 = vld [vmem:[%s3745_s0 + $0x1ef] sm:$0x80]   ;;  %v1847_v10 = vld [vmem:[%s3745_s0 + $0x90] sm:$0x10]   ;;  %v495_v16 = vsel %vm111_vm5, %v1752_v0, %v491_v13  ;;  %v866_v17 = vsel %vm99_vm2, %v1846_v9, %v862_v14 }
  0x32   :  { %v1813_v50 = vld [vmem:[%s3745_s0 + $0x9f] sm:$0x20]   ;;  %674 = vrot.lane.b32.xlu1 %v673_v47, %s2047_s18  ;;  %v773_v11 = vsel %vm111_vm5, %v1822_v48, %v769_v59  ;;  %v1834_v15 = vld [vmem:[%s3745_s0 + $0x10c] sm:$0x1]   ;;  %v499_v23 = vsel %vm115_vm6, %v1753_v7, %v495_v16  ;;  %v870_v24 = vsel %vm103_vm3, %v1847_v10, %v866_v17  ;;  %v1848_v25 = vld [vmem:[%s3745_s0 + $0xaf] sm:$0x20]  }
  0x33   :  { %v1814_v61 = vld [vmem:[%s3745_s0 + $0xbe] sm:$0x40]   ;;  %v735_v5 = vsel %vm107_vm4, %v1813_v50, %v731_v60  ;;  %639 = vrot.lane.b32.xlu0 %v638_v58, %s2047_s18  ;;  %v1835_v18 = vld [vmem:[%s3745_s0 + $0x12b] sm:$0x2]   ;;  %v1849_v29 = vld [vmem:[%s3745_s0 + $0xce] sm:$0x40]   ;;  %v874_v40 = vsel %vm107_vm4, %v1848_v25, %v870_v24 }
  0x34   :  { %v1823_v12 = vld [vmem:[%s3745_s0 + $0x1dd] sm:$0x80]   ;;  %v1836_v19 = vld [vmem:[%s3745_s0 + $0x14a] sm:$0x4]   ;;  %v739_v21 = vsel %vm111_vm5, %v1814_v61, %v735_v5  ;;  %v823_v26 = vsel %vm91_vm0, %v1835_v18, %v1834_v15  ;;  %v1772_v32 = vld [vmem:[%s3745_s0 + $0xd] sm:$0x1]   ;;  %v878_v56 = vsel %vm111_vm5, %v1849_v29, %v874_v40 }
  0x35   :  { %v1837_v20 = vld [vmem:[%s3745_s0 + $0x169] sm:$0x8]   ;;  %v1815_v22 = vld [vmem:[%s3745_s0 + $0xdd] sm:$0x80]   ;;  %v777_v28 = vsel %vm115_vm6, %v1823_v12, %v773_v11  ;;  %v827_v30 = vsel %vm95_vm1, %v1836_v19, %v823_v26  ;;  %v1773_v33 = vld [vmem:[%s3745_s0 + $0x2c] sm:$0x2]  }
  0x36   :  { %v1838_v27 = vld [vmem:[%s3745_s0 + $0x188] sm:$0x10]   ;;  %500 = vrot.lane.b32.xlu2 %v499_v23, %s2046_s3  ;;  %v831_v34 = vsel %vm99_vm2, %v1837_v20, %v827_v30  ;;  %v579_v35 = vsel %vm91_vm0, %v1773_v33, %v1772_v32  ;;  %v1774_v36 = vld [vmem:[%s3745_s0 + $0x4b] sm:$0x4]   ;;  %v743_v39 = vsel %vm115_vm6, %v1815_v22, %v739_v21  ;;  %s2048_s5 = smov 64   ;;  %s2049_s20 = smov 48  }
  0x37   :  { %v1839_v31 = vld [vmem:[%s3745_s0 + $0x1a7] sm:$0x20]   ;;  %v1775_v37 = vld [vmem:[%s3745_s0 + $0x6a] sm:$0x8]   ;;  %v835_v41 = vsel %vm103_vm3, %v1838_v27, %v831_v34  ;;  %v583_v43 = vsel %vm95_vm1, %v1774_v36, %v579_v35  ;;  %v1869_v47 = vld [vmem:[%s3745_s0 + $0x103] sm:$0x1]  }
  0x38   :  { %v1776_v38 = vld [vmem:[%s3745_s0 + $0x89] sm:$0x10]   ;;  %v1840_v42 = vld [vmem:[%s3745_s0 + $0x1c6] sm:$0x40]   ;;  %v587_v46 = vsel %vm99_vm2, %v1775_v37, %v583_v43  ;;  %v1870_v48 = vld [vmem:[%s3745_s0 + $0x122] sm:$0x2]   ;;  %v839_v50 = vsel %vm107_vm4, %v1839_v31, %v835_v41 }
  0x39   :  { %v1777_v44 = vld [vmem:[%s3745_s0 + $0xa8] sm:$0x20]   ;;  %v1871_v49 = vld [vmem:[%s3745_s0 + $0x141] sm:$0x4]   ;;  %v591_v51 = vsel %vm103_vm3, %v1776_v38, %v587_v46  ;;  %v962_v53 = vsel %vm91_vm0, %v1870_v48, %v1869_v47  ;;  %v1850_v57 = vld [vmem:[%s3745_s0 + $0xed] sm:$0x80]   ;;  %v843_v2 = vsel %vm111_vm5, %v1840_v42, %v839_v50 }
  0x3a   :  { %v1778_v45 = vld [vmem:[%s3745_s0 + $0xc7] sm:$0x40]   ;;  %778 = vrot.lane.b32.xlu1 %v777_v28, %s2048_s5  ;;  %v1872_v54 = vld [vmem:[%s3745_s0 + $0x160] sm:$0x8]   ;;  %v595_v58 = vsel %vm107_vm4, %v1777_v44, %v591_v51  ;;  %v966_v59 = vsel %vm95_vm1, %v1871_v49, %v962_v53  ;;  %v1841_v3 = vld [vmem:[%s3745_s0 + $0x1e5] sm:$0x80]   ;;  %v882_v9 = vsel %vm115_vm6, %v1850_v57, %v878_v56 }
  0x3b   :  { %v1779_v52 = vld [vmem:[%s3745_s0 + $0xe6] sm:$0x80]   ;;  %v1873_v55 = vld [vmem:[%s3745_s0 + $0x17f] sm:$0x10]   ;;  %744 = vrot.lane.b32.xlu0 %v743_v39, %s2048_s5  ;;  %v599_v61 = vsel %vm111_vm5, %v1778_v45, %v595_v58  ;;  %v970_v62 = vsel %vm99_vm2, %v1872_v54, %v966_v59  ;;  %v1799_v13 = vld [vmem:[%s3745_s0 + $0x115] sm:$0x1]   ;;  %v847_v20 = vsel %vm115_vm6, %v1841_v3, %v843_v2 }
  0x3c   :  { %v1861_v60 = vld [vmem:[%s3745_s0 + $0x3] sm:$0x1]   ;;  %v603_v4 = vsel %vm115_vm6, %v1779_v52, %v599_v61  ;;  %v974_v5 = vsel %vm103_vm3, %v1873_v55, %v970_v62  ;;  %v1800_v14 = vld [vmem:[%s3745_s0 + $0x134] sm:$0x2]   ;;  %v1896_v28 = vld [vmem:[%s3745_s0 + $0x13] sm:$0x1]  }
  0x3d   :  { %v1862_v63 = vld [vmem:[%s3745_s0 + $0x22] sm:$0x2]   ;;  %v684_v16 = vsel %vm91_vm0, %v1800_v14, %v1799_v13  ;;  %v1801_v17 = vld [vmem:[%s3745_s0 + $0x153] sm:$0x4]   ;;  %v1897_v29 = vld [vmem:[%s3745_s0 + $0x32] sm:$0x2]  }
  0x3e   :  { %v1863_v0 = vld [vmem:[%s3745_s0 + $0x41] sm:$0x4]   ;;  %v928_v7 = vsel %vm91_vm0, %v1862_v63, %v1861_v60  ;;  %604 = vrot.lane.b32.xlu2 %v603_v4, %s2047_s18  ;;  %v1802_v18 = vld [vmem:[%s3745_s0 + $0x172] sm:$0x8]   ;;  %v688_v24 = vsel %vm95_vm1, %v1801_v17, %v684_v16  ;;  %v1898_v30 = vld [vmem:[%s3745_s0 + $0x51] sm:$0x4]   ;;  %v1067_v34 = vsel %vm91_vm0, %v1897_v29, %v1896_v28 }
  0x3f   :  { %v1864_v1 = vld [vmem:[%s3745_s0 + $0x60] sm:$0x8]   ;;  %v932_v11 = vsel %vm95_vm1, %v1863_v0, %v928_v7  ;;  %v1803_v19 = vld [vmem:[%s3745_s0 + $0x191] sm:$0x10]   ;;  %v692_v27 = vsel %vm99_vm2, %v1802_v18, %v688_v24  ;;  %v1899_v35 = vld [vmem:[%s3745_s0 + $0x70] sm:$0x8]   ;;  %v1071_v40 = vsel %vm95_vm1, %v1898_v30, %v1067_v34 }
  0x40   :  { %v1874_v6 = vld [vmem:[%s3745_s0 + $0x19e] sm:$0x20]   ;;  %v936_v15 = vsel %vm99_vm2, %v1864_v1, %v932_v11  ;;  %v1804_v25 = vld [vmem:[%s3745_s0 + $0x1b0] sm:$0x20]   ;;  %v696_v32 = vsel %vm103_vm3, %v1803_v19, %v692_v27  ;;  %v1900_v36 = vld [vmem:[%s3745_s0 + $0x8f] sm:$0x10]   ;;  %v1075_v43 = vsel %vm99_vm2, %v1899_v35, %v1071_v40 }
  0x41   :  { %v1865_v8 = vld [vmem:[%s3745_s0 + $0x7f] sm:$0x10]   ;;  %v978_v21 = vsel %vm107_vm4, %v1874_v6, %v974_v5  ;;  %v1805_v26 = vld [vmem:[%s3745_s0 + $0x1cf] sm:$0x40]   ;;  %v700_v39 = vsel %vm107_vm4, %v1804_v25, %v696_v32  ;;  %v1887_v41 = vld [vmem:[%s3745_s0 + $0x10b] sm:$0x1]   ;;  %v1079_v50 = vsel %vm103_vm3, %v1900_v36, %v1075_v43 }
  0x42   :  { %v1875_v10 = vld [vmem:[%s3745_s0 + $0x1bd] sm:$0x40]   ;;  %v940_v22 = vsel %vm103_vm3, %v1865_v8, %v936_v15  ;;  %883 = vrot.lane.b32.xlu1 %v882_v9, %s2048_s5  ;;  %v1806_v33 = vld [vmem:[%s3745_s0 + $0x1ee] sm:$0x80]   ;;  %v704_v42 = vsel %vm111_vm5, %v1805_v26, %v700_v39  ;;  %v1888_v44 = vld [vmem:[%s3745_s0 + $0x12a] sm:$0x2]  }
  0x43   :  { %v1866_v12 = vld [vmem:[%s3745_s0 + $0x9e] sm:$0x20]   ;;  %848 = vrot.lane.b32.xlu0 %v847_v20, %s2048_s5  ;;  %v982_v37 = vsel %vm111_vm5, %v1875_v10, %v978_v21  ;;  %v1889_v45 = vld [vmem:[%s3745_s0 + $0x149] sm:$0x4]   ;;  %v708_v49 = vsel %vm115_vm6, %v1806_v33, %v704_v42  ;;  %v1901_v51 = vld [vmem:[%s3745_s0 + $0xae] sm:$0x20]   ;;  %v1032_v52 = vsel %vm91_vm0, %v1888_v44, %v1887_v41 }
  0x44   :  { %v1867_v23 = vld [vmem:[%s3745_s0 + $0xbd] sm:$0x40]   ;;  %v944_v31 = vsel %vm107_vm4, %v1866_v12, %v940_v22  ;;  %v1890_v46 = vld [vmem:[%s3745_s0 + $0x168] sm:$0x8]   ;;  %v1902_v55 = vld [vmem:[%s3745_s0 + $0xcd] sm:$0x40]   ;;  %v1036_v56 = vsel %vm95_vm1, %v1889_v45, %v1032_v52  ;;  %v1083_v2 = vsel %vm107_vm4, %v1901_v51, %v1079_v50 }
  0x45   :  { %v1876_v38 = vld [vmem:[%s3745_s0 + $0x1dc] sm:$0x80]   ;;  %v948_v47 = vsel %vm111_vm5, %v1867_v23, %v944_v31  ;;  %v1891_v53 = vld [vmem:[%s3745_s0 + $0x187] sm:$0x10]   ;;  %v1825_v58 = vld [vmem:[%s3745_s0 + $0xc] sm:$0x1]   ;;  %v1040_v60 = vsel %vm99_vm2, %v1890_v46, %v1036_v56  ;;  %v1087_v18 = vsel %vm111_vm5, %v1902_v55, %v1083_v2 }
  0x46   :  { %v1868_v48 = vld [vmem:[%s3745_s0 + $0xdc] sm:$0x80]   ;;  %v986_v54 = vsel %vm115_vm6, %v1876_v38, %v982_v37  ;;  %709 = vrot.lane.b32.xlu2 %v708_v49, %s2047_s18  ;;  %v1892_v57 = vld [vmem:[%s3745_s0 + $0x1a6] sm:$0x20]   ;;  %v1826_v59 = vld [vmem:[%s3745_s0 + $0x2b] sm:$0x2]   ;;  %v1044_v3 = vsel %vm103_vm3, %v1891_v53, %v1040_v60 }
  0x47   :  { %v788_v61 = vsel %vm91_vm0, %v1826_v59, %v1825_v58  ;;  %v1827_v62 = vld [vmem:[%s3745_s0 + $0x4a] sm:$0x4]   ;;  %v952_v1 = vsel %vm115_vm6, %v1868_v48, %v948_v47  ;;  %v1893_v4 = vld [vmem:[%s3745_s0 + $0x1c5] sm:$0x40]   ;;  %v1922_v10 = vld [vmem:[%s3745_s0 + $0x102] sm:$0x1]   ;;  %v1048_v12 = vsel %vm107_vm4, %v1892_v57, %v1044_v3 }
  0x48   :  { %v1828_v63 = vld [vmem:[%s3745_s0 + $0x69] sm:$0x8]   ;;  %v792_v5 = vsel %vm95_vm1, %v1827_v62, %v788_v61  ;;  %v1923_v11 = vld [vmem:[%s3745_s0 + $0x121] sm:$0x2]   ;;  %v1903_v19 = vld [vmem:[%s3745_s0 + $0xec] sm:$0x80]   ;;  %v1052_v28 = vsel %vm111_vm5, %v1893_v4, %v1048_v12 }
  0x49   :  { %v1829_v0 = vld [vmem:[%s3745_s0 + $0x88] sm:$0x10]   ;;  %v796_v8 = vsel %vm99_vm2, %v1828_v63, %v792_v5  ;;  %v1171_v14 = vsel %vm91_vm0, %v1923_v11, %v1922_v10  ;;  %v1924_v15 = vld [vmem:[%s3745_s0 + $0x140] sm:$0x4]   ;;  %v1894_v20 = vld [vmem:[%s3745_s0 + $0x1e4] sm:$0x80]   ;;  %v1091_v35 = vsel %vm115_vm6, %v1903_v19, %v1087_v18 }
  0x4a   :  { %v1830_v6 = vld [vmem:[%s3745_s0 + $0xa7] sm:$0x20]   ;;  %987 = vrot.lane.b32.xlu1 %v986_v54, %s2049_s20  ;;  %v800_v13 = vsel %vm103_vm3, %v1829_v0, %v796_v8  ;;  %v1925_v16 = vld [vmem:[%s3745_s0 + $0x15f] sm:$0x8]   ;;  %v1175_v22 = vsel %vm95_vm1, %v1924_v15, %v1171_v14  ;;  %v1852_v39 = vld [vmem:[%s3745_s0 + $0x114] sm:$0x1]   ;;  %v1056_v44 = vsel %vm115_vm6, %v1894_v20, %v1052_v28 }
  0x4b   :  { %v1831_v7 = vld [vmem:[%s3745_s0 + $0xc6] sm:$0x40]   ;;  %v1926_v17 = vld [vmem:[%s3745_s0 + $0x17e] sm:$0x10]   ;;  %953 = vrot.lane.b32.xlu0 %v952_v1, %s2049_s20  ;;  %v804_v21 = vsel %vm107_vm4, %v1830_v6, %v800_v13  ;;  %v1179_v24 = vsel %vm99_vm2, %v1925_v16, %v1175_v22  ;;  %v1853_v41 = vld [vmem:[%s3745_s0 + $0x133] sm:$0x2]  }
  0x4c   :  { %v1832_v9 = vld [vmem:[%s3745_s0 + $0xe5] sm:$0x80]   ;;  %v808_v23 = vsel %vm111_vm5, %v1831_v7, %v804_v21  ;;  %v1914_v25 = vld [vmem:[%s3745_s0 + $0x2] sm:$0x1]   ;;  %v1183_v30 = vsel %vm103_vm3, %v1926_v17, %v1179_v24  ;;  %v1854_v42 = vld [vmem:[%s3745_s0 + $0x152] sm:$0x4]   ;;  %v893_v48 = vsel %vm91_vm0, %v1853_v41, %v1852_v39 }
  0x4d   :  { %v1915_v26 = vld [vmem:[%s3745_s0 + $0x21] sm:$0x2]   ;;  %v812_v29 = vsel %vm115_vm6, %v1832_v9, %v808_v23  ;;  %v1855_v43 = vld [vmem:[%s3745_s0 + $0x171] sm:$0x8]   ;;  %v897_v51 = vsel %vm95_vm1, %v1854_v42, %v893_v48  ;;  %v1949_v53 = vld [vmem:[%s3745_s0 + $0x12] sm:$0x1]  }
  0x4e   :  { %v1916_v27 = vld [vmem:[%s3745_s0 + $0x40] sm:$0x4]   ;;  %v1137_v32 = vsel %vm91_vm0, %v1915_v26, %v1914_v25  ;;  %813 = vrot.lane.b32.xlu2 %v812_v29, %s2048_s5  ;;  %v1856_v49 = vld [vmem:[%s3745_s0 + $0x190] sm:$0x10]   ;;  %v1950_v54 = vld [vmem:[%s3745_s0 + $0x31] sm:$0x2]   ;;  %v901_v56 = vsel %vm99_vm2, %v1855_v43, %v897_v51 }
  0x4f   :  { %v1927_v31 = vld [vmem:[%s3745_s0 + $0x19d] sm:$0x20]   ;;  %v1141_v37 = vsel %vm95_vm1, %v1916_v27, %v1137_v32  ;;  %v1857_v50 = vld [vmem:[%s3745_s0 + $0x1af] sm:$0x20]   ;;  %v1276_v57 = vsel %vm91_vm0, %v1950_v54, %v1949_v53  ;;  %v1951_v58 = vld [vmem:[%s3745_s0 + $0x50] sm:$0x4]   ;;  %v905_v0 = vsel %vm103_vm3, %v1856_v49, %v901_v56 }
  0x50   :  { %v1917_v33 = vld [vmem:[%s3745_s0 + $0x5f] sm:$0x8]   ;;  %v1187_v45 = vsel %vm107_vm4, %v1927_v31, %v1183_v30  ;;  %v1858_v52 = vld [vmem:[%s3745_s0 + $0x1ce] sm:$0x40]   ;;  %v1952_v59 = vld [vmem:[%s3745_s0 + $0x6f] sm:$0x8]   ;;  %v1280_v2 = vsel %vm95_vm1, %v1951_v58, %v1276_v57  ;;  %v909_v3 = vsel %vm107_vm4, %v1857_v50, %v905_v0 }
  0x51   :  { %v1918_v34 = vld [vmem:[%s3745_s0 + $0x7e] sm:$0x10]   ;;  %v1145_v40 = vsel %vm99_vm2, %v1917_v33, %v1141_v37  ;;  %v1953_v60 = vld [vmem:[%s3745_s0 + $0x8e] sm:$0x10]   ;;  %v1859_v1 = vld [vmem:[%s3745_s0 + $0x1ed] sm:$0x80]   ;;  %v1284_v4 = vsel %vm99_vm2, %v1952_v59, %v1280_v2  ;;  %v913_v9 = vsel %vm111_vm5, %v1858_v52, %v909_v3 }
  0x52   :  { %v1928_v36 = vld [vmem:[%s3745_s0 + $0x1bc] sm:$0x40]   ;;  %v1149_v46 = vsel %vm103_vm3, %v1918_v34, %v1145_v40  ;;  %1092 = vrot.lane.b32.xlu1 %v1091_v35, %s2049_s20  ;;  %v1940_v5 = vld [vmem:[%s3745_s0 + $0x10a] sm:$0x1]   ;;  %v1288_v10 = vsel %vm103_vm3, %v1953_v60, %v1284_v4  ;;  %v1954_v11 = vld [vmem:[%s3745_s0 + $0xad] sm:$0x20]   ;;  %v917_v16 = vsel %vm115_vm6, %v1859_v1, %v913_v9 }
  0x53   :  { %v1919_v38 = vld [vmem:[%s3745_s0 + $0x9d] sm:$0x20]   ;;  %1057 = vrot.lane.b32.xlu0 %v1056_v44, %s2049_s20  ;;  %v1191_v61 = vsel %vm111_vm5, %v1928_v36, %v1187_v45  ;;  %v1941_v6 = vld [vmem:[%s3745_s0 + $0x129] sm:$0x2]   ;;  %v1955_v17 = vld [vmem:[%s3745_s0 + $0xcc] sm:$0x40]   ;;  %v1292_v26 = vsel %vm107_vm4, %v1954_v11, %v1288_v10 }
  0x54   :  { %v1920_v47 = vld [vmem:[%s3745_s0 + $0xbc] sm:$0x40]   ;;  %v1153_v55 = vsel %vm107_vm4, %v1919_v38, %v1149_v46  ;;  %v1942_v7 = vld [vmem:[%s3745_s0 + $0x148] sm:$0x4]   ;;  %v1241_v12 = vsel %vm91_vm0, %v1941_v6, %v1940_v5  ;;  %v1878_v20 = vld [vmem:[%s3745_s0 + $0xb] sm:$0x1]   ;;  %v1296_v42 = vsel %vm111_vm5, %v1955_v17, %v1292_v26 }
  0x55   :  { %v1929_v62 = vld [vmem:[%s3745_s0 + $0x1db] sm:$0x80]   ;;  %v1157_v8 = vsel %vm111_vm5, %v1920_v47, %v1153_v55  ;;  %v1943_v13 = vld [vmem:[%s3745_s0 + $0x167] sm:$0x8]   ;;  %v1245_v18 = vsel %vm95_vm1, %v1942_v7, %v1241_v12  ;;  %v1879_v22 = vld [vmem:[%s3745_s0 + $0x2a] sm:$0x2]  }
  0x56   :  { %v1921_v63 = vld [vmem:[%s3745_s0 + $0xdb] sm:$0x80]   ;;  %v1944_v14 = vld [vmem:[%s3745_s0 + $0x186] sm:$0x10]   ;;  %v1195_v15 = vsel %vm115_vm6, %v1929_v62, %v1191_v61  ;;  %918 = vrot.lane.b32.xlu2 %v917_v16, %s2048_s5  ;;  %v1249_v21 = vsel %vm99_vm2, %v1943_v13, %v1245_v18  ;;  %v1880_v23 = vld [vmem:[%s3745_s0 + $0x49] sm:$0x4]   ;;  %v997_v29 = vsel %vm91_vm0, %v1879_v22, %v1878_v20 }
  0x57   :  { %v1945_v19 = vld [vmem:[%s3745_s0 + $0x1a5] sm:$0x20]   ;;  %v1881_v24 = vld [vmem:[%s3745_s0 + $0x68] sm:$0x8]   ;;  %v1161_v25 = vsel %vm115_vm6, %v1921_v63, %v1157_v8  ;;  %v1253_v27 = vsel %vm103_vm3, %v1944_v14, %v1249_v21  ;;  %s2050_s4 = smov 32   ;;  %v1001_v32 = vsel %vm95_vm1, %v1880_v23, %v997_v29  ;;  %s2051_s21 = smov 16  }
  0x58   :  { %v1946_v28 = vld [vmem:[%s3745_s0 + $0x1c4] sm:$0x40]   ;;  %v1882_v30 = vld [vmem:[%s3745_s0 + $0x87] sm:$0x10]   ;;  %v1975_v34 = vld [vmem:[%s3745_s0 + $0x101] sm:$0x1]   ;;  %v1257_v36 = vsel %vm107_vm4, %v1945_v19, %v1253_v27  ;;  %v1005_v37 = vsel %vm99_vm2, %v1881_v24, %v1001_v32 }
  0x59   :  { %v1883_v31 = vld [vmem:[%s3745_s0 + $0xa6] sm:$0x20]   ;;  %v1976_v35 = vld [vmem:[%s3745_s0 + $0x120] sm:$0x2]   ;;  %v1956_v43 = vld [vmem:[%s3745_s0 + $0xeb] sm:$0x80]   ;;  %v1009_v45 = vsel %vm103_vm3, %v1882_v30, %v1005_v37  ;;  %v1261_v53 = vsel %vm111_vm5, %v1946_v28, %v1257_v36 }
  0x5a   :  { %1196 = vrot.lane.b32.xlu1 %v1195_v15, %s2050_s4  ;;  %v1884_v33 = vld [vmem:[%s3745_s0 + $0xc5] sm:$0x40]   ;;  %v1380_v38 = vsel %vm91_vm0, %v1976_v35, %v1975_v34  ;;  %v1977_v39 = vld [vmem:[%s3745_s0 + $0x13f] sm:$0x4]   ;;  %v1947_v44 = vld [vmem:[%s3745_s0 + $0x1e3] sm:$0x80]   ;;  %v1013_v48 = vsel %vm107_vm4, %v1883_v31, %v1009_v45  ;;  %v1300_v60 = vsel %vm115_vm6, %v1956_v43, %v1296_v42 }
  0x5b   :  { %v1978_v40 = vld [vmem:[%s3745_s0 + $0x15e] sm:$0x8]   ;;  %1162 = vrot.lane.b32.xlu0 %v1161_v25, %s2050_s4  ;;  %v1885_v46 = vld [vmem:[%s3745_s0 + $0xe4] sm:$0x80]   ;;  %v1384_v47 = vsel %vm95_vm1, %v1977_v39, %v1380_v38  ;;  %v1017_v54 = vsel %vm111_vm5, %v1884_v33, %v1013_v48  ;;  %v1905_v1 = vld [vmem:[%s3745_s0 + $0x113] sm:$0x1]   ;;  %v1265_v6 = vsel %vm115_vm6, %v1947_v44, %v1261_v53 }
  0x5c   :  { %v1979_v41 = vld [vmem:[%s3745_s0 + $0x17d] sm:$0x10]   ;;  %v1388_v49 = vsel %vm99_vm2, %v1978_v40, %v1384_v47  ;;  %v1021_v61 = vsel %vm115_vm6, %v1885_v46, %v1017_v54  ;;  %v1906_v3 = vld [vmem:[%s3745_s0 + $0x132] sm:$0x2]   ;;  %v2002_v15 = vld [vmem:[%s3745_s0 + $0x11] sm:$0x1]  }
  0x5d   :  { %v1967_v50 = vld [vmem:[%s3745_s0 + $0x1] sm:$0x1]   ;;  %v1392_v55 = vsel %vm103_vm3, %v1979_v41, %v1388_v49  ;;  %v1907_v4 = vld [vmem:[%s3745_s0 + $0x151] sm:$0x4]   ;;  %v1102_v10 = vsel %vm91_vm0, %v1906_v3, %v1905_v1  ;;  %v2003_v16 = vld [vmem:[%s3745_s0 + $0x30] sm:$0x2]  }
  0x5e   :  { %v1968_v51 = vld [vmem:[%s3745_s0 + $0x20] sm:$0x2]   ;;  %1022 = vrot.lane.b32.xlu2 %v1021_v61, %s2049_s20  ;;  %v1908_v5 = vld [vmem:[%s3745_s0 + $0x170] sm:$0x8]   ;;  %v1106_v13 = vsel %vm95_vm1, %v1907_v4, %v1102_v10  ;;  %v1485_v19 = vsel %vm91_vm0, %v2003_v16, %v2002_v15  ;;  %v2004_v20 = vld [vmem:[%s3745_s0 + $0x4f] sm:$0x4]  }
  0x5f   :  { %v1969_v52 = vld [vmem:[%s3745_s0 + $0x3f] sm:$0x4]   ;;  %v1346_v57 = vsel %vm91_vm0, %v1968_v51, %v1967_v50  ;;  %v1909_v11 = vld [vmem:[%s3745_s0 + $0x18f] sm:$0x10]   ;;  %v1110_v18 = vsel %vm99_vm2, %v1908_v5, %v1106_v13  ;;  %v2005_v21 = vld [vmem:[%s3745_s0 + $0x6e] sm:$0x8]   ;;  %v1489_v28 = vsel %vm95_vm1, %v2004_v20, %v1485_v19 }
  0x60   :  { %v1980_v56 = vld [vmem:[%s3745_s0 + $0x19c] sm:$0x20]   ;;  %v1350_v63 = vsel %vm95_vm1, %v1969_v52, %v1346_v57  ;;  %v1910_v12 = vld [vmem:[%s3745_s0 + $0x1ae] sm:$0x20]   ;;  %v2006_v22 = vld [vmem:[%s3745_s0 + $0x8d] sm:$0x10]   ;;  %v1114_v26 = vsel %vm103_vm3, %v1909_v11, %v1110_v18  ;;  %v1493_v30 = vsel %vm99_vm2, %v2005_v21, %v1489_v28 }
  0x61   :  { %v1970_v58 = vld [vmem:[%s3745_s0 + $0x5e] sm:$0x8]   ;;  %v1396_v7 = vsel %vm107_vm4, %v1980_v56, %v1392_v55  ;;  %v1911_v14 = vld [vmem:[%s3745_s0 + $0x1cd] sm:$0x40]   ;;  %v1118_v29 = vsel %vm107_vm4, %v1910_v12, %v1114_v26  ;;  %v1993_v31 = vld [vmem:[%s3745_s0 + $0x109] sm:$0x1]   ;;  %v1497_v36 = vsel %vm103_vm3, %v2006_v22, %v1493_v30 }
  0x62   :  { %v1971_v59 = vld [vmem:[%s3745_s0 + $0x7d] sm:$0x10]   ;;  %v1354_v2 = vsel %vm99_vm2, %v1970_v58, %v1350_v63  ;;  %1301 = vrot.lane.b32.xlu1 %v1300_v60, %s2050_s4  ;;  %v1912_v27 = vld [vmem:[%s3745_s0 + $0x1ec] sm:$0x80]   ;;  %v1994_v32 = vld [vmem:[%s3745_s0 + $0x128] sm:$0x2]   ;;  %v1122_v35 = vsel %vm111_vm5, %v1911_v14, %v1118_v29 }
  0x63   :  { %v1981_v62 = vld [vmem:[%s3745_s0 + $0x1bb] sm:$0x40]   ;;  %v1358_v8 = vsel %vm103_vm3, %v1971_v59, %v1354_v2  ;;  %1266 = vrot.lane.b32.xlu0 %v1265_v6, %s2050_s4  ;;  %v1995_v33 = vld [vmem:[%s3745_s0 + $0x147] sm:$0x4]   ;;  %v2007_v37 = vld [vmem:[%s3745_s0 + $0xac] sm:$0x20]   ;;  %v1450_v38 = vsel %vm91_vm0, %v1994_v32, %v1993_v31  ;;  %v1126_v42 = vsel %vm115_vm6, %v1912_v27, %v1122_v35 }
  0x64   :  { %v1972_v0 = vld [vmem:[%s3745_s0 + $0x9c] sm:$0x20]   ;;  %v1400_v23 = vsel %vm111_vm5, %v1981_v62, %v1396_v7  ;;  %v1996_v39 = vld [vmem:[%s3745_s0 + $0x166] sm:$0x8]   ;;  %v2008_v43 = vld [vmem:[%s3745_s0 + $0xcb] sm:$0x40]   ;;  %v1454_v44 = vsel %vm95_vm1, %v1995_v33, %v1450_v38  ;;  %v1501_v52 = vsel %vm107_vm4, %v2007_v37, %v1497_v36 }
  0x65   :  { %v1973_v9 = vld [vmem:[%s3745_s0 + $0xbb] sm:$0x40]   ;;  %v1362_v17 = vsel %vm107_vm4, %v1972_v0, %v1358_v8  ;;  %v1997_v40 = vld [vmem:[%s3745_s0 + $0x185] sm:$0x10]   ;;  %v1931_v46 = vld [vmem:[%s3745_s0 + $0xa] sm:$0x1]   ;;  %v1458_v47 = vsel %vm99_vm2, %v1996_v39, %v1454_v44  ;;  %v1505_v4 = vsel %vm111_vm5, %v2008_v43, %v1501_v52 }
  0x66   :  { %v1982_v24 = vld [vmem:[%s3745_s0 + $0x1da] sm:$0x80]   ;;  %v1366_v34 = vsel %vm111_vm5, %v1973_v9, %v1362_v17  ;;  %v1998_v45 = vld [vmem:[%s3745_s0 + $0x1a4] sm:$0x20]   ;;  %1127 = vrot.lane.b32.xlu2 %v1126_v42, %s2049_s20  ;;  %v1932_v48 = vld [vmem:[%s3745_s0 + $0x29] sm:$0x2]   ;;  %v1462_v53 = vsel %vm103_vm3, %v1997_v40, %v1458_v47 }
  0x67   :  { %v1974_v25 = vld [vmem:[%s3745_s0 + $0xda] sm:$0x80]   ;;  %v1404_v41 = vsel %vm115_vm6, %v1982_v24, %v1400_v23  ;;  %v1933_v49 = vld [vmem:[%s3745_s0 + $0x48] sm:$0x4]   ;;  %v1999_v54 = vld [vmem:[%s3745_s0 + $0x1c3] sm:$0x40]   ;;  %v1206_v55 = vsel %vm91_vm0, %v1932_v48, %v1931_v46  ;;  %v1466_v62 = vsel %vm107_vm4, %v1998_v45, %v1462_v53 }
  0x68   :  { %v1934_v50 = vld [vmem:[%s3745_s0 + $0x67] sm:$0x8]   ;;  %v1370_v51 = vsel %vm115_vm6, %v1974_v25, %v1366_v34  ;;  %v1210_v58 = vsel %vm95_vm1, %v1933_v49, %v1206_v55  ;;  %v2029_v60 = vld [vmem:[%s3745_s0 + $0x119] sm:$0x1]   ;;  %v2009_v5 = vld [vmem:[%s3745_s0 + $0xea] sm:$0x80]   ;;  %v1470_v15 = vsel %vm111_vm5, %v1999_v54, %v1466_v62 }
  0x69   :  { %v1935_v56 = vld [vmem:[%s3745_s0 + $0x86] sm:$0x10]   ;;  %v2030_v61 = vld [vmem:[%s3745_s0 + $0x138] sm:$0x2]   ;;  %v1214_v63 = vsel %vm99_vm2, %v1934_v50, %v1210_v58  ;;  %v2000_v6 = vld [vmem:[%s3745_s0 + $0x1e2] sm:$0x80]   ;;  %v1509_v22 = vsel %vm115_vm6, %v2009_v5, %v1505_v4 }
  0x6a   :  { %v1936_v57 = vld [vmem:[%s3745_s0 + $0xa5] sm:$0x20]   ;;  %1405 = vrot.lane.b32.xlu1 %v1404_v41, %s2051_s21  ;;  %v1590_v0 = vsel %vm91_vm0, %v2030_v61, %v2029_v60  ;;  %v2031_v1 = vld [vmem:[%s3745_s0 + $0x157] sm:$0x4]   ;;  %v1218_v7 = vsel %vm103_vm3, %v1935_v56, %v1214_v63  ;;  %v1958_v27 = vld [vmem:[%s3745_s0 + $0x112] sm:$0x1]   ;;  %v1474_v32 = vsel %vm115_vm6, %v2000_v6, %v1470_v15 }
  0x6b   :  { %v1937_v59 = vld [vmem:[%s3745_s0 + $0xc4] sm:$0x40]   ;;  %v2032_v2 = vld [vmem:[%s3745_s0 + $0x176] sm:$0x8]   ;;  %1371 = vrot.lane.b32.xlu0 %v1370_v51, %s2051_s21  ;;  %v1594_v9 = vsel %vm95_vm1, %v2031_v1, %v1590_v0  ;;  %v1222_v10 = vsel %vm107_vm4, %v1936_v57, %v1218_v7  ;;  %v1959_v29 = vld [vmem:[%s3745_s0 + $0x131] sm:$0x2]  }
  0x6c   :  { %v2033_v3 = vld [vmem:[%s3745_s0 + $0x195] sm:$0x10]   ;;  %v1938_v8 = vld [vmem:[%s3745_s0 + $0xe3] sm:$0x80]   ;;  %v1598_v11 = vsel %vm99_vm2, %v2032_v2, %v1594_v9  ;;  %v1226_v16 = vsel %vm111_vm5, %v1937_v59, %v1222_v10  ;;  %v1960_v30 = vld [vmem:[%s3745_s0 + $0x150] sm:$0x4]   ;;  %v1311_v36 = vsel %vm91_vm0, %v1959_v29, %v1958_v27 }
  0x6d   :  { %v2020_v12 = vld [vmem:[%s3745_s0 + $0x19] sm:$0x1]   ;;  %v1602_v17 = vsel %vm103_vm3, %v2033_v3, %v1598_v11  ;;  %v1230_v23 = vsel %vm115_vm6, %v1938_v8, %v1226_v16  ;;  %v1961_v31 = vld [vmem:[%s3745_s0 + $0x16f] sm:$0x8]   ;;  %v1315_v41 = vsel %vm95_vm1, %v1960_v30, %v1311_v36  ;;  %v1984_v43 = vld [vmem:[%s3745_s0 + $0x9] sm:$0x1]  }
  0x6e   :  { %v2021_v13 = vld [vmem:[%s3745_s0 + $0x38] sm:$0x2]   ;;  %1231 = vrot.lane.b32.xlu2 %v1230_v23, %s2050_s4  ;;  %v1962_v37 = vld [vmem:[%s3745_s0 + $0x18e] sm:$0x10]   ;;  %v1985_v44 = vld [vmem:[%s3745_s0 + $0x28] sm:$0x2]   ;;  %v1319_v45 = vsel %vm99_vm2, %v1961_v31, %v1315_v41 }
  0x6f   :  { %v2022_v14 = vld [vmem:[%s3745_s0 + $0x57] sm:$0x4]   ;;  %v1555_v19 = vsel %vm91_vm0, %v2021_v13, %v2020_v12  ;;  %v1963_v38 = vld [vmem:[%s3745_s0 + $0x1ad] sm:$0x20]   ;;  %v1415_v46 = vsel %vm91_vm0, %v1985_v44, %v1984_v43  ;;  %v1986_v47 = vld [vmem:[%s3745_s0 + $0x47] sm:$0x4]   ;;  %v1323_v52 = vsel %vm103_vm3, %v1962_v37, %v1319_v45 }
  0x70   :  { %v2034_v18 = vld [vmem:[%s3745_s0 + $0x1b4] sm:$0x20]   ;;  %v1559_v25 = vsel %vm95_vm1, %v2022_v14, %v1555_v19  ;;  %v1964_v42 = vld [vmem:[%s3745_s0 + $0x1cc] sm:$0x40]   ;;  %v1987_v48 = vld [vmem:[%s3745_s0 + $0x66] sm:$0x8]   ;;  %v1419_v54 = vsel %vm95_vm1, %v1986_v47, %v1415_v46  ;;  %v1327_v57 = vsel %vm107_vm4, %v1963_v38, %v1323_v52 }
  0x71   :  { %v2023_v20 = vld [vmem:[%s3745_s0 + $0x76] sm:$0x8]   ;;  %v1606_v33 = vsel %vm107_vm4, %v2034_v18, %v1602_v17  ;;  %v1988_v49 = vld [vmem:[%s3745_s0 + $0x85] sm:$0x10]   ;;  %v1965_v53 = vld [vmem:[%s3745_s0 + $0x1eb] sm:$0x80]   ;;  %v1423_v58 = vsel %vm99_vm2, %v1987_v48, %v1419_v54  ;;  %v1331_v61 = vsel %vm111_vm5, %v1964_v42, %v1327_v57 }
  0x72   :  { %v2024_v21 = vld [vmem:[%s3745_s0 + $0x95] sm:$0x10]   ;;  %v1563_v28 = vsel %vm99_vm2, %v2023_v20, %v1559_v25  ;;  %1510 = vrot.lane.b32.xlu1 %v1509_v22, %s2051_s21  ;;  %v1989_v55 = vld [vmem:[%s3745_s0 + $0xa4] sm:$0x20]   ;;  %v1427_v62 = vsel %vm103_vm3, %v1988_v49, %v1423_v58  ;;  %vm4_vm7 = vcmask 1047556   ;;  %vm6_vm8 = vcmask 130048  }
  0x73   :  { %v2035_v24 = vld [vmem:[%s3745_s0 + $0x1d3] sm:$0x40]   ;;  %v1567_v34 = vsel %vm103_vm3, %v2024_v21, %v1563_v28  ;;  %1475 = vrot.lane.b32.xlu0 %v1474_v32, %s2051_s21  ;;  %v1990_v59 = vld [vmem:[%s3745_s0 + $0xc3] sm:$0x40]   ;;  %v1335_v1 = vsel %vm115_vm6, %v1965_v53, %v1331_v61  ;;  %v1431_v2 = vsel %vm107_vm4, %v1989_v55, %v1427_v62  ;;  %vm119_vm9 = vcmask 1048448  }
  0x74   :  { %v2025_v26 = vld [vmem:[%s3745_s0 + $0xb4] sm:$0x20]   ;;  %v1610_v50 = vsel %vm111_vm5, %v2035_v24, %v1606_v33  ;;  %v1633_v60 = vld [vmem:[%s3745_s0 + $0x100] ss:$8 sm:$0xf]   ;;  %v1435_v12 = vsel %vm111_vm5, %v1990_v59, %v1431_v2  ;;  %vm328_vm10 = vcmask 917248  }
  0x75   :  { %v2026_v35 = vld [vmem:[%s3745_s0 + $0xd3] sm:$0x40]   ;;  %v1571_v40 = vsel %vm107_vm4, %v2025_v26, %v1567_v34  ;;  %v1634_v63 = vld [vmem:[%s3745_s0 + $0x100] ss:$8 sm:$0xf0]   ;;  %vm537_vm11 = vcmask 786048  }
  0x76   :  { %v2036_v39 = vld [vmem:[%s3745_s0 + $0x1f2] sm:$0x80]   ;;  %v1575_v56 = vsel %vm111_vm5, %v2026_v35, %v1571_v40  ;;  %v48_v3 = vsel %vm4_vm7, %v1634_v63, %v1633_v60  ;;  %v1637_v4 = vld [vmem:[%s3745_s0 + $0x140] ss:$8 sm:$0xf]   ;;  %1336 = vrot.lane.b32.xlu2 %v1335_v1, %s2050_s4  ;;  %vm746_vm12 = vcmask 654848  }
  0x77   :  { %v2027_v51 = vld [vmem:[%s3745_s0 + $0xf2] sm:$0x80]   ;;  %v1614_v0 = vsel %vm115_vm6, %v2036_v39, %v1610_v50  ;;  %v1638_v5 = vld [vmem:[%s3745_s0 + $0x140] ss:$8 sm:$0xf0]   ;;  %v3454_v10 = vpop.permute.xlu2 %256   ;;  %vm955_vm13 = vcmask 523648  }
  0x78   :  { %v1991_v6 = vld [vmem:[%s3745_s0 + $0xe2] sm:$0x80]   ;;  %1635 = vst.msk [vmem:[%s3746_s1 + $0x20] ss:$8 sm:$0xf] %vm6_vm8, %v48_v3   ;;  %v59_v7 = vsel %vm4_vm7, %v1638_v5, %v1637_v4  ;;  %v1579_v9 = vsel %vm115_vm6, %v2027_v51, %v1575_v56  ;;  %vm1164_vm14 = vcmask 392448  }
  0x79   :  { %v1641_v8 = vld [vmem:[%s3745_s0 + $0x180] ss:$8 sm:$0xf]   ;;  %1636 = vst.msk [vmem:[%s3746_s1 + $0x1] ss:$8 sm:$0xf0] %vm6_vm8, %v48_v3   ;;  %v1439_v19 = vsel %vm115_vm6, %v1991_v6, %v1435_v12 }
  0x7a   :  { %v1642_v11 = vld [vmem:[%s3745_s0 + $0x180] ss:$8 sm:$0xf0]   ;;  %1615 = vrot.lane.b32.xlu1 %v1614_v0, %s2051_s21  ;;  %1639 = vst.msk [vmem:[%s3746_s1 + $0x22] ss:$8 sm:$0xf] %vm6_vm8, %v59_v7  }
  0x7b   :  { %v70_v13 = vsel %vm4_vm7, %v1642_v11, %v1641_v8  ;;  %v1645_v14 = vld [vmem:[%s3745_s0 + $0x1c0] ss:$8 sm:$0xf]   ;;  %1640 = vst.msk [vmem:[%s3746_s1 + $0x3] ss:$8 sm:$0xf0] %vm6_vm8, %v59_v7   ;;  %1580 = vrot.lane.b32.xlu0 %v1579_v9, %s2051_s21 }
  0x7c   :  { %v1646_v15 = vld [vmem:[%s3745_s0 + $0x1c0] ss:$8 sm:$0xf0]   ;;  %v187_v16 = vpop.permute.xlu1 %186   ;;  %1643 = vst.msk [vmem:[%s3746_s1 + $0x24] ss:$8 sm:$0xf] %vm6_vm8, %v70_v13  }
  0x7d   :  { %v81_v17 = vsel %vm4_vm7, %v1646_v15, %v1645_v14  ;;  %v2_v18 = vld [vmem:[%s3745_s0] ss:$8 sm:$0xf]   ;;  %1644 = vst.msk [vmem:[%s3746_s1 + $0x5] ss:$8 sm:$0xf0] %vm6_vm8, %v70_v13   ;;  %v118_v21 = vpop.permute.xlu0 %117  }
  0x7e   :  { %v3_v20 = vld [vmem:[%s3745_s0] ss:$8 sm:$0xf0]   ;;  %1647 = vst.msk [vmem:[%s3746_s1 + $0x26] ss:$8 sm:$0xf] %vm6_vm8, %v81_v17   ;;  %1440 = vrot.lane.b32.xlu2 %v1439_v19, %s2051_s21 }
  0x7f   :  { %v5_v22 = vsel %vm4_vm7, %v3_v20, %v2_v18  ;;  %v1621_v23 = vld [vmem:[%s3745_s0 + $0x40] ss:$8 sm:$0xf]   ;;  %1648 = vst.msk [vmem:[%s3746_s1 + $0x7] ss:$8 sm:$0xf0] %vm6_vm8, %v81_v17   ;;  %v292_v27 = vpop.permute.xlu2 %291  }
  0x80   :  { %v1622_v24 = vld [vmem:[%s3745_s0 + $0x40] ss:$8 sm:$0xf0]   ;;  %7 = vst.msk [vmem:[%s3746_s1] ss:$8 sm:$0xf] %vm6_vm8, %v5_v22  }
  0x81   :  { %v15_v25 = vsel %vm4_vm7, %v1622_v24, %v1621_v23  ;;  %v1625_v26 = vld [vmem:[%s3745_s0 + $0x80] ss:$8 sm:$0xf]   ;;  %1620 = vst.msk [vmem:[%s3746_s1 - $0x1f] ss:$8 sm:$0xf0] %vm6_vm8, %v5_v22  }
  0x82   :  { %v1626_v28 = vld [vmem:[%s3745_s0 + $0x80] ss:$8 sm:$0xf0]   ;;  %1701 = vst.msk [vmem:[%s3746_s1 + $0x30] sm:$0xff] %vm119_vm9, %v292_v27   ;;  %v2011_v30 = vld [vmem:[%s3745_s0 + $0x111] sm:$0x1]  }
  0x83   :  { %v1629_v29 = vld [vmem:[%s3745_s0 + $0xc0] ss:$8 sm:$0xf]   ;;  %1623 = vst.msk [vmem:[%s3746_s1 + $0x2] ss:$8 sm:$0xf] %vm6_vm8, %v15_v25   ;;  %v26_v31 = vsel %vm4_vm7, %v1626_v28, %v1625_v26 }
  0x84   :  { %v1630_v32 = vld [vmem:[%s3745_s0 + $0xc0] ss:$8 sm:$0xf0]   ;;  %v222_v33 = vpop.permute.xlu1 %221   ;;  %1624 = vst.msk [vmem:[%s3746_s1 - $0x1d] ss:$8 sm:$0xf0] %vm6_vm8, %v15_v25  }
  0x85   :  { %v2012_v34 = vld [vmem:[%s3745_s0 + $0x130] sm:$0x2]   ;;  %1683 = vst.msk [vmem:[%s3746_s1 + $0x28] sm:$0xff] %vm119_vm9, %v222_v33   ;;  %v152_v38 = vpop.permute.xlu0 %151   ;;  %v37_v39 = vsel %vm4_vm7, %v1630_v32, %v1629_v29  ;;  %vm1373_vm15 = vcmask 261248  }
  0x86   :  { %v1520_v35 = vsel %vm91_vm0, %v2012_v34, %v2011_v30  ;;  %v2013_v36 = vld [vmem:[%s3745_s0 + $0x14f] sm:$0x4]   ;;  %1627 = vst.msk [vmem:[%s3746_s1 + $0x4] ss:$8 sm:$0xf] %vm6_vm8, %v26_v31  }
  0x87   :  { %v2014_v37 = vld [vmem:[%s3745_s0 + $0x16e] sm:$0x8]   ;;  %v1524_v40 = vsel %vm95_vm1, %v2013_v36, %v1520_v35  ;;  %1665 = vst.msk [vmem:[%s3746_s1 + $0x20] sm:$0xff] %vm119_vm9, %v152_v38  }
  0x88   :  { %v2015_v41 = vld [vmem:[%s3745_s0 + $0x18d] sm:$0x10]   ;;  %v1528_v42 = vsel %vm99_vm2, %v2014_v37, %v1524_v40  ;;  %1628 = vst.msk [vmem:[%s3746_s1 - $0x1b] ss:$8 sm:$0xf0] %vm6_vm8, %v26_v31   ;;  %v396_v48 = vpop.permute.xlu2 %395  }
  0x89   :  { %v2016_v43 = vld [vmem:[%s3745_s0 + $0x1ac] sm:$0x20]   ;;  %v1532_v45 = vsel %vm103_vm3, %v2015_v41, %v1528_v42  ;;  %1631 = vst.msk [vmem:[%s3746_s1 + $0x6] ss:$8 sm:$0xf] %vm6_vm8, %v37_v39  }
  0x8a   :  { %v2017_v44 = vld [vmem:[%s3745_s0 + $0x1cb] sm:$0x40]   ;;  %v1536_v47 = vsel %vm107_vm4, %v2016_v43, %v1532_v45  ;;  %1632 = vst.msk [vmem:[%s3746_s1 - $0x19] ss:$8 sm:$0xf0] %vm6_vm8, %v37_v39  }
  0x8b   :  { %v2018_v46 = vld [vmem:[%s3745_s0 + $0x1ea] sm:$0x80]   ;;  %v1540_v49 = vsel %vm111_vm5, %v2017_v44, %v1536_v47  ;;  %120 = vst.msk [vmem:[%s3746_s1] sm:$0xff] %vm119_vm9, %v118_v21  }
  0x8c   :  { %v1544_v50 = vsel %vm115_vm6, %v2018_v46, %v1540_v49  ;;  %v361_v51 = vpop.permute.xlu1 %360   ;;  %1674 = vst.msk [vmem:[%s3746_s1 + $0x8] sm:$0xff] %vm119_vm9, %v187_v16  }
  0x8d   :  { %1545 = vrot.lane.b32.xlu2 %v1544_v50, %s2051_s21  ;;  %1718 = vst.msk [vmem:[%s3746_s1 + $0x20] sm:$0xff] %vm328_vm10, %v361_v51   ;;  %v327_v52 = vpop.permute.xlu0 %326  }
  0x8e   :  { %1692 = vst.msk [vmem:[%s3746_s1 + $0x10] sm:$0xff] %vm119_vm9, %v3454_v10  }
  0x8f   :  { %329 = vst.msk [vmem:[%s3746_s1] sm:$0xff] %vm328_vm10, %v327_v52  }
  0x90   :  { %1727 = vst.msk [vmem:[%s3746_s1 + $0x8] sm:$0xff] %vm328_vm10, %v396_v48   ;;  %v501_v53 = vpop.permute.xlu2 %500  }
  0x91   :  { %1754 = vst.msk [vmem:[%s3746_s1 + $0x30] sm:$0xff] %vm328_vm10, %v501_v53  }
  0x94   :  { %v466_v54 = vpop.permute.xlu1 %465  }
  0x95   :  { %1745 = vst.msk [vmem:[%s3746_s1 + $0x10] sm:$0xff] %vm328_vm10, %v466_v54   ;;  %v431_v55 = vpop.permute.xlu0 %430  }
  0x96   :  { %1736 = vst.msk [vmem:[%s3746_s1 + $0x28] sm:$0xff] %vm328_vm10, %v431_v55  }
  0x98   :  { %v605_v56 = vpop.permute.xlu2 %604  }
  0x99   :  { %1780 = vst.msk [vmem:[%s3746_s1 + $0x8] sm:$0xff] %vm537_vm11, %v605_v56  }
  0x9c   :  { %v570_v57 = vpop.permute.xlu1 %569  }
  0x9d   :  { %1771 = vst.msk [vmem:[%s3746_s1 + $0x20] sm:$0xff] %vm537_vm11, %v570_v57   ;;  %v536_v58 = vpop.permute.xlu0 %535  }
  0x9e   :  { %538 = vst.msk [vmem:[%s3746_s1] sm:$0xff] %vm537_vm11, %v536_v58  }
  0xa0   :  { %v710_v59 = vpop.permute.xlu2 %709  }
  0xa1   :  { %1807 = vst.msk [vmem:[%s3746_s1 + $0x30] sm:$0xff] %vm537_vm11, %v710_v59  }
  0xa4   :  { %v675_v60 = vpop.permute.xlu1 %674  }
  0xa5   :  { %1798 = vst.msk [vmem:[%s3746_s1 + $0x10] sm:$0xff] %vm537_vm11, %v675_v60   ;;  %v640_v61 = vpop.permute.xlu0 %639  }
  0xa6   :  { %1789 = vst.msk [vmem:[%s3746_s1 + $0x28] sm:$0xff] %vm537_vm11, %v640_v61  }
  0xa8   :  { %v814_v62 = vpop.permute.xlu2 %813  }
  0xa9   :  { %1833 = vst.msk [vmem:[%s3746_s1 + $0x8] sm:$0xff] %vm746_vm12, %v814_v62  }
  0xac   :  { %v779_v63 = vpop.permute.xlu1 %778  }
  0xad   :  { %1824 = vst.msk [vmem:[%s3746_s1 + $0x20] sm:$0xff] %vm746_vm12, %v779_v63   ;;  %v745_v0 = vpop.permute.xlu0 %744  }
  0xae   :  { %747 = vst.msk [vmem:[%s3746_s1] sm:$0xff] %vm746_vm12, %v745_v0  }
  0xb0   :  { %v919_v1 = vpop.permute.xlu2 %918  }
  0xb1   :  { %1860 = vst.msk [vmem:[%s3746_s1 + $0x30] sm:$0xff] %vm746_vm12, %v919_v1  }
  0xb4   :  { %v884_v2 = vpop.permute.xlu1 %883  }
  0xb5   :  { %1851 = vst.msk [vmem:[%s3746_s1 + $0x10] sm:$0xff] %vm746_vm12, %v884_v2   ;;  %v849_v3 = vpop.permute.xlu0 %848  }
  0xb6   :  { %1842 = vst.msk [vmem:[%s3746_s1 + $0x28] sm:$0xff] %vm746_vm12, %v849_v3  }
  0xb8   :  { %v1023_v4 = vpop.permute.xlu2 %1022  }
  0xb9   :  { %1886 = vst.msk [vmem:[%s3746_s1 + $0x8] sm:$0xff] %vm955_vm13, %v1023_v4  }
  0xbc   :  { %v988_v5 = vpop.permute.xlu1 %987  }
  0xbd   :  { %1877 = vst.msk [vmem:[%s3746_s1 + $0x20] sm:$0xff] %vm955_vm13, %v988_v5   ;;  %v954_v6 = vpop.permute.xlu0 %953  }
  0xbe   :  { %956 = vst.msk [vmem:[%s3746_s1] sm:$0xff] %vm955_vm13, %v954_v6  }
  0xc0   :  { %v1128_v7 = vpop.permute.xlu2 %1127  }
  0xc1   :  { %1913 = vst.msk [vmem:[%s3746_s1 + $0x30] sm:$0xff] %vm955_vm13, %v1128_v7  }
  0xc4   :  { %v1093_v8 = vpop.permute.xlu1 %1092  }
  0xc5   :  { %1904 = vst.msk [vmem:[%s3746_s1 + $0x10] sm:$0xff] %vm955_vm13, %v1093_v8   ;;  %v1058_v9 = vpop.permute.xlu0 %1057  }
  0xc6   :  { %1895 = vst.msk [vmem:[%s3746_s1 + $0x28] sm:$0xff] %vm955_vm13, %v1058_v9  }
  0xc8   :  { %v1232_v10 = vpop.permute.xlu2 %1231  }
  0xc9   :  { %1939 = vst.msk [vmem:[%s3746_s1 + $0x8] sm:$0xff] %vm1164_vm14, %v1232_v10  }
  0xcc   :  { %v1197_v11 = vpop.permute.xlu1 %1196  }
  0xcd   :  { %1930 = vst.msk [vmem:[%s3746_s1 + $0x20] sm:$0xff] %vm1164_vm14, %v1197_v11   ;;  %v1163_v12 = vpop.permute.xlu0 %1162  }
  0xce   :  { %1165 = vst.msk [vmem:[%s3746_s1] sm:$0xff] %vm1164_vm14, %v1163_v12  }
  0xd0   :  { %v1337_v13 = vpop.permute.xlu2 %1336  }
  0xd1   :  { %1966 = vst.msk [vmem:[%s3746_s1 + $0x30] sm:$0xff] %vm1164_vm14, %v1337_v13  }
  0xd4   :  { %v1302_v14 = vpop.permute.xlu1 %1301  }
  0xd5   :  { %1957 = vst.msk [vmem:[%s3746_s1 + $0x10] sm:$0xff] %vm1164_vm14, %v1302_v14   ;;  %v1267_v15 = vpop.permute.xlu0 %1266  }
  0xd6   :  { %1948 = vst.msk [vmem:[%s3746_s1 + $0x28] sm:$0xff] %vm1164_vm14, %v1267_v15  }
  0xd8   :  { %v1441_v16 = vpop.permute.xlu2 %1440  }
  0xd9   :  { %1992 = vst.msk [vmem:[%s3746_s1 + $0x8] sm:$0xff] %vm1373_vm15, %v1441_v16  }
  0xdc   :  { %v1406_v17 = vpop.permute.xlu1 %1405  }
  0xdd   :  { %1983 = vst.msk [vmem:[%s3746_s1 + $0x20] sm:$0xff] %vm1373_vm15, %v1406_v17   ;;  %v1372_v18 = vpop.permute.xlu0 %1371  }
  0xde   :  { %1374 = vst.msk [vmem:[%s3746_s1] sm:$0xff] %vm1373_vm15, %v1372_v18  }
  0xe4   :  { %v1511_v19 = vpop.permute.xlu1 %1510  }
  0xe5   :  { %2010 = vst.msk [vmem:[%s3746_s1 + $0x10] sm:$0xff] %vm1373_vm15, %v1511_v19   ;;  %v1476_v20 = vpop.permute.xlu0 %1475  }
  0xe6   :  { %2001 = vst.msk [vmem:[%s3746_s1 + $0x28] sm:$0xff] %vm1373_vm15, %v1476_v20  }
  0xe7   :  { %v1546_v21 = vpop.permute.xlu2 %1545  }
  0xe8   :  { %2019 = vst.msk [vmem:[%s3746_s1 + $0x30] sm:$0xff] %vm1373_vm15, %v1546_v21  }
  0xec   :  { %v1616_v22 = vpop.permute.xlu1 %1615  }
  0xed   :  { %2037 = vst.msk [vmem:[%s3746_s1 + $0x38] sm:$0xff] %vm1373_vm15, %v1616_v22   ;;  %v1581_v23 = vpop.permute.xlu0 %1580  }
  0xee   :  { %2028 = vst.msk [vmem:[%s3746_s1 + $0x18] sm:$0xff] %vm1373_vm15, %v1581_v23  }

// kernel: decoder_forward.1
= control target key start
LH: loop header
LB: loop body
LE: loop exit
PB: predicated region body
PF: predicated region fallthrough
CT: control target
= control target key end

     0   :  { %s6444_s0 = inlined_call_operand.vmem [shape: f32[14,28], index: 0, kind: input, shape index: {}]   ;;  %s6445_s1 = inlined_call_operand.vmem [shape: f32[3,26,14], index: 1, kind: input, shape index: {}]   ;;  %s6446_s2 = inlined_call_operand.vmem [shape: f32[3,28,104], index: 2, kind: input, shape index: {}]   ;;  %s6447_s3 = inlined_call_operand.vmem [shape: f32[1,104], index: 3, kind: input, shape index: {}]   ;;  %s6448_s4 = inlined_call_operand.vmem [shape: f32[104,8], index: 4, kind: input, shape index: {}]   ;;  %s6449_s5 = inlined_call_operand.vmem [shape: f32[8,104], index: 5, kind: input, shape index: {}]   ;;  %s6450_s6 = inlined_call_operand.vmem [shape: f32[1,8], index: 6, kind: input, shape index: {}]   ;;  %s6451_s7 = inlined_call_operand.vmem [shape: f32[1,8], index: 7, kind: input, shape index: {}]   ;;  %s6452_s8 = inlined_call_operand.vmem [shape: f32[3,52,26], index: 8, kind: input, shape index: {}]   ;;  %s6453_s9 = inlined_call_operand.vmem [shape: f32[3,104,416], index: 9, kind: input, shape index: {}]   ;;  %s6454_s10 = inlined_call_operand.vmem [shape: f32[1,416], index: 10, kind: input, shape index: {}]   ;;  %s6455_s11 = inlined_call_operand.vmem [shape: f32[416,16], index: 11, kind: input, shape index: {}]   ;;  %s6456_s12 = inlined_call_operand.vmem [shape: f32[16,416], index: 12, kind: input, shape index: {}]   ;;  %s6457_s13 = inlined_call_operand.vmem [shape: f32[1,16], index: 13, kind: input, shape index: {}]   ;;  %s6458_s14 = inlined_call_operand.vmem [shape: f32[1,16], index: 14, kind: input, shape index: {}]   ;;  %s6459_s15 = inlined_call_operand.vmem [shape: f32[3,56,52], index: 15, kind: input, shape index: {}]   ;;  %s6460_s16 = inlined_call_operand.vmem [shape: f32[3,416,28], index: 16, kind: input, shape index: {}]   ;;  %s6461_s17 = inlined_call_operand.vmem [shape: f32[1,28], index: 17, kind: input, shape index: {}]   ;;  %s6462_s18 = inlined_call_operand.hbm [shape: f32[56,28], index: 18, kind: output, shape index: {}]  }
   0x1   :  { %6473 = sst [smem:[#allocation28_spill]] %s6444_s0 }
   0x2   :  { %6474 = sst [smem:[#allocation29_spill]] %s6445_s1 }
   0x3   :  { %6475 = sst [smem:[#allocation30_spill]] %s6446_s2 }
   0x4   :  { %vm74_vm0 = vcmask 1043456   ;;  %s6476_s29 = sld [smem:[#allocation30_spill]]  ;;  %vm67_vm1 = vcmask 228352  }
   0x5   :  { %s6477_s30 = sld [smem:[#allocation28_spill]] }
   0xa   :  { %v3318_v0 = vld [vmem:[%s6476_s29 + $0x38] sm:$0xf]  ;;  %v3317_v1 = vld [vmem:[%s6476_s29 + $0x30] sm:$0xff]  ;;  %v3316_v3 = vld [vmem:[%s6476_s29 + $0x28] sm:$0xff] }
   0xb   :  { %3319 = vmatpush.msk.msra.mxu1 %vm74_vm0, %v3318_v0  ;;  %v66_v2 = vld [vmem:[%s6476_s29 + $0x18] sm:$0xf]  ;;  %v65_v4 = vld [vmem:[%s6476_s29 + $0x10] sm:$0xff]  ;;  %v64_v5 = vld [vmem:[%s6476_s29 + $0x8] sm:$0xff] }
   0xc   :  { %3312 = vmatpush.msk.msra.mxu0 %vm74_vm0, %v66_v2  ;;  %v3315_v6 = vld [vmem:[%s6476_s29 + $0x20] sm:$0xff] }
   0xd   :  { %126 = vmatpush.msra.mxu1 %v3317_v1  ;;  %v60_v7 = vld [vmem:[%s6477_s30] sm:$0xff] }
   0xe   :  { %91 = vmatpush.msra.mxu0 %v65_v4  ;;  %v63_v8 = vld [vmem:[%s6476_s29] sm:$0xff] }
   0xf   :  { %127 = vmatpush.msra.mxu1 %v3316_v3 }
  0x10   :  { %23 = vsyncpa [#allocation3], 0  ;;  %92 = vmatpush.msra.mxu0 %v64_v5  ;;  %v3339_v9 = vld [vmem:[%s6476_s29 + $0x58] sm:$0xf]  ;;  %v3338_v10 = vld [vmem:[%s6476_s29 + $0x50] sm:$0xff]  ;;  %vm154_vm2 = vcmask 1045504  }
  0x11   :  { %128 = vmatpush.msra.mxu1 %v3315_v6  ;;  %v3337_v11 = vld [vmem:[%s6476_s29 + $0x48] sm:$0xff]  ;;  %v3336_v13 = vld [vmem:[%s6476_s29 + $0x40] sm:$0xff]  ;;  %s6478_s0 = sld [smem:[#allocation29_spill]]  ;;  %vm141_vm3 = vcmask 113664   ;;  %v394_v43 = vld [vmem:[%s6448_s4 + $0x58] sm:$0xff]  ;;  %vm332_vm4 = vcmask 1041408  }
  0x12   :  { %3320 = vmatmul.msk.f32.vlgmr.msra.gmra.mxu1 %vm67_vm1, %v60_v7  ;;  %93 = vmatpush.msra.mxu0 %v63_v8  ;;  %v61_v12 = vld [vmem:[%s6477_s30 + $0x8] sm:$0x3f]  ;;  %v395_v42 = vld [vmem:[%s6448_s4 + $0x60] sm:$0xff]  ;;  %v393_v44 = vld [vmem:[%s6448_s4 + $0x50] sm:$0xff]  ;;  %vm328_vm5 = vcmask 211968   ;;  %vm396_vm6 = vcmask 850944  }
  0x13   :  { %3313 = vmatmul.msk.f32.vlgmr.msra.gmra.mxu0 %vm67_vm1, %v60_v7  ;;  %v392_v45 = vld [vmem:[%s6448_s4 + $0x48] sm:$0xff]  ;;  %v391_v47 = vld [vmem:[%s6448_s4 + $0x40] sm:$0xff]  ;;  %v390_v51 = vld [vmem:[%s6448_s4 + $0x38] sm:$0xff]  ;;  %vm470_vm11 = vcmask 64512   ;;  %vm1719_vm12 = vcmask 424960   ;;  %vm1986_vm13 = vcmask 261120  }
  0x14   :  { %3340 = vmatpush.msk.msrb.mxu0 %vm74_vm0, %v3339_v9  ;;  %v389_v55 = vld [vmem:[%s6448_s4 + $0x30] sm:$0xff]  ;;  %v3817_v56 = vld [vmem:[%s6447_s3] ss:$0 sm:$0xff]  ;;  %v388_v59 = vld [vmem:[%s6448_s4 + $0x28] sm:$0xff]  ;;  %s3300_s20 = sshll.u32 %s6462_s18, 4  ;;  %s3857_s21 = smov 128   ;;  %s3301_s20 = int_to_ptr.hbm [resolvable:$true] %s3300_s20 }
  0x15   :  { %v387_v63 = vld [vmem:[%s6448_s4 + $0x20] sm:$0xff]  ;;  %v386_v2 = vld [vmem:[%s6448_s4 + $0x18] sm:$0xff]  ;;  %v385_v5 = vld [vmem:[%s6448_s4 + $0x10] sm:$0xff] }
  0x16   :  { %252 = vmatpush.msrb.mxu0 %v3338_v10  ;;  %v6466_v10 = vmov 1.0  }
  0x17   :  { %v3322_v17 = vld [vmem:[%s6478_s0 + $0x20] sm:$0xff]  ;;  %v3323_v19 = vld [vmem:[%s6478_s0 + $0x28] sm:$0xff]  ;;  %v3324_v21 = vld [vmem:[%s6478_s0 + $0x30] sm:$0xff] }
  0x18   :  { %253 = vmatpush.msrb.mxu0 %v3337_v11  ;;  %v3343_v23 = vld [vmem:[%s6478_s0 + $0x40] sm:$0xff]  ;;  %v3325_v24 = vld [vmem:[%s6478_s0 + $0x38] sm:$0x3]  ;;  %v3344_v25 = vld [vmem:[%s6478_s0 + $0x48] sm:$0xff] }
  0x19   :  { %v101_v26 = vld [vmem:[%s6478_s0] sm:$0xff]  ;;  %v3345_v27 = vld [vmem:[%s6478_s0 + $0x50] sm:$0xff]  ;;  %v102_v28 = vld [vmem:[%s6478_s0 + $0x8] sm:$0xff] }
  0x1a   :  { %3321 = vmatmul.msk.f32.gmra.mxu1 %vm67_vm1, %v61_v12  ;;  %254 = vmatpush.msrb.mxu0 %v3336_v13  ;;  %v3346_v29 = vld [vmem:[%s6478_s0 + $0x58] sm:$0x3]  ;;  %v103_v30 = vld [vmem:[%s6478_s0 + $0x10] sm:$0xff] }
  0x1b   :  { %3314 = vmatmul.msk.f32.gmra.mxu0 %vm67_vm1, %v61_v12  ;;  %v104_v31 = vld [vmem:[%s6478_s0 + $0x18] sm:$0x3] }
  0x1c   :  { %403 = vmatpush.msra.mxu0 %v395_v42 }
  0x1e   :  { %404 = vmatpush.msra.mxu0 %v394_v43 }
  0x20   :  { %405 = vmatpush.msra.mxu0 %v393_v44 }
  0x22   :  { %406 = vmatpush.msra.mxu0 %v392_v45 }
  0x23   :  { %3341 = vmatmul.msk.f32.vlgmr.msrb.gmra.mxu0 %vm67_vm1, %v60_v7  ;;  %v384_v7 = vld [vmem:[%s6448_s4 + $0x8] sm:$0xff] }
  0x24   :  { %407 = vmatpush.msra.mxu0 %v391_v47 }
  0x26   :  { %408 = vmatpush.msra.mxu0 %v390_v51 }
  0x28   :  { %409 = vmatpush.msra.mxu0 %v389_v55 }
  0x2a   :  { %410 = vmatpush.msra.mxu0 %v388_v59 }
  0x2b   :  { %3342 = vmatmul.msk.f32.gmra.mxu0 %vm67_vm1, %v61_v12 }
  0x2c   :  { %411 = vmatpush.msra.mxu0 %v387_v63 }
  0x2e   :  { %412 = vmatpush.msra.mxu0 %v386_v2 }
  0x30   :  { %413 = vmatpush.msra.mxu0 %v385_v5 }
  0x32   :  { %414 = vmatpush.msra.mxu0 %v384_v7 }
  0x8f   :  { %v130_v14 = vpop.f32.mrf.mxu1 }
  0x90   :  { %v95_v15 = vpop.f32.mrf.mxu0 }
  0x97   :  { %v133_v16 = vpop.f32.mrf.mxu1 }
  0x98   :  { %3326 = vmatpush.msk.msra.mxu3 %vm154_vm2, %v133_v16  ;;  %v98_v18 = vpop.f32.mrf.mxu0 }
  0x9a   :  { %173 = vmatpush.msra.mxu3 %v130_v14  ;;  %v383_v14 = vld [vmem:[%s6448_s4] sm:$0xff] }
  0x9b   :  { %3327 = vmatmul.msk.f32.vlgmr.msra.gmra.mxu3 %vm141_vm3, %v3322_v17  ;;  %415 = vmatpush.msra.mxu0 %v383_v14  ;;  %v3854_v17 = vmov 338.0  }
  0x9c   :  { %3331 = vmatpush.msk.msrb.mxu3 %vm154_vm2, %v98_v18  ;;  %3819 = vrcp.f32 %v3854_v17 }
  0x9e   :  { %217 = vmatpush.msrb.mxu3 %v95_v15 }
  0xa0   :  { %v256_v20 = vpop.f32.mrf.mxu0 }
  0xa2   :  { %v3820_v18 = vpop.eup %3819 }
  0xa3   :  { %3328 = vmatmul.msk.f32.gmra.mxu3 %vm141_vm3, %v3323_v19  ;;  %v421_v19 = vmul.f32 338.0, %v3820_v18  ;;  %vm425_vm7 = vweird.f32 %v3820_v18 }
  0xa8   :  { %v259_v22 = vpop.f32.mrf.mxu0 }
  0xa9   :  { %3347 = vmatpush.msk.msrb.mxu1 %vm154_vm2, %v259_v22  ;;  %v469_v22 = vld [vmem:[%s6449_s5] sm:$0xff] }
  0xaa   :  { %489 = vmatpush.msra.mxu2 %v469_v22 }
  0xab   :  { %3329 = vmatmul.msk.f32.gmra.mxu3 %vm141_vm3, %v3324_v21  ;;  %297 = vmatpush.msrb.mxu1 %v256_v20  ;;  %v422_v20 = vsub.f32 1.0, %v421_v19  ;;  %v545_v19 = vld [vmem:[%s6453_s9 + $0x88] sm:$0xff] }
  0xac   :  { %3348 = vmatmul.msk.f32.vlgmr.msrb.gmra.mxu1 %vm141_vm3, %v3343_v23 }
  0xad   :  { %434 = vmatpush.msra.mxu1 %v395_v42  ;;  %v423_v21 = vmul.f32 %v3820_v18, %v422_v20  ;;  %v571_v42 = vld [vmem:[%s6453_s9 + $0x158] sm:$0xff]  ;;  %v546_v20 = vld [vmem:[%s6453_s9 + $0x90] sm:$0xff] }
  0xaf   :  { %435 = vmatpush.msra.mxu1 %v394_v43  ;;  %v424_v23 = vadd.f32 %v3820_v18, %v423_v21  ;;  %v547_v21 = vld [vmem:[%s6453_s9 + $0x98] sm:$0xff] }
  0xb1   :  { %436 = vmatpush.msra.mxu1 %v393_v44  ;;  %v564_v44 = vld [vmem:[%s6453_s9 + $0x120] sm:$0xff] }
  0xb3   :  { %3330 = vmatmul.msk.f32.gmra.mxu3 %vm141_vm3, %v3325_v24  ;;  %437 = vmatpush.msra.mxu1 %v392_v45  ;;  %v565_v45 = vld [vmem:[%s6453_s9 + $0x128] sm:$0xff] }
  0xb4   :  { %3349 = vmatmul.msk.f32.gmra.mxu1 %vm141_vm3, %v3344_v25  ;;  %v426_v25 = vsel %vm425_vm7, %v3820_v18, %v424_v23  ;;  %v544_v18 = vld [vmem:[%s6453_s9 + $0x80] sm:$0xff]  ;;  %v541_v23 = vld [vmem:[%s6453_s9 + $0x68] sm:$0xff] }
  0xb5   :  { %438 = vmatpush.msra.mxu1 %v391_v47  ;;  %v567_v47 = vld [vmem:[%s6453_s9 + $0x138] sm:$0xff] }
  0xb7   :  { %439 = vmatpush.msra.mxu1 %v390_v51  ;;  %v562_v51 = vld [vmem:[%s6453_s9 + $0x110] sm:$0xff] }
  0xb9   :  { %440 = vmatpush.msra.mxu1 %v389_v55  ;;  %v558_v55 = vld [vmem:[%s6453_s9 + $0xf0] sm:$0xff] }
  0xbb   :  { %3332 = vmatmul.msk.f32.vlgmr.msrb.gmra.mxu3 %vm141_vm3, %v101_v26  ;;  %441 = vmatpush.msra.mxu1 %v388_v59  ;;  %v554_v59 = vld [vmem:[%s6453_s9 + $0xd0] sm:$0xff] }
  0xbc   :  { %3350 = vmatmul.msk.f32.gmra.mxu1 %vm141_vm3, %v3345_v27 }
  0xbd   :  { %442 = vmatpush.msra.mxu1 %v387_v63  ;;  %v550_v63 = vld [vmem:[%s6453_s9 + $0xb0] sm:$0xff] }
  0xbf   :  { %443 = vmatpush.msra.mxu1 %v386_v2 }
  0xc1   :  { %444 = vmatpush.msra.mxu1 %v385_v5 }
  0xc3   :  { %3333 = vmatmul.msk.f32.gmra.mxu3 %vm141_vm3, %v102_v28  ;;  %445 = vmatpush.msra.mxu1 %v384_v7 }
  0xc4   :  { %3351 = vmatmul.msk.f32.gmra.mxu1 %vm141_vm3, %v3346_v29 }
  0xc5   :  { %446 = vmatpush.msra.mxu1 %v383_v14 }
  0xcb   :  { %3334 = vmatmul.msk.f32.gmra.mxu3 %vm141_vm3, %v103_v30  ;;  %v576_v30 = vld [vmem:[%s6453_s9 + $0x180] sm:$0xff] }
  0xcc   :  { %595 = vmatpush.msrb.mxu2 %v576_v30  ;;  %v532_v30 = vld [vmem:[%s6453_s9 + $0x20] sm:$0xff] }
  0xd3   :  { %3335 = vmatmul.msk.f32.gmra.mxu3 %vm141_vm3, %v104_v31  ;;  %v577_v31 = vld [vmem:[%s6453_s9 + $0x188] sm:$0xff] }
 0x11e   :  { %v175_v32 = vpop.f32.mrf.mxu3 }
 0x126   :  { %v178_v33 = vpop.f32.mrf.mxu3 }
 0x129   :  { %v299_v36 = vpop.f32.mrf.mxu1 }
 0x12e   :  { %v181_v34 = vpop.f32.mrf.mxu3 }
 0x131   :  { %v302_v38 = vpop.f32.mrf.mxu1 }
 0x136   :  { %v184_v35 = vpop.f32.mrf.mxu3 }
 0x139   :  { %v305_v40 = vpop.f32.mrf.mxu1 }
 0x13e   :  { %v219_v37 = vpop.f32.mrf.mxu3 }
 0x13f   :  { %v220_v52 = vadd.f32 %v219_v37, %v175_v32  ;;  %v578_v32 = vld [vmem:[%s6453_s9 + $0x190] sm:$0xff] }
 0x140   :  { %653 = vmatpush.msrb.mxu0 %v578_v32  ;;  %v574_v37 = vld [vmem:[%s6453_s9 + $0x170] sm:$0xff] }
 0x141   :  { %v308_v50 = vpop.f32.mrf.mxu1  ;;  %v311_v60 = vadd.f32 %v299_v36, %v220_v52  ;;  %v563_v52 = vld [vmem:[%s6453_s9 + $0x118] sm:$0xff]  ;;  %v534_v32 = vld [vmem:[%s6453_s9 + $0x30] sm:$0xff] }
 0x142   :  { %654 = vmatpush.msrb.mxu0 %v574_v37  ;;  %v531_v37 = vld [vmem:[%s6453_s9 + $0x18] sm:$0xff] }
 0x143   :  { %v318_v3 = vadd.f32 %v3817_v56, %v311_v60  ;;  %v555_v60 = vld [vmem:[%s6453_s9 + $0xd8] sm:$0xff] }
 0x145   :  { %v4102_v8 = vmax.f32 %v318_v3, 0.0 }
 0x146   :  { %v222_v39 = vpop.f32.mrf.mxu3 }
 0x147   :  { %v223_v48 = vadd.f32 %v222_v39, %v178_v33  ;;  %v356_v13 = vmul.f32 %v4102_v8, %v4102_v8  ;;  %v579_v33 = vld [vmem:[%s6453_s9 + $0x198] sm:$0xff]  ;;  %v568_v39 = vld [vmem:[%s6453_s9 + $0x140] sm:$0xff] }
 0x148   :  { %682 = vmatpush.msrb.mxu1 %v579_v33  ;;  %v535_v33 = vld [vmem:[%s6453_s9 + $0x38] sm:$0xff] }
 0x149   :  { %v312_v57 = vadd.f32 %v302_v38, %v223_v48  ;;  %v575_v38 = vld [vmem:[%s6453_s9 + $0x178] sm:$0xff] }
 0x14a   :  { %683 = vmatpush.msrb.mxu1 %v575_v38  ;;  %v3424_v38 = vld [vmem:[%s6453_s9 + $0x320] sm:$0xff] }
 0x14b   :  { %v319_v0 = vadd.f32 %v3817_v56, %v312_v57  ;;  %v552_v57 = vld [vmem:[%s6453_s9 + $0xc0] sm:$0xff] }
 0x14c   :  { %684 = vmatpush.msrb.mxu1 %v571_v42  ;;  %v3420_v42 = vld [vmem:[%s6453_s9 + $0x300] sm:$0xff] }
 0x14d   :  { %v4096_v6 = vmax.f32 %v319_v0, 0.0  ;;  %v551_v0 = vld [vmem:[%s6453_s9 + $0xb8] sm:$0xff] }
 0x14e   :  { %v225_v41 = vpop.f32.mrf.mxu3  ;;  %685 = vmatpush.msrb.mxu1 %v567_v47  ;;  %v3417_v47 = vld [vmem:[%s6453_s9 + $0x2e8] sm:$0xff] }
 0x14f   :  { %v226_v46 = vadd.f32 %v225_v41, %v181_v34  ;;  %v357_v12 = vmul.f32 %v4096_v6, %v4096_v6  ;;  %v572_v34 = vld [vmem:[%s6453_s9 + $0x160] sm:$0xff]  ;;  %v570_v41 = vld [vmem:[%s6453_s9 + $0x150] sm:$0xff] }
 0x150   :  { %596 = vmatpush.msrb.mxu2 %v572_v34  ;;  %655 = vmatpush.msrb.mxu0 %v570_v41  ;;  %v528_v34 = vld [vmem:[%s6453_s9] sm:$0xff]  ;;  %v3427_v41 = vld [vmem:[%s6453_s9 + $0x338] sm:$0xff] }
 0x151   :  { %v313_v53 = vadd.f32 %v305_v40, %v226_v46  ;;  %v569_v40 = vld [vmem:[%s6453_s9 + $0x148] sm:$0xff]  ;;  %v566_v46 = vld [vmem:[%s6453_s9 + $0x130] sm:$0xff]  ;;  %686 = vmatpush.msrb.mxu1 %v563_v52 }
 0x152   :  { %597 = vmatpush.msrb.mxu2 %v568_v39  ;;  %656 = vmatpush.msrb.mxu0 %v566_v46  ;;  %v3425_v39 = vld [vmem:[%s6453_s9 + $0x328] sm:$0xff]  ;;  %v3416_v46 = vld [vmem:[%s6453_s9 + $0x2e0] sm:$0xff]  ;;  %v3414_v52 = vld [vmem:[%s6453_s9 + $0x2d0] sm:$0xff] }
 0x153   :  { %v320_v61 = vadd.f32 %v3817_v56, %v313_v53  ;;  %v556_v53 = vld [vmem:[%s6453_s9 + $0xe0] sm:$0xff] }
 0x154   :  { %598 = vmatpush.msrb.mxu2 %v564_v44  ;;  %657 = vmatpush.msrb.mxu0 %v562_v51  ;;  %v3422_v44 = vld [vmem:[%s6453_s9 + $0x310] sm:$0xff]  ;;  %v3413_v51 = vld [vmem:[%s6453_s9 + $0x2c8] sm:$0xff] }
 0x155   :  { %v4090_v4 = vmax.f32 %v320_v61, 0.0  ;;  %v548_v61 = vld [vmem:[%s6453_s9 + $0xa0] sm:$0xff] }
 0x156   :  { %v228_v49 = vpop.f32.mrf.mxu3  ;;  %658 = vmatpush.msrb.mxu0 %v558_v55  ;;  %v3409_v55 = vld [vmem:[%s6453_s9 + $0x2a8] sm:$0xff] }
 0x157   :  { %v229_v54 = vadd.f32 %v228_v49, %v184_v35  ;;  %v358_v11 = vmul.f32 %v4090_v4, %v4090_v4  ;;  %v573_v35 = vld [vmem:[%s6453_s9 + $0x168] sm:$0xff]  ;;  %v560_v49 = vld [vmem:[%s6453_s9 + $0x100] sm:$0xff] }
 0x158   :  { %599 = vmatpush.msrb.mxu2 %v560_v49  ;;  %659 = vmatpush.msrb.mxu0 %v554_v59  ;;  %v3419_v49 = vld [vmem:[%s6453_s9 + $0x2f8] sm:$0xff]  ;;  %v3405_v59 = vld [vmem:[%s6453_s9 + $0x288] sm:$0xff] }
 0x159   :  { %v314_v58 = vadd.f32 %v308_v50, %v229_v54  ;;  %v561_v50 = vld [vmem:[%s6453_s9 + $0x108] sm:$0xff] }
 0x15a   :  { %v557_v54 = vld [vmem:[%s6453_s9 + $0xe8] sm:$0xff]  ;;  %600 = vmatpush.msrb.mxu2 %v556_v53  ;;  %660 = vmatpush.msrb.mxu0 %v550_v63  ;;  %v3415_v53 = vld [vmem:[%s6453_s9 + $0x2d8] sm:$0xff] }
 0x15b   :  { %v321_v62 = vadd.f32 %v3817_v56, %v314_v58  ;;  %v559_v56 = vld [vmem:[%s6453_s9 + $0xf8] sm:$0xff]  ;;  %v553_v58 = vld [vmem:[%s6453_s9 + $0xc8] sm:$0xff] }
 0x15c   :  { %687 = vmatpush.msrb.mxu1 %v559_v56  ;;  %601 = vmatpush.msrb.mxu2 %v552_v57  ;;  %v3410_v56 = vld [vmem:[%s6453_s9 + $0x2b0] sm:$0xff]  ;;  %v3411_v57 = vld [vmem:[%s6453_s9 + $0x2b8] sm:$0xff]  ;;  %v3401_v63 = vld [vmem:[%s6453_s9 + $0x268] sm:$0xff] }
 0x15d   :  { %v4083_v1 = vmax.f32 %v321_v62, 0.0  ;;  %v549_v62 = vld [vmem:[%s6453_s9 + $0xa8] sm:$0xff]  ;;  %661 = vmatpush.msrb.mxu0 %v546_v20  ;;  %v3391_v20 = vld [vmem:[%s6453_s9 + $0x218] sm:$0xff] }
 0x15e   :  { %688 = vmatpush.msrb.mxu1 %v555_v60  ;;  %602 = vmatpush.msrb.mxu2 %v548_v61  ;;  %v3406_v60 = vld [vmem:[%s6453_s9 + $0x290] sm:$0xff]  ;;  %v3407_v61 = vld [vmem:[%s6453_s9 + $0x298] sm:$0xff] }
 0x15f   :  { %3352 = vmatpush.msk.msra.mxu3 %vm332_vm4, %v4083_v1  ;;  %v359_v9 = vmul.f32 %v4083_v1, %v4083_v1 }
 0x160   :  { %689 = vmatpush.msrb.mxu1 %v551_v0  ;;  %603 = vmatpush.msrb.mxu2 %v544_v18  ;;  %v3402_v0 = vld [vmem:[%s6453_s9 + $0x270] sm:$0xff]  ;;  %v3389_v18 = vld [vmem:[%s6453_s9 + $0x208] sm:$0xff] }
 0x161   :  { %349 = vmatpush.msra.mxu3 %v4090_v4 }
 0x162   :  { %690 = vmatpush.msrb.mxu1 %v547_v21  ;;  %v3384_v21 = vld [vmem:[%s6453_s9 + $0x1e0] sm:$0xff] }
 0x163   :  { %350 = vmatpush.msra.mxu3 %v4096_v6 }
 0x165   :  { %351 = vmatpush.msra.mxu3 %v4102_v8 }
 0x166   :  { %3353 = vmatmul.msk.f32.vlgmr.msra.gmra.mxu3 %vm328_vm5, %v6466_v10 }
 0x167   :  { %3354 = vmatpush.msk.msrb.mxu3 %vm332_vm4, %v359_v9 }
 0x169   :  { %376 = vmatpush.msrb.mxu3 %v358_v11  ;;  %v326_v11 = vld [vmem:[%s6450_s6] sm:$0x1]  ;;  %s3858_s6 = smov 8  }
 0x16b   :  { %377 = vmatpush.msrb.mxu3 %v357_v12 }
 0x16d   :  { %378 = vmatpush.msrb.mxu3 %v356_v13 }
 0x16e   :  { %3355 = vmatmul.msk.f32.vlgmr.msrb.gmra.mxu3 %vm328_vm5, %v6466_v10 }
 0x16f   :  { %512 = vmatpush.msra.mxu3 %v469_v22  ;;  %v540_v22 = vld [vmem:[%s6453_s9 + $0x60] sm:$0xff] }
 0x170   :  { %604 = vmatpush.msrb.mxu2 %v540_v22  ;;  %v3385_v22 = vld [vmem:[%s6453_s9 + $0x1e8] sm:$0xff] }
 0x171   :  { %624 = vmatpush.msrb.mxu3 %v577_v31  ;;  %v533_v31 = vld [vmem:[%s6453_s9 + $0x28] sm:$0xff] }
 0x173   :  { %625 = vmatpush.msrb.mxu3 %v573_v35  ;;  %v529_v35 = vld [vmem:[%s6453_s9 + $0x8] sm:$0xff] }
 0x175   :  { %626 = vmatpush.msrb.mxu3 %v569_v40  ;;  %v3426_v40 = vld [vmem:[%s6453_s9 + $0x330] sm:$0xff] }
 0x177   :  { %627 = vmatpush.msrb.mxu3 %v565_v45  ;;  %v3423_v45 = vld [vmem:[%s6453_s9 + $0x318] sm:$0xff] }
 0x179   :  { %628 = vmatpush.msrb.mxu3 %v561_v50  ;;  %v3412_v50 = vld [vmem:[%s6453_s9 + $0x2c0] sm:$0xff] }
 0x17b   :  { %629 = vmatpush.msrb.mxu3 %v557_v54  ;;  %v3408_v54 = vld [vmem:[%s6453_s9 + $0x2a0] sm:$0xff] }
 0x17d   :  { %630 = vmatpush.msrb.mxu3 %v553_v58  ;;  %v3404_v58 = vld [vmem:[%s6453_s9 + $0x280] sm:$0xff] }
 0x17f   :  { %631 = vmatpush.msrb.mxu3 %v549_v62  ;;  %v3400_v62 = vld [vmem:[%s6453_s9 + $0x260] sm:$0xff] }
 0x181   :  { %632 = vmatpush.msrb.mxu3 %v545_v19  ;;  %v3390_v19 = vld [vmem:[%s6453_s9 + $0x210] sm:$0xff] }
 0x183   :  { %633 = vmatpush.msrb.mxu3 %v541_v23 }
 0x1e9   :  { %v353_v15 = vpop.f32.mrf.mxu3 }
 0x1ea   :  { %3356 = vmatmul.msk.f32.vlgmr.msra.gmra.mxu0 %vm396_vm6, %v353_v15  ;;  %v327_v15 = vld [vmem:[%s6451_s7] sm:$0x1] }
 0x1f1   :  { %v380_v16 = vpop.f32.mrf.mxu3 }
 0x1f2   :  { %3357 = vmatmul.msk.f32.vlgmr.msra.gmra.mxu1 %vm396_vm6, %v380_v16 }
 0x267   :  { %v417_v24 = vpop.f32.mrf.mxu0 }
 0x268   :  { %v4126_v26 = vmul.f32 %v426_v25, %v417_v24  ;;  %v542_v24 = vld [vmem:[%s6453_s9 + $0x70] sm:$0xff] }
 0x269   :  { %662 = vmatpush.msrb.mxu0 %v542_v24  ;;  %v3386_v24 = vld [vmem:[%s6453_s9 + $0x1f0] sm:$0xff] }
 0x26a   :  { %v452_v28 = vmul.f32 %v4126_v26, %v4126_v26 }
 0x26f   :  { %v448_v27 = vpop.f32.mrf.mxu1 }
 0x270   :  { %v451_v29 = vmul.f32 %v448_v27, %v426_v25  ;;  %v543_v25 = vld [vmem:[%s6453_s9 + $0x78] sm:$0xff]  ;;  %v537_v27 = vld [vmem:[%s6453_s9 + $0x48] sm:$0xff] }
 0x271   :  { %691 = vmatpush.msrb.mxu1 %v543_v25  ;;  %634 = vmatpush.msrb.mxu3 %v537_v27  ;;  %v3387_v25 = vld [vmem:[%s6453_s9 + $0x1f8] sm:$0xff] }
 0x272   :  { %v453_v36 = vsub.f32 %v451_v29, %v452_v28  ;;  %v538_v28 = vld [vmem:[%s6453_s9 + $0x50] sm:$0xff]  ;;  %v539_v29 = vld [vmem:[%s6453_s9 + $0x58] sm:$0xff] }
 0x273   :  { %663 = vmatpush.msrb.mxu0 %v538_v28  ;;  %692 = vmatpush.msrb.mxu1 %v539_v29  ;;  %v3380_v28 = vld [vmem:[%s6453_s9 + $0x1c0] sm:$0xff]  ;;  %v3381_v29 = vld [vmem:[%s6453_s9 + $0x1c8] sm:$0xff] }
 0x274   :  { %v454_v43 = vmax.f32 %v453_v36, 0.0  ;;  %635 = vmatpush.msrb.mxu3 %v533_v31  ;;  %v530_v36 = vld [vmem:[%s6453_s9 + $0x10] sm:$0xff]  ;;  %v3383_v31 = vld [vmem:[%s6453_s9 + $0x1d8] sm:$0xff] }
 0x275   :  { %664 = vmatpush.msrb.mxu0 %v534_v32  ;;  %693 = vmatpush.msrb.mxu1 %v535_v33  ;;  %v3376_v32 = vld [vmem:[%s6453_s9 + $0x1a0] sm:$0xff]  ;;  %v3377_v33 = vld [vmem:[%s6453_s9 + $0x1a8] sm:$0xff] }
 0x276   :  { %v455_v48 = vadd.f32 1e-05, %v454_v43  ;;  %636 = vmatpush.msrb.mxu3 %v529_v35  ;;  %v3421_v43 = vld [vmem:[%s6453_s9 + $0x308] sm:$0xff]  ;;  %v3379_v35 = vld [vmem:[%s6453_s9 + $0x1b8] sm:$0xff] }
 0x277   :  { %665 = vmatpush.msrb.mxu0 %v530_v36  ;;  %694 = vmatpush.msrb.mxu1 %v531_v37 }
 0x278   :  { %3821 = vrsqrt.f32 %v455_v48  ;;  %vm462_vm9 = vweird.f32 %v455_v48 }
 0x279   :  { %829 = vmatpush.msra.mxu0 %v3426_v40  ;;  %858 = vmatpush.msra.mxu1 %v3427_v41 }
 0x27b   :  { %830 = vmatpush.msra.mxu0 %v3422_v44  ;;  %859 = vmatpush.msra.mxu1 %v3423_v45 }
 0x27d   :  { %860 = vmatpush.msra.mxu1 %v3419_v49 }
 0x27e   :  { %v3822_v2 = vpop.eup %3821 }
 0x27f   :  { %v457_v3 = vmul.f32 %v3822_v2, %v455_v48  ;;  %vm463_vm8 = vweird.f32 %v3822_v2  ;;  %v3418_v48 = vld [vmem:[%s6453_s9 + $0x2f0] sm:$0xff]  ;;  %861 = vmatpush.msra.mxu1 %v3415_v53 }
 0x280   :  { %vm464_vm10 = vmor %vm462_vm9, %vm463_vm8  ;;  %831 = vmatpush.msra.mxu0 %v3418_v48 }
 0x281   :  { %v458_v5 = vmul.f32 %v3822_v2, %v457_v3  ;;  %862 = vmatpush.msra.mxu1 %v3411_v57  ;;  %v3396_v3 = vld [vmem:[%s6453_s9 + $0x240] sm:$0xff] }
 0x282   :  { %832 = vmatpush.msra.mxu0 %v3414_v52 }
 0x283   :  { %v459_v7 = vmul.f32 0.5, %v458_v5  ;;  %863 = vmatpush.msra.mxu1 %v3407_v61  ;;  %v3397_v5 = vld [vmem:[%s6453_s9 + $0x248] sm:$0xff] }
 0x284   :  { %833 = vmatpush.msra.mxu0 %v3410_v56 }
 0x285   :  { %v460_v9 = vsub.f32 1.5, %v459_v7  ;;  %v3398_v7 = vld [vmem:[%s6453_s9 + $0x250] sm:$0xff] }
 0x286   :  { %834 = vmatpush.msra.mxu0 %v3406_v60 }
 0x287   :  { %v461_v12 = vmul.f32 %v3822_v2, %v460_v9  ;;  %v3399_v9 = vld [vmem:[%s6453_s9 + $0x258] sm:$0xff] }
 0x288   :  { %835 = vmatpush.msra.mxu0 %v3402_v0 }
 0x289   :  { %v465_v13 = vsel %vm464_vm10, %v3822_v2, %v461_v12  ;;  %v3403_v2 = vld [vmem:[%s6453_s9 + $0x278] sm:$0xff]  ;;  %v3393_v12 = vld [vmem:[%s6453_s9 + $0x228] sm:$0xff] }
 0x28a   :  { %v466_v14 = vmul.f32 %v465_v13, %v326_v11  ;;  %864 = vmatpush.msra.mxu1 %v3403_v2  ;;  %v3392_v11 = vld [vmem:[%s6453_s9 + $0x220] sm:$0xff]  ;;  %v3394_v13 = vld [vmem:[%s6453_s9 + $0x230] sm:$0xff]  ;;  %836 = vmatpush.msra.mxu0 %v3398_v7 }
 0x28c   :  { %v467_v16 = vmul.f32 %v466_v14, %v4126_v26  ;;  %3358 = vmatmul.msk.f32.vlgmr.msra.gmra.mxu2 %vm470_vm11, %v466_v14  ;;  %v536_v26 = vld [vmem:[%s6453_s9 + $0x40] sm:$0xff]  ;;  %v3395_v14 = vld [vmem:[%s6453_s9 + $0x238] sm:$0xff]  ;;  %865 = vmatpush.msra.mxu1 %v3399_v9 }
 0x28d   :  { %605 = vmatpush.msrb.mxu2 %v536_v26  ;;  %837 = vmatpush.msra.mxu0 %v3394_v13  ;;  %v3445_v13 = vld [vmem:[%s6452_s8 + $0x40] sm:$0xff] }
 0x28e   :  { %v468_v17 = vsub.f32 %v327_v15, %v467_v16  ;;  %866 = vmatpush.msra.mxu1 %v3395_v14  ;;  %v3446_v14 = vld [vmem:[%s6452_s8 + $0x48] sm:$0xff] }
 0x28f   :  { %606 = vmatpush.msrb.mxu2 %v532_v30  ;;  %838 = vmatpush.msra.mxu0 %v3390_v19  ;;  %v708_v19 = vld [vmem:[%s6452_s8] sm:$0xff] }
 0x290   :  { %3359 = vmatmul.msk.f32.vlgmr.msra.gmra.mxu3 %vm470_vm11, %v468_v17  ;;  %v3388_v17 = vld [vmem:[%s6453_s9 + $0x200] sm:$0xff]  ;;  %867 = vmatpush.msra.mxu1 %v3391_v20  ;;  %v3565_v20 = vld [vmem:[%s6453_s9 + $0x4d0] sm:$0xff] }
 0x291   :  { %607 = vmatpush.msrb.mxu2 %v528_v34  ;;  %800 = vmatpush.msra.mxu3 %v3425_v39  ;;  %v3378_v34 = vld [vmem:[%s6453_s9 + $0x1b0] sm:$0xff] }
 0x292   :  { %839 = vmatpush.msra.mxu0 %v3386_v24  ;;  %868 = vmatpush.msra.mxu1 %v3387_v25  ;;  %v3557_v24 = vld [vmem:[%s6453_s9 + $0x490] sm:$0xff]  ;;  %v3558_v25 = vld [vmem:[%s6453_s9 + $0x498] sm:$0xff] }
 0x293   :  { %771 = vmatpush.msra.mxu2 %v3424_v38  ;;  %801 = vmatpush.msra.mxu3 %v3421_v43 }
 0x294   :  { %869 = vmatpush.msra.mxu1 %v3383_v31  ;;  %v3559_v31 = vld [vmem:[%s6453_s9 + $0x4a0] sm:$0xff] }
 0x295   :  { %772 = vmatpush.msra.mxu2 %v3420_v42  ;;  %802 = vmatpush.msra.mxu3 %v3417_v47 }
 0x296   :  { %870 = vmatpush.msra.mxu1 %v3379_v35  ;;  %v3555_v35 = vld [vmem:[%s6453_s9 + $0x480] sm:$0xff] }
 0x297   :  { %773 = vmatpush.msra.mxu2 %v3416_v46  ;;  %803 = vmatpush.msra.mxu3 %v3413_v51 }
 0x299   :  { %774 = vmatpush.msra.mxu2 %v3412_v50  ;;  %804 = vmatpush.msra.mxu3 %v3409_v55 }
 0x29b   :  { %775 = vmatpush.msra.mxu2 %v3408_v54  ;;  %805 = vmatpush.msra.mxu3 %v3405_v59 }
 0x29d   :  { %776 = vmatpush.msra.mxu2 %v3404_v58  ;;  %806 = vmatpush.msra.mxu3 %v3401_v63 }
 0x29f   :  { %777 = vmatpush.msra.mxu2 %v3400_v62  ;;  %807 = vmatpush.msra.mxu3 %v3397_v5 }
 0x2a1   :  { %778 = vmatpush.msra.mxu2 %v3396_v3  ;;  %808 = vmatpush.msra.mxu3 %v3393_v12  ;;  %v3444_v12 = vld [vmem:[%s6452_s8 + $0x38] sm:$0xff] }
 0x2a3   :  { %779 = vmatpush.msra.mxu2 %v3392_v11  ;;  %809 = vmatpush.msra.mxu3 %v3389_v18  ;;  %v3450_v18 = vld [vmem:[%s6452_s8 + $0x68] sm:$0xf] }
 0x2a5   :  { %780 = vmatpush.msra.mxu2 %v3388_v17  ;;  %810 = vmatpush.msra.mxu3 %v3385_v22  ;;  %v3449_v17 = vld [vmem:[%s6452_s8 + $0x60] sm:$0xff]  ;;  %v3561_v22 = vld [vmem:[%s6453_s9 + $0x4b0] sm:$0xff] }
 0x2a7   :  { %781 = vmatpush.msra.mxu2 %v3384_v21  ;;  %811 = vmatpush.msra.mxu3 %v3381_v29  ;;  %v3566_v21 = vld [vmem:[%s6453_s9 + $0x4d8] sm:$0xff] }
 0x2a8   :  { %v3554_v29 = vld [vmem:[%s6453_s9 + $0x478] sm:$0xff] }
 0x2a9   :  { %782 = vmatpush.msra.mxu2 %v3380_v28  ;;  %812 = vmatpush.msra.mxu3 %v3377_v33  ;;  %v3553_v28 = vld [vmem:[%s6453_s9 + $0x470] sm:$0xff] }
 0x2aa   :  { %v3549_v33 = vld [vmem:[%s6453_s9 + $0x450] sm:$0xff] }
 0x2ab   :  { %783 = vmatpush.msra.mxu2 %v3376_v32  ;;  %v3560_v32 = vld [vmem:[%s6453_s9 + $0x4a8] sm:$0xff] }
 0x30f   :  { %v491_v15 = vpop.f32.mrf.mxu2 }
 0x310   :  { %v517_v16 = vperm.slane %v491_v15, 0  ;;  %v3447_v15 = vld [vmem:[%s6452_s8 + $0x50] sm:$0xff] }
 0x312   :  { %v518_v26 = vmul.f32 %v517_v16, %v4102_v8  ;;  %v3382_v8 = vld [vmem:[%s6453_s9 + $0x1d0] sm:$0xff]  ;;  %v519_v36 = vmul.f32 %v517_v16, %v4096_v6  ;;  %v520_v38 = vmul.f32 %v517_v16, %v4090_v4  ;;  %v521_v6 = vmul.f32 %v517_v16, %v4083_v1  ;;  %v3448_v16 = vld [vmem:[%s6452_s8 + $0x58] sm:$0xff] }
 0x313   :  { %v514_v23 = vpop.f32.mrf.mxu3  ;;  %840 = vmatpush.msra.mxu0 %v3382_v8  ;;  %v709_v8 = vld [vmem:[%s6452_s8 + $0x8] sm:$0xff] }
 0x314   :  { %v522_v27 = vperm.slane %v514_v23, 0  ;;  %v3562_v23 = vld [vmem:[%s6453_s9 + $0x4b8] sm:$0xff] }
 0x315   :  { %841 = vmatpush.msra.mxu0 %v3378_v34  ;;  %v3550_v34 = vld [vmem:[%s6453_s9 + $0x458] sm:$0xff] }
 0x316   :  { %v4432_v30 = vadd.f32 %v522_v27, %v518_v26  ;;  %v4461_v37 = vadd.f32 %v522_v27, %v519_v36  ;;  %v4472_v39 = vadd.f32 %v522_v27, %v520_v38  ;;  %v4483_v40 = vadd.f32 %v522_v27, %v521_v6  ;;  %v3563_v26 = vld [vmem:[%s6453_s9 + $0x4c0] sm:$0xff]  ;;  %v3564_v27 = vld [vmem:[%s6453_s9 + $0x4c8] sm:$0xff]  ;;  %v3545_v38 = vld [vmem:[%s6453_s9 + $0x430] sm:$0xff] }
 0x317   :  { %v3556_v36 = vld [vmem:[%s6453_s9 + $0x488] sm:$0xff]  ;;  %v3546_v6 = vld [vmem:[%s6453_s9 + $0x438] sm:$0xff] }
 0x318   :  { %3360 = vmatmul.msk.f32.vlgmr.msrb.gmra.mxu2 %vm396_vm6, %v4432_v30  ;;  %3364 = vmatmul.msk.f32.vlgmr.msrb.gmra.mxu3 %vm396_vm6, %v4432_v30 }
 0x319   :  { %3368 = vmatmul.msk.f32.vlgmr.msrb.gmra.mxu0 %vm396_vm6, %v4432_v30  ;;  %3372 = vmatmul.msk.f32.vlgmr.msrb.gmra.mxu1 %vm396_vm6, %v4432_v30 }
 0x320   :  { %3361 = vmatmul.msk.f32.gmra.mxu2 %vm396_vm6, %v4461_v37  ;;  %3365 = vmatmul.msk.f32.gmra.mxu3 %vm396_vm6, %v4461_v37 }
 0x321   :  { %3369 = vmatmul.msk.f32.gmra.mxu0 %vm396_vm6, %v4461_v37  ;;  %3373 = vmatmul.msk.f32.gmra.mxu1 %vm396_vm6, %v4461_v37 }
 0x328   :  { %3362 = vmatmul.msk.f32.gmra.mxu2 %vm396_vm6, %v4472_v39  ;;  %3366 = vmatmul.msk.f32.gmra.mxu3 %vm396_vm6, %v4472_v39 }
 0x329   :  { %3370 = vmatmul.msk.f32.gmra.mxu0 %vm396_vm6, %v4472_v39  ;;  %3374 = vmatmul.msk.f32.gmra.mxu1 %vm396_vm6, %v4472_v39 }
 0x330   :  { %3363 = vmatmul.msk.f32.gmra.mxu2 %vm396_vm6, %v4483_v40  ;;  %3367 = vmatmul.msk.f32.gmra.mxu3 %vm396_vm6, %v4483_v40 }
 0x331   :  { %3371 = vmatmul.msk.f32.gmra.mxu0 %vm396_vm6, %v4483_v40  ;;  %3375 = vmatmul.msk.f32.gmra.mxu1 %vm396_vm6, %v4483_v40 }
 0x338   :  { %3428 = vmatmul.msk.f32.vlgmr.msra.gmra.mxu2 %vm396_vm6, %v4432_v30  ;;  %3432 = vmatmul.msk.f32.vlgmr.msra.gmra.mxu3 %vm396_vm6, %v4432_v30 }
 0x339   :  { %3436 = vmatmul.msk.f32.vlgmr.msra.gmra.mxu0 %vm396_vm6, %v4432_v30  ;;  %3440 = vmatmul.msk.f32.vlgmr.msra.gmra.mxu1 %vm396_vm6, %v4432_v30 }
 0x340   :  { %3429 = vmatmul.msk.f32.gmra.mxu2 %vm396_vm6, %v4461_v37  ;;  %3433 = vmatmul.msk.f32.gmra.mxu3 %vm396_vm6, %v4461_v37 }
 0x341   :  { %3437 = vmatmul.msk.f32.gmra.mxu0 %vm396_vm6, %v4461_v37  ;;  %3441 = vmatmul.msk.f32.gmra.mxu1 %vm396_vm6, %v4461_v37 }
 0x348   :  { %3430 = vmatmul.msk.f32.gmra.mxu2 %vm396_vm6, %v4472_v39  ;;  %3434 = vmatmul.msk.f32.gmra.mxu3 %vm396_vm6, %v4472_v39 }
 0x349   :  { %3438 = vmatmul.msk.f32.gmra.mxu0 %vm396_vm6, %v4472_v39  ;;  %3442 = vmatmul.msk.f32.gmra.mxu1 %vm396_vm6, %v4472_v39 }
 0x350   :  { %3431 = vmatmul.msk.f32.gmra.mxu2 %vm396_vm6, %v4483_v40  ;;  %3435 = vmatmul.msk.f32.gmra.mxu3 %vm396_vm6, %v4483_v40 }
 0x351   :  { %3439 = vmatmul.msk.f32.gmra.mxu0 %vm396_vm6, %v4483_v40  ;;  %3443 = vmatmul.msk.f32.gmra.mxu1 %vm396_vm6, %v4483_v40 }
 0x396   :  { %v667_v1 = vpop.f32.mrf.mxu0  ;;  %v696_v4 = vpop.f32.mrf.mxu1 }
 0x39b   :  { %v4525_v41 = vpop.f32.mrf.mxu2  ;;  %v4527_v42 = vpop.f32.mrf.mxu3 }
 0x39e   :  { %v670_v43 = vpop.f32.mrf.mxu0  ;;  %v699_v44 = vpop.f32.mrf.mxu1 }
 0x3a3   :  { %v612_v45 = vpop.f32.mrf.mxu2  ;;  %v641_v46 = vpop.f32.mrf.mxu3 }
 0x3a6   :  { %v673_v47 = vpop.f32.mrf.mxu0  ;;  %v702_v48 = vpop.f32.mrf.mxu1 }
 0x3ab   :  { %v615_v49 = vpop.f32.mrf.mxu2  ;;  %v644_v50 = vpop.f32.mrf.mxu3 }
 0x3ae   :  { %v676_v51 = vpop.f32.mrf.mxu0  ;;  %v705_v52 = vpop.f32.mrf.mxu1 }
 0x3b3   :  { %v618_v53 = vpop.f32.mrf.mxu2  ;;  %v647_v54 = vpop.f32.mrf.mxu3 }
 0x3b6   :  { %v843_v55 = vpop.f32.mrf.mxu0  ;;  %v872_v56 = vpop.f32.mrf.mxu1 }
 0x3bb   :  { %v785_v57 = vpop.f32.mrf.mxu2  ;;  %v814_v58 = vpop.f32.mrf.mxu3 }
 0x3be   :  { %v846_v59 = vpop.f32.mrf.mxu0  ;;  %v875_v60 = vpop.f32.mrf.mxu1 }
 0x3c3   :  { %v788_v61 = vpop.f32.mrf.mxu2  ;;  %v817_v62 = vpop.f32.mrf.mxu3 }
 0x3c6   :  { %v849_v63 = vpop.f32.mrf.mxu0  ;;  %v878_v0 = vpop.f32.mrf.mxu1 }
 0x3cb   :  { %v791_v2 = vpop.f32.mrf.mxu2  ;;  %v820_v3 = vpop.f32.mrf.mxu3 }
 0x3ce   :  { %v852_v5 = vpop.f32.mrf.mxu0  ;;  %v881_v7 = vpop.f32.mrf.mxu1 }
 0x3cf   :  { %3467 = vmatpush.msk.msrb.mxu0 %vm332_vm4, %v852_v5  ;;  %3475 = vmatpush.msk.msrb.mxu1 %vm332_vm4, %v881_v7  ;;  %v3517_v5 = vld [vmem:[%s6453_s9 + $0x350] sm:$0xff]  ;;  %v3518_v7 = vld [vmem:[%s6453_s9 + $0x358] sm:$0xff] }
 0x3d1   :  { %1014 = vmatpush.msrb.mxu0 %v849_v63  ;;  %1052 = vmatpush.msrb.mxu1 %v878_v0  ;;  %v3521_v63 = vld [vmem:[%s6453_s9 + $0x370] sm:$0xff]  ;;  %v3522_v0 = vld [vmem:[%s6453_s9 + $0x378] sm:$0xff] }
 0x3d3   :  { %1015 = vmatpush.msrb.mxu0 %v846_v59  ;;  %1053 = vmatpush.msrb.mxu1 %v875_v60  ;;  %v794_v9 = vpop.f32.mrf.mxu2  ;;  %v823_v11 = vpop.f32.mrf.mxu3  ;;  %v3525_v59 = vld [vmem:[%s6453_s9 + $0x390] sm:$0xff]  ;;  %v3526_v60 = vld [vmem:[%s6453_s9 + $0x398] sm:$0xff] }
 0x3d4   :  { %3451 = vmatpush.msk.msrb.mxu2 %vm332_vm4, %v794_v9  ;;  %3459 = vmatpush.msk.msrb.mxu3 %vm332_vm4, %v823_v11  ;;  %v3523_v9 = vld [vmem:[%s6453_s9 + $0x380] sm:$0xff]  ;;  %v3524_v11 = vld [vmem:[%s6453_s9 + $0x388] sm:$0xff] }
 0x3d5   :  { %1016 = vmatpush.msrb.mxu0 %v843_v55  ;;  %1054 = vmatpush.msrb.mxu1 %v872_v56  ;;  %v3530_v55 = vld [vmem:[%s6453_s9 + $0x3b8] sm:$0xff]  ;;  %v3535_v56 = vld [vmem:[%s6453_s9 + $0x3e0] sm:$0xff] }
 0x3d6   :  { %3468 = vmatmul.msk.f32.vlgmr.msrb.gmra.mxu0 %vm328_vm5, %v3444_v12  ;;  %3476 = vmatmul.msk.f32.vlgmr.msrb.gmra.mxu1 %vm328_vm5, %v3444_v12 }
 0x3d7   :  { %3499 = vmatpush.msk.msra.mxu0 %vm332_vm4, %v676_v51  ;;  %3507 = vmatpush.msk.msra.mxu1 %vm332_vm4, %v705_v52  ;;  %v3534_v51 = vld [vmem:[%s6453_s9 + $0x3d8] sm:$0xff]  ;;  %v3539_v52 = vld [vmem:[%s6453_s9 + $0x400] sm:$0xff] }
 0x3d8   :  { %938 = vmatpush.msrb.mxu2 %v791_v2  ;;  %976 = vmatpush.msrb.mxu3 %v820_v3  ;;  %v3527_v2 = vld [vmem:[%s6453_s9 + $0x3a0] sm:$0xff]  ;;  %v3528_v3 = vld [vmem:[%s6453_s9 + $0x3a8] sm:$0xff] }
 0x3d9   :  { %1199 = vmatpush.msra.mxu0 %v673_v47  ;;  %1237 = vmatpush.msra.mxu1 %v702_v48  ;;  %v3538_v47 = vld [vmem:[%s6453_s9 + $0x3f8] sm:$0xff]  ;;  %v3543_v48 = vld [vmem:[%s6453_s9 + $0x420] sm:$0xff] }
 0x3da   :  { %939 = vmatpush.msrb.mxu2 %v788_v61  ;;  %977 = vmatpush.msrb.mxu3 %v817_v62  ;;  %v3531_v61 = vld [vmem:[%s6453_s9 + $0x3c0] sm:$0xff]  ;;  %v3532_v62 = vld [vmem:[%s6453_s9 + $0x3c8] sm:$0xff] }
 0x3db   :  { %1200 = vmatpush.msra.mxu0 %v670_v43  ;;  %1238 = vmatpush.msra.mxu1 %v699_v44  ;;  %v3547_v43 = vld [vmem:[%s6453_s9 + $0x440] sm:$0xff]  ;;  %v3548_v44 = vld [vmem:[%s6453_s9 + $0x448] sm:$0xff] }
 0x3dc   :  { %940 = vmatpush.msrb.mxu2 %v785_v57  ;;  %978 = vmatpush.msrb.mxu3 %v814_v58  ;;  %v3536_v57 = vld [vmem:[%s6453_s9 + $0x3e8] sm:$0xff]  ;;  %v711_v58 = vld [vmem:[%s6452_s8 + $0x18] sm:$0xff] }
 0x3dd   :  { %3452 = vmatmul.msk.f32.vlgmr.msrb.gmra.mxu2 %vm328_vm5, %v3444_v12  ;;  %3460 = vmatmul.msk.f32.vlgmr.msrb.gmra.mxu3 %vm328_vm5, %v3444_v12  ;;  %v712_v12 = vld [vmem:[%s6452_s8 + $0x20] sm:$0xff] }
 0x3de   :  { %3483 = vmatpush.msk.msra.mxu2 %vm332_vm4, %v618_v53  ;;  %3491 = vmatpush.msk.msra.mxu3 %vm332_vm4, %v647_v54  ;;  %v3540_v53 = vld [vmem:[%s6453_s9 + $0x408] sm:$0xff]  ;;  %v3529_v54 = vld [vmem:[%s6453_s9 + $0x3b0] sm:$0xff] }
 0x3df   :  { %1201 = vmatpush.msra.mxu0 %v667_v1  ;;  %1239 = vmatpush.msra.mxu1 %v696_v4  ;;  %v3551_v1 = vld [vmem:[%s6453_s9 + $0x460] sm:$0xff]  ;;  %v3552_v4 = vld [vmem:[%s6453_s9 + $0x468] sm:$0xff] }
 0x3e0   :  { %3469 = vmatmul.msk.f32.gmra.mxu0 %vm328_vm5, %v3445_v13  ;;  %3477 = vmatmul.msk.f32.gmra.mxu1 %vm328_vm5, %v3445_v13 }
 0x3e1   :  { %1123 = vmatpush.msra.mxu2 %v615_v49  ;;  %1161 = vmatpush.msra.mxu3 %v644_v50  ;;  %v3544_v49 = vld [vmem:[%s6453_s9 + $0x428] sm:$0xff]  ;;  %v3533_v50 = vld [vmem:[%s6453_s9 + $0x3d0] sm:$0xff] }
 0x3e2   :  { %1376 = vmatpush.msrb.mxu0 %v3565_v20  ;;  %1405 = vmatpush.msrb.mxu1 %v3566_v21 }
 0x3e3   :  { %1124 = vmatpush.msra.mxu2 %v612_v45  ;;  %1162 = vmatpush.msra.mxu3 %v641_v46  ;;  %v710_v45 = vld [vmem:[%s6452_s8 + $0x10] sm:$0xff] }
 0x3e4   :  { %1377 = vmatpush.msrb.mxu0 %v3561_v22  ;;  %1406 = vmatpush.msrb.mxu1 %v3562_v23  ;;  %v3537_v46 = vld [vmem:[%s6453_s9 + $0x3f0] sm:$0xff] }
 0x3e5   :  { %1125 = vmatpush.msra.mxu2 %v4525_v41  ;;  %1163 = vmatpush.msra.mxu3 %v4527_v42  ;;  %v3541_v41 = vld [vmem:[%s6453_s9 + $0x410] sm:$0xff]  ;;  %v3542_v42 = vld [vmem:[%s6453_s9 + $0x418] sm:$0xff] }
 0x3e6   :  { %3453 = vmatmul.msk.f32.gmra.mxu2 %vm328_vm5, %v3445_v13  ;;  %3461 = vmatmul.msk.f32.gmra.mxu3 %vm328_vm5, %v3445_v13  ;;  %v3519_v13 = vld [vmem:[%s6453_s9 + $0x360] sm:$0xff] }
 0x3e7   :  { %1318 = vmatpush.msrb.mxu2 %v3563_v26  ;;  %1347 = vmatpush.msrb.mxu3 %v3564_v27 }
 0x3e8   :  { %3470 = vmatmul.msk.f32.gmra.mxu0 %vm328_vm5, %v3446_v14  ;;  %3478 = vmatmul.msk.f32.gmra.mxu1 %vm328_vm5, %v3446_v14 }
 0x3e9   :  { %1378 = vmatpush.msrb.mxu0 %v3557_v24  ;;  %1407 = vmatpush.msrb.mxu1 %v3558_v25 }
 0x3ea   :  { %1319 = vmatpush.msrb.mxu2 %v3559_v31  ;;  %1348 = vmatpush.msrb.mxu3 %v3560_v32 }
 0x3eb   :  { %1379 = vmatpush.msrb.mxu0 %v3553_v28  ;;  %1408 = vmatpush.msrb.mxu1 %v3554_v29 }
 0x3ec   :  { %1320 = vmatpush.msrb.mxu2 %v3555_v35  ;;  %1349 = vmatpush.msrb.mxu3 %v3556_v36 }
 0x3ed   :  { %1380 = vmatpush.msrb.mxu0 %v3549_v33  ;;  %1409 = vmatpush.msrb.mxu1 %v3550_v34 }
 0x3ee   :  { %3454 = vmatmul.msk.f32.gmra.mxu2 %vm328_vm5, %v3446_v14  ;;  %3462 = vmatmul.msk.f32.gmra.mxu3 %vm328_vm5, %v3446_v14  ;;  %v3520_v14 = vld [vmem:[%s6453_s9 + $0x368] sm:$0xff] }
 0x3ef   :  { %1381 = vmatpush.msrb.mxu0 %v3545_v38  ;;  %1410 = vmatpush.msrb.mxu1 %v3546_v6 }
 0x3f0   :  { %3471 = vmatmul.msk.f32.gmra.mxu0 %vm328_vm5, %v3447_v15  ;;  %3479 = vmatmul.msk.f32.gmra.mxu1 %vm328_vm5, %v3447_v15 }
 0x3f1   :  { %1321 = vmatpush.msrb.mxu2 %v3551_v1  ;;  %1350 = vmatpush.msrb.mxu3 %v3552_v4 }
 0x3f2   :  { %1382 = vmatpush.msrb.mxu0 %v3541_v41  ;;  %1411 = vmatpush.msrb.mxu1 %v3542_v42 }
 0x3f3   :  { %1322 = vmatpush.msrb.mxu2 %v3547_v43  ;;  %1351 = vmatpush.msrb.mxu3 %v3548_v44 }
 0x3f4   :  { %1383 = vmatpush.msrb.mxu0 %v3537_v46  ;;  %1412 = vmatpush.msrb.mxu1 %v3538_v47 }
 0x3f5   :  { %1323 = vmatpush.msrb.mxu2 %v3543_v48  ;;  %1352 = vmatpush.msrb.mxu3 %v3544_v49 }
 0x3f6   :  { %3455 = vmatmul.msk.f32.gmra.mxu2 %vm328_vm5, %v3447_v15  ;;  %3463 = vmatmul.msk.f32.gmra.mxu3 %vm328_vm5, %v3447_v15  ;;  %v3515_v15 = vld [vmem:[%s6453_s9 + $0x340] sm:$0xff] }
 0x3f7   :  { %1384 = vmatpush.msrb.mxu0 %v3533_v50  ;;  %1413 = vmatpush.msrb.mxu1 %v3534_v51 }
 0x3f8   :  { %3472 = vmatmul.msk.f32.gmra.mxu0 %vm328_vm5, %v3448_v16  ;;  %3480 = vmatmul.msk.f32.gmra.mxu1 %vm328_vm5, %v3448_v16 }
 0x3f9   :  { %1324 = vmatpush.msrb.mxu2 %v3539_v52  ;;  %1353 = vmatpush.msrb.mxu3 %v3540_v53 }
 0x3fa   :  { %1385 = vmatpush.msrb.mxu0 %v3529_v54  ;;  %1414 = vmatpush.msrb.mxu1 %v3530_v55 }
 0x3fb   :  { %1325 = vmatpush.msrb.mxu2 %v3535_v56  ;;  %1354 = vmatpush.msrb.mxu3 %v3536_v57 }
 0x3fc   :  { %1386 = vmatpush.msrb.mxu0 %v3525_v59  ;;  %1415 = vmatpush.msrb.mxu1 %v3526_v60 }
 0x3fd   :  { %1326 = vmatpush.msrb.mxu2 %v3531_v61  ;;  %1355 = vmatpush.msrb.mxu3 %v3532_v62 }
 0x3fe   :  { %3456 = vmatmul.msk.f32.gmra.mxu2 %vm328_vm5, %v3448_v16  ;;  %3464 = vmatmul.msk.f32.gmra.mxu3 %vm328_vm5, %v3448_v16  ;;  %v3516_v16 = vld [vmem:[%s6453_s9 + $0x348] sm:$0xff] }
 0x3ff   :  { %1387 = vmatpush.msrb.mxu0 %v3521_v63  ;;  %1416 = vmatpush.msrb.mxu1 %v3522_v0 }
 0x400   :  { %3473 = vmatmul.msk.f32.gmra.mxu0 %vm328_vm5, %v3449_v17  ;;  %3481 = vmatmul.msk.f32.gmra.mxu1 %vm328_vm5, %v3449_v17 }
 0x401   :  { %1327 = vmatpush.msrb.mxu2 %v3527_v2  ;;  %1356 = vmatpush.msrb.mxu3 %v3528_v3 }
 0x402   :  { %1388 = vmatpush.msrb.mxu0 %v3517_v5  ;;  %1417 = vmatpush.msrb.mxu1 %v3518_v7 }
 0x403   :  { %1328 = vmatpush.msrb.mxu2 %v3523_v9  ;;  %1357 = vmatpush.msrb.mxu3 %v3524_v11 }
 0x405   :  { %1329 = vmatpush.msrb.mxu2 %v3519_v13  ;;  %1358 = vmatpush.msrb.mxu3 %v3520_v14 }
 0x406   :  { %3457 = vmatmul.msk.f32.gmra.mxu2 %vm328_vm5, %v3449_v17  ;;  %3465 = vmatmul.msk.f32.gmra.mxu3 %vm328_vm5, %v3449_v17  ;;  %v713_v17 = vld [vmem:[%s6452_s8 + $0x28] sm:$0xff] }
 0x407   :  { %1330 = vmatpush.msrb.mxu2 %v3515_v15  ;;  %1359 = vmatpush.msrb.mxu3 %v3516_v16 }
 0x408   :  { %3474 = vmatmul.msk.f32.gmra.mxu0 %vm328_vm5, %v3450_v18  ;;  %3482 = vmatmul.msk.f32.gmra.mxu1 %vm328_vm5, %v3450_v18 }
 0x40e   :  { %3458 = vmatmul.msk.f32.gmra.mxu2 %vm328_vm5, %v3450_v18  ;;  %3466 = vmatmul.msk.f32.gmra.mxu3 %vm328_vm5, %v3450_v18  ;;  %v714_v18 = vld [vmem:[%s6452_s8 + $0x30] sm:$0xf] }
 0x410   :  { %3500 = vmatmul.msk.f32.vlgmr.msra.gmra.mxu0 %vm328_vm5, %v708_v19  ;;  %3508 = vmatmul.msk.f32.vlgmr.msra.gmra.mxu1 %vm328_vm5, %v708_v19 }
 0x416   :  { %3484 = vmatmul.msk.f32.vlgmr.msra.gmra.mxu2 %vm328_vm5, %v708_v19  ;;  %3492 = vmatmul.msk.f32.vlgmr.msra.gmra.mxu3 %vm328_vm5, %v708_v19 }
 0x418   :  { %3501 = vmatmul.msk.f32.gmra.mxu0 %vm328_vm5, %v709_v8  ;;  %3509 = vmatmul.msk.f32.gmra.mxu1 %vm328_vm5, %v709_v8 }
 0x41e   :  { %3485 = vmatmul.msk.f32.gmra.mxu2 %vm328_vm5, %v709_v8  ;;  %3493 = vmatmul.msk.f32.gmra.mxu3 %vm328_vm5, %v709_v8 }
 0x420   :  { %3502 = vmatmul.msk.f32.gmra.mxu0 %vm328_vm5, %v710_v45  ;;  %3510 = vmatmul.msk.f32.gmra.mxu1 %vm328_vm5, %v710_v45 }
 0x426   :  { %3486 = vmatmul.msk.f32.gmra.mxu2 %vm328_vm5, %v710_v45  ;;  %3494 = vmatmul.msk.f32.gmra.mxu3 %vm328_vm5, %v710_v45 }
 0x428   :  { %3503 = vmatmul.msk.f32.gmra.mxu0 %vm328_vm5, %v711_v58  ;;  %3511 = vmatmul.msk.f32.gmra.mxu1 %vm328_vm5, %v711_v58 }
 0x42e   :  { %3487 = vmatmul.msk.f32.gmra.mxu2 %vm328_vm5, %v711_v58  ;;  %3495 = vmatmul.msk.f32.gmra.mxu3 %vm328_vm5, %v711_v58 }
 0x430   :  { %3504 = vmatmul.msk.f32.gmra.mxu0 %vm328_vm5, %v712_v12  ;;  %3512 = vmatmul.msk.f32.gmra.mxu1 %vm328_vm5, %v712_v12 }
 0x436   :  { %3488 = vmatmul.msk.f32.gmra.mxu2 %vm328_vm5, %v712_v12  ;;  %3496 = vmatmul.msk.f32.gmra.mxu3 %vm328_vm5, %v712_v12 }
 0x438   :  { %3505 = vmatmul.msk.f32.gmra.mxu0 %vm328_vm5, %v713_v17  ;;  %3513 = vmatmul.msk.f32.gmra.mxu1 %vm328_vm5, %v713_v17 }
 0x43e   :  { %3489 = vmatmul.msk.f32.gmra.mxu2 %vm328_vm5, %v713_v17  ;;  %3497 = vmatmul.msk.f32.gmra.mxu3 %vm328_vm5, %v713_v17 }
 0x440   :  { %3506 = vmatmul.msk.f32.gmra.mxu0 %vm328_vm5, %v714_v18  ;;  %3514 = vmatmul.msk.f32.gmra.mxu1 %vm328_vm5, %v714_v18 }
 0x446   :  { %3490 = vmatmul.msk.f32.gmra.mxu2 %vm328_vm5, %v714_v18  ;;  %3498 = vmatmul.msk.f32.gmra.mxu3 %vm328_vm5, %v714_v18 }
 0x448   :  { %3575 = vmatmul.msk.f32.vlgmr.msrb.gmra.mxu0 %vm396_vm6, %v4432_v30  ;;  %3579 = vmatmul.msk.f32.vlgmr.msrb.gmra.mxu1 %vm396_vm6, %v4432_v30 }
 0x44e   :  { %3567 = vmatmul.msk.f32.vlgmr.msrb.gmra.mxu2 %vm396_vm6, %v4432_v30  ;;  %3571 = vmatmul.msk.f32.vlgmr.msrb.gmra.mxu3 %vm396_vm6, %v4432_v30 }
 0x450   :  { %3576 = vmatmul.msk.f32.gmra.mxu0 %vm396_vm6, %v4461_v37  ;;  %3580 = vmatmul.msk.f32.gmra.mxu1 %vm396_vm6, %v4461_v37 }
 0x453   :  { %v4805_v19 = vpop.f32.mrf.mxu0  ;;  %v4807_v20 = vpop.f32.mrf.mxu1 }
 0x456   :  { %3568 = vmatmul.msk.f32.gmra.mxu2 %vm396_vm6, %v4461_v37  ;;  %3572 = vmatmul.msk.f32.gmra.mxu3 %vm396_vm6, %v4461_v37 }
 0x458   :  { %3577 = vmatmul.msk.f32.gmra.mxu0 %vm396_vm6, %v4472_v39  ;;  %3581 = vmatmul.msk.f32.gmra.mxu1 %vm396_vm6, %v4472_v39 }
 0x45d   :  { %v4817_v30 = vpop.f32.mrf.mxu0  ;;  %v4819_v21 = vpop.f32.mrf.mxu1 }
 0x45e   :  { %3569 = vmatmul.msk.f32.gmra.mxu2 %vm396_vm6, %v4472_v39  ;;  %3573 = vmatmul.msk.f32.gmra.mxu3 %vm396_vm6, %v4472_v39 }
 0x460   :  { %3578 = vmatmul.msk.f32.gmra.mxu0 %vm396_vm6, %v4483_v40  ;;  %3582 = vmatmul.msk.f32.gmra.mxu1 %vm396_vm6, %v4483_v40  ;;  %v4829_v37 = vpop.f32.mrf.mxu2  ;;  %v4831_v22 = vpop.f32.mrf.mxu3 }
 0x461   :  { %6479 = vst [vmem:[#allocation5_spill] sm:$0xff] %v4831_v22 }
 0x465   :  { %v4833_v23 = vpop.f32.mrf.mxu0  ;;  %v4835_v24 = vpop.f32.mrf.mxu1 }
 0x466   :  { %3570 = vmatmul.msk.f32.gmra.mxu2 %vm396_vm6, %v4483_v40  ;;  %3574 = vmatmul.msk.f32.gmra.mxu3 %vm396_vm6, %v4483_v40 }
 0x469   :  { %v4841_v39 = vpop.f32.mrf.mxu2  ;;  %v4843_v25 = vpop.f32.mrf.mxu3 }
 0x46d   :  { %v4845_v26 = vpop.f32.mrf.mxu0  ;;  %v4847_v27 = vpop.f32.mrf.mxu1 }
 0x471   :  { %v4849_v28 = vpop.f32.mrf.mxu2  ;;  %v4851_v29 = vpop.f32.mrf.mxu3 }
 0x475   :  { %v4853_v8 = vpop.f32.mrf.mxu0  ;;  %v4855_v31 = vpop.f32.mrf.mxu1 }
 0x479   :  { %v4857_v32 = vpop.f32.mrf.mxu2  ;;  %v4859_v33 = vpop.f32.mrf.mxu3 }
 0x47d   :  { %v4861_v40 = vpop.f32.mrf.mxu0  ;;  %v4863_v34 = vpop.f32.mrf.mxu1 }
 0x481   :  { %v4865_v35 = vpop.f32.mrf.mxu2  ;;  %v4867_v36 = vpop.f32.mrf.mxu3 }
 0x482   :  { %6480 = vst [vmem:[#allocation6_spill] sm:$0xff] %v4865_v35 }
 0x483   :  { %6481 = vst [vmem:[#allocation7_spill] sm:$0xff] %v4867_v36 }
 0x485   :  { %v4869_v38 = vpop.f32.mrf.mxu0  ;;  %v4871_v6 = vpop.f32.mrf.mxu1 }
 0x489   :  { %v4873_v1 = vpop.f32.mrf.mxu2  ;;  %v4875_v4 = vpop.f32.mrf.mxu3 }
 0x48a   :  { %6482 = vst [vmem:[#allocation8_spill] sm:$0xff] %v4875_v4 }
 0x48d   :  { %v4877_v41 = vpop.f32.mrf.mxu0  ;;  %v4879_v42 = vpop.f32.mrf.mxu1 }
 0x491   :  { %v4881_v43 = vpop.f32.mrf.mxu2  ;;  %v4883_v44 = vpop.f32.mrf.mxu3 }
 0x492   :  { %6483 = vst [vmem:[#allocation9_spill] sm:$0xff] %v4881_v43 }
 0x493   :  { %6484 = vst [vmem:[#allocation10_spill] sm:$0xff] %v4883_v44 }
 0x495   :  { %v4885_v45 = vpop.f32.mrf.mxu0  ;;  %v4887_v46 = vpop.f32.mrf.mxu1 }
 0x499   :  { %v4889_v47 = vpop.f32.mrf.mxu2  ;;  %v4891_v48 = vpop.f32.mrf.mxu3 }
 0x49a   :  { %6485 = vst [vmem:[#allocation11_spill] sm:$0xff] %v4891_v48 }
 0x49d   :  { %v4893_v49 = vpop.f32.mrf.mxu0  ;;  %v4895_v50 = vpop.f32.mrf.mxu1 }
 0x4a1   :  { %v4897_v51 = vpop.f32.mrf.mxu2  ;;  %v4899_v52 = vpop.f32.mrf.mxu3 }
 0x4a5   :  { %v4901_v53 = vpop.f32.mrf.mxu0  ;;  %v4903_v54 = vpop.f32.mrf.mxu1 }
 0x4a9   :  { %v4905_v55 = vpop.f32.mrf.mxu2  ;;  %v4907_v56 = vpop.f32.mrf.mxu3 }
 0x4ad   :  { %v4909_v57 = vpop.f32.mrf.mxu0  ;;  %v4911_v58 = vpop.f32.mrf.mxu1 }
 0x4b1   :  { %v4913_v59 = vpop.f32.mrf.mxu2  ;;  %v4915_v60 = vpop.f32.mrf.mxu3 }
 0x4b5   :  { %v4917_v61 = vpop.f32.mrf.mxu0  ;;  %v4919_v62 = vpop.f32.mrf.mxu1 }
 0x4b9   :  { %v4921_v63 = vpop.f32.mrf.mxu2  ;;  %v4923_v0 = vpop.f32.mrf.mxu3 }
 0x4ba   :  { %6486 = vst [vmem:[#allocation12_spill] sm:$0xff] %v4921_v63 }
 0x4bb   :  { %6487 = vst [vmem:[#allocation13_spill] sm:$0xff] %v4923_v0 }
 0x4bd   :  { %v4925_v2 = vpop.f32.mrf.mxu0  ;;  %v4927_v3 = vpop.f32.mrf.mxu1 }
 0x4c1   :  { %v4929_v5 = vpop.f32.mrf.mxu2  ;;  %v4931_v7 = vpop.f32.mrf.mxu3 }
 0x4c2   :  { %6488 = vst [vmem:[#allocation14_spill] sm:$0xff] %v4931_v7 }
 0x4c5   :  { %v1390_v9 = vpop.f32.mrf.mxu0  ;;  %v1419_v11 = vpop.f32.mrf.mxu1 }
 0x4c9   :  { %v4933_v12 = vpop.f32.mrf.mxu2  ;;  %v4935_v13 = vpop.f32.mrf.mxu3 }
 0x4ca   :  { %6489 = vst [vmem:[#allocation15_spill] sm:$0xff] %v4933_v12 }
 0x4cb   :  { %6490 = vst [vmem:[#allocation16_spill] sm:$0xff] %v4935_v13  ;;  %v3583_v13 = vld [vmem:[%s6452_s8 + $0x70] sm:$0xff] }
 0x4cd   :  { %v1393_v14 = vpop.f32.mrf.mxu0  ;;  %v1422_v15 = vpop.f32.mrf.mxu1 }
 0x4d1   :  { %v1332_v16 = vpop.f32.mrf.mxu2  ;;  %v1361_v17 = vpop.f32.mrf.mxu3 }
 0x4d5   :  { %v1396_v18 = vpop.f32.mrf.mxu0  ;;  %v1425_v10 = vpop.f32.mrf.mxu1 }
 0x4d9   :  { %v1335_v48 = vpop.f32.mrf.mxu2  ;;  %v1364_v22 = vpop.f32.mrf.mxu3 }
 0x4dd   :  { %v1399_v44 = vpop.f32.mrf.mxu0  ;;  %v1428_v43 = vpop.f32.mrf.mxu1 }
 0x4de   :  { %3606 = vmatpush.msk.msra.mxu0 %vm332_vm4, %v1399_v44  ;;  %3614 = vmatpush.msk.msra.mxu1 %vm332_vm4, %v1428_v43  ;;  %v3587_v43 = vld [vmem:[%s6452_s8 + $0x90] sm:$0xff] }
 0x4e0   :  { %1561 = vmatpush.msra.mxu0 %v1396_v18  ;;  %1599 = vmatpush.msra.mxu1 %v1425_v10  ;;  %v3584_v10 = vld [vmem:[%s6452_s8 + $0x78] sm:$0xff] }
 0x4e1   :  { %v1338_v0 = vpop.f32.mrf.mxu2  ;;  %v1367_v12 = vpop.f32.mrf.mxu3 }
 0x4e2   :  { %1562 = vmatpush.msra.mxu0 %v1393_v14  ;;  %1600 = vmatpush.msra.mxu1 %v1422_v15 }
 0x4e4   :  { %1563 = vmatpush.msra.mxu0 %v1390_v9  ;;  %1601 = vmatpush.msra.mxu1 %v1419_v11 }
 0x4e5   :  { %3607 = vmatmul.msk.f32.vlgmr.msra.gmra.mxu0 %vm328_vm5, %v3583_v13  ;;  %3615 = vmatmul.msk.f32.vlgmr.msra.gmra.mxu1 %vm328_vm5, %v3583_v13 }
 0x4e9   :  { %v1341_v36 = vpop.f32.mrf.mxu2  ;;  %v1370_v44 = vpop.f32.mrf.mxu3 }
 0x4ea   :  { %3590 = vmatpush.msk.msra.mxu2 %vm332_vm4, %v1341_v36  ;;  %3598 = vmatpush.msk.msra.mxu3 %vm332_vm4, %v1370_v44  ;;  %v3585_v36 = vld [vmem:[%s6452_s8 + $0x80] sm:$0xff]  ;;  %vm2187_vm4 = vcmask 130048  }
 0x4ec   :  { %1485 = vmatpush.msra.mxu2 %v1338_v0  ;;  %1523 = vmatpush.msra.mxu3 %v1367_v12  ;;  %v3589_v0 = vld [vmem:[%s6452_s8 + $0xa0] sm:$0xf] }
 0x4ed   :  { %3608 = vmatmul.msk.f32.gmra.mxu0 %vm328_vm5, %v3584_v10  ;;  %3616 = vmatmul.msk.f32.gmra.mxu1 %vm328_vm5, %v3584_v10 }
 0x4ee   :  { %1486 = vmatpush.msra.mxu2 %v1335_v48  ;;  %1524 = vmatpush.msra.mxu3 %v1364_v22  ;;  %v3586_v22 = vld [vmem:[%s6452_s8 + $0x88] sm:$0xff]  ;;  %v3588_v48 = vld [vmem:[%s6452_s8 + $0x98] sm:$0xff] }
 0x4f0   :  { %1487 = vmatpush.msra.mxu2 %v1332_v16  ;;  %1525 = vmatpush.msra.mxu3 %v1361_v17 }
 0x4f1   :  { %3591 = vmatmul.msk.f32.vlgmr.msra.gmra.mxu2 %vm328_vm5, %v3583_v13  ;;  %3599 = vmatmul.msk.f32.vlgmr.msra.gmra.mxu3 %vm328_vm5, %v3583_v13 }
 0x4f5   :  { %3609 = vmatmul.msk.f32.gmra.mxu0 %vm328_vm5, %v3585_v36  ;;  %3617 = vmatmul.msk.f32.gmra.mxu1 %vm328_vm5, %v3585_v36 }
 0x4f9   :  { %3592 = vmatmul.msk.f32.gmra.mxu2 %vm328_vm5, %v3584_v10  ;;  %3600 = vmatmul.msk.f32.gmra.mxu3 %vm328_vm5, %v3584_v10 }
 0x4fd   :  { %3610 = vmatmul.msk.f32.gmra.mxu0 %vm328_vm5, %v3586_v22  ;;  %3618 = vmatmul.msk.f32.gmra.mxu1 %vm328_vm5, %v3586_v22 }
 0x501   :  { %3593 = vmatmul.msk.f32.gmra.mxu2 %vm328_vm5, %v3585_v36  ;;  %3601 = vmatmul.msk.f32.gmra.mxu3 %vm328_vm5, %v3585_v36 }
 0x505   :  { %3611 = vmatmul.msk.f32.gmra.mxu0 %vm328_vm5, %v3587_v43  ;;  %3619 = vmatmul.msk.f32.gmra.mxu1 %vm328_vm5, %v3587_v43 }
 0x509   :  { %3594 = vmatmul.msk.f32.gmra.mxu2 %vm328_vm5, %v3586_v22  ;;  %3602 = vmatmul.msk.f32.gmra.mxu3 %vm328_vm5, %v3586_v22 }
 0x50d   :  { %3612 = vmatmul.msk.f32.gmra.mxu0 %vm328_vm5, %v3588_v48  ;;  %3620 = vmatmul.msk.f32.gmra.mxu1 %vm328_vm5, %v3588_v48 }
 0x511   :  { %3595 = vmatmul.msk.f32.gmra.mxu2 %vm328_vm5, %v3587_v43  ;;  %3603 = vmatmul.msk.f32.gmra.mxu3 %vm328_vm5, %v3587_v43 }
 0x515   :  { %3613 = vmatmul.msk.f32.gmra.mxu0 %vm328_vm5, %v3589_v0  ;;  %3621 = vmatmul.msk.f32.gmra.mxu1 %vm328_vm5, %v3589_v0 }
 0x519   :  { %3596 = vmatmul.msk.f32.gmra.mxu2 %vm328_vm5, %v3588_v48  ;;  %3604 = vmatmul.msk.f32.gmra.mxu3 %vm328_vm5, %v3588_v48 }
 0x521   :  { %3597 = vmatmul.msk.f32.gmra.mxu2 %vm328_vm5, %v3589_v0  ;;  %3605 = vmatmul.msk.f32.gmra.mxu3 %vm328_vm5, %v3589_v0 }
 0x562   :  { %v1565_v9 = vpop.f32.mrf.mxu0  ;;  %v4990_v11 = vpop.f32.mrf.mxu1 }
 0x56a   :  { %v1568_v12 = vpop.f32.mrf.mxu0  ;;  %v1606_v13 = vpop.f32.mrf.mxu1 }
 0x572   :  { %v1571_v14 = vpop.f32.mrf.mxu0  ;;  %v1609_v15 = vpop.f32.mrf.mxu1 }
 0x574   :  { %v4992_v16 = vpop.f32.mrf.mxu2  ;;  %v4994_v17 = vpop.f32.mrf.mxu3 }
 0x575   :  { %6491 = vst [vmem:[#allocation17_spill] sm:$0xff] %v4992_v16  ;;  %v5013_v16 = vld [vmem:[%s6454_s10] sm:$0xf] }
 0x576   :  { %6492 = vst [vmem:[#allocation18_spill] sm:$0xff] %v4994_v17  ;;  %v1219_v17 = vadd.f32 %v4917_v61, %v4861_v40  ;;  %v1254_v40 = vadd.f32 %v4911_v58, %v4855_v31  ;;  %v1222_v61 = vadd.f32 %v4925_v2, %v4869_v38 }
 0x57a   :  { %v1574_v18 = vpop.f32.mrf.mxu0  ;;  %v1612_v44 = vpop.f32.mrf.mxu1 }
 0x57c   :  { %v4996_v10 = vpop.f32.mrf.mxu2  ;;  %v4998_v36 = vpop.f32.mrf.mxu3 }
 0x57d   :  { %6493 = vst [vmem:[#allocation19_spill] sm:$0xff] %v4996_v10  ;;  %v1257_v10 = vadd.f32 %v4919_v62, %v4863_v34  ;;  %v1210_v62 = vadd.f32 %v4893_v49, %v4833_v23 }
 0x57e   :  { %6494 = vst [vmem:[#allocation20_spill] sm:$0xff] %v4998_v36  ;;  %v1216_v36 = vadd.f32 %v4909_v57, %v4853_v8  ;;  %v1655_v8 = vperm.slane %v5013_v16, 2 }
 0x582   :  { %v1577_v22 = vpop.f32.mrf.mxu0  ;;  %v1615_v43 = vpop.f32.mrf.mxu1 }
 0x583   :  { %v1642_v57 = vadd.f32 %v1577_v22, %v1216_v36  ;;  %v1643_v58 = vadd.f32 %v1615_v43, %v1254_v40 }
 0x584   :  { %v5000_v48 = vpop.f32.mrf.mxu2  ;;  %v5002_v0 = vpop.f32.mrf.mxu3 }
 0x585   :  { %6495 = vst [vmem:[#allocation21_spill] sm:$0xff] %v5000_v48  ;;  %v1204_v48 = vadd.f32 %v4877_v41, %v4805_v19  ;;  %v1251_v19 = vadd.f32 %v4903_v54, %v4847_v27  ;;  %v1679_v54 = vadd.f32 %v1655_v8, %v1642_v57 }
 0x586   :  { %6496 = vst [vmem:[#allocation22_spill] sm:$0xff] %v5002_v0 }
 0x587   :  { %v1639_v23 = vadd.f32 %v1612_v44, %v1251_v19  ;;  %v1626_v44 = vadd.f32 %v1565_v9, %v1204_v48  ;;  %v5072_v9 = vadd.f32 %v4889_v47, %v4829_v37  ;;  %v1169_v37 = vadd.f32 %v4899_v52, %v4843_v25  ;;  %v6502_v52 = vld [vmem:[#allocation6_spill] sm:$0xff] }
 0x588   :  { %v1134_v47 = vadd.f32 %v4905_v55, %v4849_v28  ;;  %v1137_v25 = vadd.f32 %v4913_v59, %v4857_v32  ;;  %v1175_v28 = vadd.f32 %v4915_v60, %v4859_v33  ;;  %v6503_v55 = vld [vmem:[#allocation12_spill] sm:$0xff]  ;;  %v6506_v33 = vld [vmem:[#allocation7_spill] sm:$0xff]  ;;  %v6507_v59 = vld [vmem:[#allocation13_spill] sm:$0xff] }
 0x589   :  { %v1178_v60 = vadd.f32 %v6507_v59, %v6506_v33 }
 0x58a   :  { %v1580_v7 = vpop.f32.mrf.mxu0  ;;  %v1618_v4 = vpop.f32.mrf.mxu1 }
 0x58b   :  { %v1646_v0 = vadd.f32 %v1580_v7, %v1219_v17  ;;  %v1647_v34 = vadd.f32 %v1618_v4, %v1257_v10  ;;  %v1248_v4 = vadd.f32 %v4895_v50, %v4835_v24  ;;  %v1245_v10 = vadd.f32 %v4887_v46, %v4819_v21 }
 0x58c   :  { %v5004_v63 = vpop.f32.mrf.mxu2  ;;  %v5006_v35 = vpop.f32.mrf.mxu3 }
 0x58d   :  { %6497 = vst [vmem:[#allocation23_spill] sm:$0xff] %v5004_v63  ;;  %v1260_v63 = vadd.f32 %v4927_v3, %v4871_v6  ;;  %v1683_v38 = vadd.f32 %v1655_v8, %v1646_v0  ;;  %v1207_v6 = vadd.f32 %v4885_v45, %v4817_v30  ;;  %v1634_v3 = vadd.f32 %v1571_v14, %v1210_v62 }
 0x58e   :  { %6498 = vst [vmem:[#allocation24_spill] sm:$0xff] %v5006_v35  ;;  %v1213_v35 = vadd.f32 %v4901_v53, %v4845_v26  ;;  %v1656_v26 = vperm.slane %v5013_v16, 3  ;;  %v1635_v36 = vadd.f32 %v1609_v15, %v1248_v4  ;;  %v1242_v14 = vadd.f32 %v4879_v42, %v4807_v20 }
 0x58f   :  { %v5045_v45 = vmax.f32 %v1683_v38, 0.0  ;;  %v1631_v43 = vadd.f32 %v1606_v13, %v1245_v10  ;;  %v1671_v0 = vadd.f32 %v1655_v8, %v1634_v3  ;;  %v1663_v13 = vadd.f32 %v1655_v8, %v1626_v44 }
 0x590   :  { %v1638_v41 = vadd.f32 %v1574_v18, %v1213_v35  ;;  %v1684_v35 = vadd.f32 %v1656_v26, %v1647_v34  ;;  %v1680_v30 = vadd.f32 %v1656_v26, %v1643_v58  ;;  %v1676_v40 = vadd.f32 %v1656_v26, %v1639_v23  ;;  %v6510_v23 = vld [vmem:[#allocation10_spill] sm:$0xff] }
 0x591   :  { %v1672_v57 = vadd.f32 %v1656_v26, %v1635_v36  ;;  %v1836_v42 = vmul.f32 %v5045_v45, %v5045_v45  ;;  %v1668_v62 = vadd.f32 %v1656_v26, %v1631_v43  ;;  %v5074_v19 = vmax.f32 %v1671_v0, 0.0 }
 0x592   :  { %v1583_v31 = vpop.f32.mrf.mxu0  ;;  %v1621_v53 = vpop.f32.mrf.mxu1  ;;  %v1675_v22 = vadd.f32 %v1655_v8, %v1638_v41  ;;  %v5059_v46 = vmax.f32 %v1684_v35, 0.0  ;;  %v5066_v20 = vmax.f32 %v1680_v30, 0.0  ;;  %v5077_v41 = vmax.f32 %v1676_v40, 0.0 }
 0x593   :  { %v1650_v2 = vadd.f32 %v1583_v31, %v1222_v61  ;;  %v1651_v7 = vadd.f32 %v1621_v53, %v1260_v63  ;;  %v1630_v63 = vadd.f32 %v1568_v12, %v1207_v6  ;;  %v5053_v61 = vmax.f32 %v1679_v54, 0.0  ;;  %v6511_v54 = vld [vmem:[#allocation16_spill] sm:$0xff] }
 0x594   :  { %v5039_v49 = vpop.f32.mrf.mxu2  ;;  %v5041_v27 = vpop.f32.mrf.mxu3  ;;  %6501 = vst [vmem:[#allocation27_spill] sm:$0xff] %v5059_v46  ;;  %v1627_v12 = vadd.f32 %v4990_v11, %v1242_v14  ;;  %v5062_v34 = vmax.f32 %v1675_v22, 0.0  ;;  %v1131_v53 = vadd.f32 %v4897_v51, %v4841_v39  ;;  %v5102_v51 = vmax.f32 %v1663_v13, 0.0  ;;  %v6512_v22 = vld [vmem:[#allocation23_spill] sm:$0xff] }
 0x595   :  { %v1687_v17 = vadd.f32 %v1655_v8, %v1650_v2  ;;  %v1688_v18 = vadd.f32 %v1656_v26, %v1651_v7  ;;  %v1667_v15 = vadd.f32 %v1655_v8, %v1630_v63  ;;  %v1832_v31 = vmul.f32 %v5053_v61, %v5053_v61  ;;  %v6505_v7 = vld [vmem:[#allocation14_spill] sm:$0xff] }
 0x596   :  { %v1172_v8 = vadd.f32 %v4907_v56, %v4851_v29  ;;  %v1664_v58 = vadd.f32 %v1656_v26, %v1627_v12  ;;  %v5092_v2 = vmax.f32 %v1672_v57, 0.0  ;;  %v1828_v39 = vmul.f32 %v5062_v34, %v5062_v34  ;;  %v6504_v26 = vld [vmem:[#allocation8_spill] sm:$0xff] }
 0x597   :  { %v5047_v24 = vmax.f32 %v1687_v17, 0.0  ;;  %v5049_v50 = vmax.f32 %v1688_v18, 0.0  ;;  %v5089_v38 = vmax.f32 %v1667_v15, 0.0  ;;  %v1143_v29 = vadd.f32 %v4929_v5, %v4873_v1  ;;  %v6508_v1 = vld [vmem:[#allocation9_spill] sm:$0xff]  ;;  %v6509_v5 = vld [vmem:[#allocation15_spill] sm:$0xff] }
 0x598   :  { %v1140_v56 = vadd.f32 %v6503_v55, %v6502_v52  ;;  %v1181_v6 = vadd.f32 %v6505_v7, %v6504_v26  ;;  %v5109_v4 = vmax.f32 %v1668_v62, 0.0  ;;  %v1824_v32 = vmul.f32 %v5074_v19, %v5074_v19  ;;  %v6519_v26 = vld [vmem:[#allocation5_spill] sm:$0xff]  ;;  %v6520_v7 = vld [vmem:[#allocation11_spill] sm:$0xff] }
 0x599   :  { %6499 = vst [vmem:[#allocation25_spill] sm:$0xff] %v5047_v24  ;;  %v1840_v21 = vmul.f32 %v5047_v24, %v5047_v24  ;;  %3628 = vmatpush.msk.msrb.mxu1 %vm74_vm0, %v5049_v50  ;;  %v1146_v3 = vadd.f32 %v6509_v5, %v6508_v1  ;;  %v1184_v35 = vadd.f32 %v6511_v54, %v6510_v23  ;;  %v5120_v18 = vperm.slane %v5013_v16, 0  ;;  %v6524_v23 = vld [vmem:[#allocation18_spill] sm:$0xff] }
 0x59a   :  { %6500 = vst [vmem:[#allocation26_spill] sm:$0xff] %v5049_v50  ;;  %v5123_v63 = vmax.f32 %v1664_v58, 0.0  ;;  %v1820_v36 = vmul.f32 %v5089_v38, %v5089_v38  ;;  %v1636_v30 = vadd.f32 %v6512_v22, %v1137_v25  ;;  %v1841_v14 = vmul.f32 %v5049_v50, %v5049_v50  ;;  %v1941_v50 = vld [vmem:[%s6455_s11 + $0x38] sm:$0xff] }
 0x59b   :  { %1804 = vmatpush.msrb.mxu1 %v5059_v46  ;;  %3634 = vmatpush.msk.msrb.mxu0 %vm74_vm0, %v1840_v21  ;;  %v1640_v44 = vadd.f32 %v5039_v49, %v1140_v56  ;;  %v1816_v40 = vmul.f32 %v5102_v51, %v5102_v51  ;;  %v1654_v21 = vperm.slane %v5013_v16, 1  ;;  %v1641_v12 = vadd.f32 %v5041_v27, %v1178_v60 }
 0x59c   :  { %v1504_v48 = vpop.f32.mrf.mxu2  ;;  %v1542_v11 = vpop.f32.mrf.mxu3  ;;  %v1837_v49 = vmul.f32 %v5059_v46, %v5059_v46  ;;  %v6514_v27 = vmov 1.0   ;;  %v1829_v59 = vmul.f32 %v5077_v41, %v5077_v41  ;;  %v1673_v60 = vadd.f32 %v5120_v18, %v1636_v30  ;;  %v1938_v46 = vld [vmem:[%s6455_s11 + $0x20] sm:$0xff] }
 0x59d   :  { %1805 = vmatpush.msrb.mxu1 %v5066_v20  ;;  %1904 = vmatpush.msrb.mxu0 %v1836_v42  ;;  %v1644_v17 = vadd.f32 %v1504_v48, %v1143_v29  ;;  %v1645_v10 = vadd.f32 %v1542_v11, %v1181_v6  ;;  %v6513_v42 = vld [vmem:[#allocation24_spill] sm:$0xff]  ;;  %v1677_v29 = vadd.f32 %v5120_v18, %v1640_v44 }
 0x59e   :  { %v1637_v13 = vadd.f32 %v6513_v42, %v1175_v28  ;;  %v1833_v28 = vmul.f32 %v5066_v20, %v5066_v20  ;;  %v1678_v52 = vadd.f32 %v1654_v21, %v1641_v12  ;;  %v1166_v6 = vadd.f32 %v6520_v7, %v6519_v26  ;;  %v5268_v26 = vld [vmem:[%s6455_s11 + $0xe8] sm:$0xff] }
 0x59f   :  { %1806 = vmatpush.msrb.mxu1 %v5077_v41  ;;  %1905 = vmatpush.msrb.mxu0 %v1832_v31  ;;  %v1681_v48 = vadd.f32 %v5120_v18, %v1644_v17  ;;  %v1682_v11 = vadd.f32 %v1654_v21, %v1645_v10  ;;  %v6515_v31 = vld [vmem:[#allocation21_spill] sm:$0xff]  ;;  %v5187_v44 = vmax.f32 %v1673_v60, 0.0  ;;  %v5300_v60 = vld [vmem:[%s6455_s11 + $0xc8] sm:$0xff] }
 0x5a0   :  { %v1632_v58 = vadd.f32 %v6515_v31, %v1134_v47  ;;  %v6521_v47 = vld [vmem:[#allocation19_spill] sm:$0xff]  ;;  %v1674_v1 = vadd.f32 %v1654_v21, %v1637_v13  ;;  %v1625_v54 = vadd.f32 %v6524_v23, %v1166_v6  ;;  %v5180_v22 = vmax.f32 %v1678_v52, 0.0  ;;  %v5276_v6 = vld [vmem:[%s6455_s11 + $0xe0] sm:$0xff]  ;;  %v5320_v23 = vld [vmem:[%s6455_s11 + $0x170] sm:$0xff] }
 0x5a1   :  { %1807 = vmatpush.msrb.mxu1 %v5092_v2  ;;  %1906 = vmatpush.msrb.mxu0 %v1828_v39  ;;  %v6516_v39 = vld [vmem:[#allocation22_spill] sm:$0xff]  ;;  %v5166_v5 = vmax.f32 %v1681_v48, 0.0  ;;  %v1826_v7 = vmul.f32 %v5187_v44, %v5187_v44 }
 0x5a2   :  { %v1633_v25 = vadd.f32 %v6516_v39, %v1172_v8  ;;  %v6522_v8 = vld [vmem:[#allocation20_spill] sm:$0xff]  ;;  %v1669_v17 = vadd.f32 %v5120_v18, %v1632_v58  ;;  %v1662_v12 = vadd.f32 %v1654_v21, %v1625_v54 }
 0x5a3   :  { %1808 = vmatpush.msrb.mxu1 %v5109_v4  ;;  %1907 = vmatpush.msrb.mxu0 %v1824_v32  ;;  %v1628_v32 = vadd.f32 %v6521_v47, %v1131_v53  ;;  %v1629_v33 = vadd.f32 %v6522_v8, %v1169_v37  ;;  %v6523_v53 = vld [vmem:[#allocation17_spill] sm:$0xff]  ;;  %v1948_v54 = vld [vmem:[%s6455_s11 + $0x70] sm:$0xff] }
 0x5a4   :  { %v1507_v43 = vpop.f32.mrf.mxu2  ;;  %v1545_v0 = vpop.f32.mrf.mxu3  ;;  %v1624_v37 = vadd.f32 %v6523_v53, %v5072_v9  ;;  %v1670_v10 = vadd.f32 %v1654_v21, %v1633_v25  ;;  %v1821_v9 = vmul.f32 %v5109_v4, %v5109_v4  ;;  %v5247_v25 = vld [vmem:[%s6455_s11 + $0xf8] sm:$0xff] }
 0x5a5   :  { %v1648_v15 = vadd.f32 %v1507_v43, %v1146_v3  ;;  %v1649_v57 = vadd.f32 %v1545_v0, %v1184_v35  ;;  %1809 = vmatpush.msrb.mxu1 %v5123_v63  ;;  %1908 = vmatpush.msrb.mxu0 %v1820_v36  ;;  %v5168_v3 = vmax.f32 %v1682_v11, 0.0  ;;  %v1825_v35 = vmul.f32 %v5092_v2, %v5092_v2  ;;  %v1949_v53 = vld [vmem:[%s6455_s11 + $0x78] sm:$0xff] }
 0x5a6   :  { %3629 = vmatmul.msk.f32.vlgmr.msrb.gmra.mxu1 %vm1719_vm12, %v6514_v27  ;;  %v5178_v36 = vmax.f32 %v1677_v29, 0.0  ;;  %v1665_v30 = vadd.f32 %v5120_v18, %v1628_v32  ;;  %v5189_v43 = vmax.f32 %v1674_v1, 0.0  ;;  %v1817_v0 = vmul.f32 %v5123_v63, %v5123_v63  ;;  %v5258_v29 = vld [vmem:[%s6455_s11 + $0xf0] sm:$0xff]  ;;  %v5284_v32 = vld [vmem:[%s6455_s11 + $0xd8] sm:$0xff] }
 0x5a7   :  { %3636 = vmatpush.msk.msra.mxu1 %vm74_vm0, %v1841_v14  ;;  %v1685_v16 = vadd.f32 %v5120_v18, %v1648_v15  ;;  %v1686_v62 = vadd.f32 %v1654_v21, %v1649_v57  ;;  %1909 = vmatpush.msrb.mxu0 %v1816_v40  ;;  %v1666_v14 = vadd.f32 %v1654_v21, %v1629_v33  ;;  %v5196_v15 = vmax.f32 %v1669_v17, 0.0  ;;  %v5292_v33 = vld [vmem:[%s6455_s11 + $0xd0] sm:$0xff]  ;;  %v5305_v1 = vld [vmem:[%s6455_s11 + $0x178] sm:$0xff] }
 0x5a8   :  { %3635 = vmatmul.msk.f32.vlgmr.msrb.gmra.mxu0 %vm1719_vm12, %v6514_v27  ;;  %v1661_v40 = vadd.f32 %v5120_v18, %v1624_v37  ;;  %v5198_v57 = vmax.f32 %v1670_v10, 0.0  ;;  %v5202_v42 = vmax.f32 %v1665_v30, 0.0  ;;  %v5212_v21 = vmax.f32 %v1662_v12, 0.0  ;;  %v5315_v37 = vld [vmem:[%s6455_s11 + $0xc0] sm:$0xff]  ;;  %v5336_v17 = vld [vmem:[%s6455_s11 + $0xb8] sm:$0xff]  ;;  %v5356_v30 = vld [vmem:[%s6455_s11 + $0xb0] sm:$0xff] }
 0x5a9   :  { %1924 = vmatpush.msra.mxu1 %v1837_v49  ;;  %v5151_v55 = vmax.f32 %v1685_v16, 0.0  ;;  %v5153_v56 = vmax.f32 %v1686_v62, 0.0  ;;  %v5204_v13 = vmax.f32 %v1666_v14, 0.0  ;;  %v1835_v49 = vmul.f32 %v5168_v3, %v5168_v3  ;;  %2030 = vmatpush.msra.mxu0 %v5305_v1  ;;  %v5346_v10 = vld [vmem:[%s6455_s11 + $0x198] sm:$0xff]  ;;  %v1946_v14 = vld [vmem:[%s6455_s11 + $0x60] sm:$0xff]  ;;  %v5377_v12 = vld [vmem:[%s6455_s11 + $0xa8] sm:$0xff] }
 0x5aa   :  { %v5210_v18 = vmax.f32 %v1661_v40, 0.0  ;;  %v1831_v11 = vmul.f32 %v5180_v22, %v5180_v22  ;;  %v1827_v16 = vmul.f32 %v5189_v43, %v5189_v43  ;;  %v1823_v62 = vmul.f32 %v5198_v57, %v5198_v57  ;;  %v5372_v40 = vld [vmem:[%s6455_s11 + $0x158] sm:$0xff] }
 0x5ab   :  { %6517 = vst [vmem:[#allocation6_spill] sm:$0xff] %v5151_v55  ;;  %1925 = vmatpush.msra.mxu1 %v1833_v28  ;;  %3622 = vmatpush.msk.msrb.mxu2 %vm74_vm0, %v5151_v55  ;;  %v1839_v48 = vmul.f32 %v5153_v56, %v5153_v56  ;;  %v1819_v31 = vmul.f32 %v5204_v13, %v5204_v13 }
 0x5ac   :  { %6518 = vst [vmem:[#allocation12_spill] sm:$0xff] %v5153_v56  ;;  %3624 = vmatpush.msk.msrb.mxu3 %vm74_vm0, %v5153_v56  ;;  %v1815_v58 = vmul.f32 %v5212_v21, %v5212_v21  ;;  %v1838_v39 = vmul.f32 %v5151_v55, %v5151_v55  ;;  %v1834_v28 = vmul.f32 %v5166_v5, %v5166_v5  ;;  %v1950_v55 = vld [vmem:[%s6455_s11 + $0x80] sm:$0xff]  ;;  %v1940_v56 = vld [vmem:[%s6455_s11 + $0x30] sm:$0xff] }
 0x5ad   :  { %1926 = vmatpush.msra.mxu1 %v1829_v59  ;;  %1744 = vmatpush.msrb.mxu2 %v5166_v5  ;;  %v1830_v52 = vmul.f32 %v5178_v36, %v5178_v36  ;;  %v1822_v47 = vmul.f32 %v5196_v15, %v5196_v15  ;;  %v1818_v8 = vmul.f32 %v5202_v42, %v5202_v42 }
 0x5ae   :  { %1764 = vmatpush.msrb.mxu3 %v5168_v3  ;;  %v1814_v59 = vmul.f32 %v5210_v18, %v5210_v18  ;;  %2031 = vmatpush.msra.mxu0 %v5320_v23 }
 0x5af   :  { %1927 = vmatpush.msra.mxu1 %v1825_v35  ;;  %1745 = vmatpush.msrb.mxu2 %v5178_v36  ;;  %v5331_v35 = vld [vmem:[%s6455_s11 + $0x168] sm:$0xff] }
 0x5b0   :  { %1765 = vmatpush.msrb.mxu3 %v5180_v22  ;;  %2032 = vmatpush.msra.mxu0 %v5331_v35 }
 0x5b1   :  { %1928 = vmatpush.msra.mxu1 %v1821_v9  ;;  %1746 = vmatpush.msrb.mxu2 %v5187_v44  ;;  %v5351_v9 = vld [vmem:[%s6455_s11 + $0x160] sm:$0xff] }
 0x5b2   :  { %1766 = vmatpush.msrb.mxu3 %v5189_v43  ;;  %2033 = vmatpush.msra.mxu0 %v5351_v9 }
 0x5b3   :  { %1929 = vmatpush.msra.mxu1 %v1817_v0  ;;  %1747 = vmatpush.msrb.mxu2 %v5196_v15  ;;  %v5367_v0 = vld [vmem:[%s6455_s11 + $0x190] sm:$0xff] }
 0x5b4   :  { %1767 = vmatpush.msrb.mxu3 %v5198_v57  ;;  %3637 = vmatmul.msk.f32.vlgmr.msra.gmra.mxu1 %vm1719_vm12, %v6514_v27 }
 0x5b5   :  { %1748 = vmatpush.msrb.mxu2 %v5202_v42  ;;  %2062 = vmatpush.msrb.mxu1 %v5346_v10 }
 0x5b6   :  { %1768 = vmatpush.msrb.mxu3 %v5204_v13  ;;  %2034 = vmatpush.msra.mxu0 %v5372_v40 }
 0x5b7   :  { %1749 = vmatpush.msrb.mxu2 %v5210_v18  ;;  %2063 = vmatpush.msrb.mxu1 %v5367_v0 }
 0x5b8   :  { %1769 = vmatpush.msrb.mxu3 %v5212_v21  ;;  %3623 = vmatmul.msk.f32.vlgmr.msrb.gmra.mxu2 %vm1719_vm12, %v6514_v27 }
 0x5b9   :  { %3626 = vmatpush.msk.msra.mxu2 %vm74_vm0, %v5047_v24  ;;  %3625 = vmatmul.msk.f32.vlgmr.msrb.gmra.mxu3 %vm1719_vm12, %v6514_v27  ;;  %v1939_v24 = vld [vmem:[%s6455_s11 + $0x28] sm:$0xff] }
 0x5ba   :  { %3632 = vmatpush.msk.msra.mxu3 %vm74_vm0, %v1839_v48  ;;  %v1945_v48 = vld [vmem:[%s6455_s11 + $0x58] sm:$0xff] }
 0x5bb   :  { %1784 = vmatpush.msra.mxu2 %v5045_v45 }
 0x5bc   :  { %1884 = vmatpush.msra.mxu3 %v1835_v49  ;;  %v5388_v49 = vld [vmem:[%s6455_s11 + $0x188] sm:$0xff] }
 0x5bd   :  { %1785 = vmatpush.msra.mxu2 %v5053_v61  ;;  %2064 = vmatpush.msrb.mxu1 %v5388_v49 }
 0x5be   :  { %1885 = vmatpush.msra.mxu3 %v1831_v11  ;;  %v5393_v11 = vld [vmem:[%s6455_s11 + $0x150] sm:$0xff] }
 0x5bf   :  { %1786 = vmatpush.msra.mxu2 %v5062_v34  ;;  %2035 = vmatpush.msra.mxu0 %v5393_v11 }
 0x5c0   :  { %1886 = vmatpush.msra.mxu3 %v1827_v16  ;;  %v5398_v16 = vld [vmem:[%s6455_s11 + $0xa0] sm:$0xff] }
 0x5c1   :  { %1787 = vmatpush.msra.mxu2 %v5074_v19 }
 0x5c2   :  { %1887 = vmatpush.msra.mxu3 %v1823_v62  ;;  %v1944_v62 = vld [vmem:[%s6455_s11 + $0x50] sm:$0xff] }
 0x5c3   :  { %1788 = vmatpush.msra.mxu2 %v5089_v38 }
 0x5c4   :  { %1888 = vmatpush.msra.mxu3 %v1819_v31  ;;  %v5409_v31 = vld [vmem:[%s6455_s11 + $0x180] sm:$0xff] }
 0x5c5   :  { %1789 = vmatpush.msra.mxu2 %v5102_v51  ;;  %2065 = vmatpush.msrb.mxu1 %v5409_v31 }
 0x5c6   :  { %1889 = vmatpush.msra.mxu3 %v1815_v58  ;;  %3627 = vmatmul.msk.f32.vlgmr.msra.gmra.mxu2 %vm1719_vm12, %v6514_v27  ;;  %v1975_v58 = vld [vmem:[%s6455_s11 + $0x148] sm:$0xff] }
 0x5c7   :  { %3630 = vmatpush.msk.msrb.mxu2 %vm74_vm0, %v1838_v39  ;;  %3633 = vmatmul.msk.f32.vlgmr.msra.gmra.mxu3 %vm1719_vm12, %v6514_v27  ;;  %v5417_v39 = vld [vmem:[%s6455_s11 + $0x98] sm:$0xff] }
 0x5c8   :  { %2010 = vmatpush.msrb.mxu3 %v5247_v25  ;;  %2036 = vmatpush.msra.mxu0 %v1975_v58 }
 0x5c9   :  { %1864 = vmatpush.msrb.mxu2 %v1834_v28  ;;  %v1943_v28 = vld [vmem:[%s6455_s11 + $0x48] sm:$0xff]  ;;  %2081 = vmatpush.msra.mxu1 %v1949_v53 }
 0x5ca   :  { %2011 = vmatpush.msrb.mxu3 %v5258_v29 }
 0x5cb   :  { %1865 = vmatpush.msrb.mxu2 %v1830_v52  ;;  %v1974_v52 = vld [vmem:[%s6455_s11 + $0x140] sm:$0xff]  ;;  %2082 = vmatpush.msra.mxu1 %v1948_v54 }
 0x5cc   :  { %2012 = vmatpush.msrb.mxu3 %v5268_v26  ;;  %2037 = vmatpush.msra.mxu0 %v1974_v52 }
 0x5cd   :  { %1866 = vmatpush.msrb.mxu2 %v1826_v7  ;;  %v5431_v7 = vld [vmem:[%s6455_s11 + $0x90] sm:$0xff] }
 0x5ce   :  { %2013 = vmatpush.msrb.mxu3 %v5276_v6 }
 0x5cf   :  { %1867 = vmatpush.msrb.mxu2 %v1822_v47  ;;  %v1942_v47 = vld [vmem:[%s6455_s11 + $0x40] sm:$0xff] }
 0x5d0   :  { %2014 = vmatpush.msrb.mxu3 %v5284_v32 }
 0x5d1   :  { %1868 = vmatpush.msrb.mxu2 %v1818_v8  ;;  %v1973_v8 = vld [vmem:[%s6455_s11 + $0x138] sm:$0xff] }
 0x5d2   :  { %2015 = vmatpush.msrb.mxu3 %v5292_v33  ;;  %2038 = vmatpush.msra.mxu0 %v1973_v8 }
 0x5d3   :  { %1869 = vmatpush.msrb.mxu2 %v1814_v59  ;;  %v5443_v59 = vld [vmem:[%s6455_s11 + $0x88] sm:$0xff] }
 0x5d4   :  { %3631 = vmatmul.msk.f32.vlgmr.msrb.gmra.mxu2 %vm1719_vm12, %v6514_v27  ;;  %2016 = vmatpush.msrb.mxu3 %v5300_v60  ;;  %v1947_v27 = vld [vmem:[%s6455_s11 + $0x68] sm:$0xff] }
 0x5d5   :  { %1990 = vmatpush.msra.mxu2 %v1949_v53  ;;  %v1972_v53 = vld [vmem:[%s6455_s11 + $0x130] sm:$0xff]  ;;  %2083 = vmatpush.msra.mxu1 %v1947_v27 }
 0x5d6   :  { %2017 = vmatpush.msrb.mxu3 %v5315_v37  ;;  %2039 = vmatpush.msra.mxu0 %v1972_v53 }
 0x5d7   :  { %1991 = vmatpush.msra.mxu2 %v1948_v54  ;;  %v1971_v54 = vld [vmem:[%s6455_s11 + $0x128] sm:$0xff]  ;;  %2084 = vmatpush.msra.mxu1 %v1946_v14 }
 0x5d8   :  { %2018 = vmatpush.msrb.mxu3 %v5336_v17  ;;  %2040 = vmatpush.msra.mxu0 %v1971_v54 }
 0x5d9   :  { %1992 = vmatpush.msra.mxu2 %v1947_v27  ;;  %2085 = vmatpush.msra.mxu1 %v1945_v48  ;;  %v1937_v27 = vld [vmem:[%s6455_s11 + $0x18] sm:$0xff] }
 0x5da   :  { %2019 = vmatpush.msrb.mxu3 %v5356_v30 }
 0x5db   :  { %1993 = vmatpush.msra.mxu2 %v1946_v14  ;;  %2086 = vmatpush.msra.mxu1 %v1944_v62 }
 0x5dc   :  { %2020 = vmatpush.msrb.mxu3 %v5377_v12 }
 0x5dd   :  { %1994 = vmatpush.msra.mxu2 %v1945_v48  ;;  %2087 = vmatpush.msra.mxu1 %v1943_v28 }
 0x5de   :  { %2021 = vmatpush.msrb.mxu3 %v5398_v16 }
 0x5df   :  { %1995 = vmatpush.msra.mxu2 %v1944_v62  ;;  %2088 = vmatpush.msra.mxu1 %v1942_v47 }
 0x5e0   :  { %2022 = vmatpush.msrb.mxu3 %v5417_v39 }
 0x5e1   :  { %1996 = vmatpush.msra.mxu2 %v1943_v28  ;;  %2089 = vmatpush.msra.mxu1 %v1941_v50 }
 0x5e2   :  { %2023 = vmatpush.msrb.mxu3 %v5431_v7 }
 0x5e3   :  { %1997 = vmatpush.msra.mxu2 %v1942_v47  ;;  %2090 = vmatpush.msra.mxu1 %v1940_v56 }
 0x5e4   :  { %2024 = vmatpush.msrb.mxu3 %v5443_v59 }
 0x5e5   :  { %1998 = vmatpush.msra.mxu2 %v1941_v50  ;;  %2091 = vmatpush.msra.mxu1 %v1939_v24  ;;  %v1969_v50 = vld [vmem:[%s6455_s11 + $0x118] sm:$0xff] }
 0x5e6   :  { %2025 = vmatpush.msrb.mxu3 %v1950_v55 }
 0x5e7   :  { %1999 = vmatpush.msra.mxu2 %v1940_v56  ;;  %2092 = vmatpush.msra.mxu1 %v1938_v46  ;;  %v1966_v56 = vld [vmem:[%s6455_s11 + $0x100] sm:$0xff] }
 0x5e8   :  { %2121 = vmatpush.msra.mxu3 %v5305_v1  ;;  %v1936_v1 = vld [vmem:[%s6455_s11 + $0x10] sm:$0xff] }
 0x5e9   :  { %2000 = vmatpush.msra.mxu2 %v1939_v24  ;;  %2093 = vmatpush.msra.mxu1 %v1937_v27  ;;  %v1970_v24 = vld [vmem:[%s6455_s11 + $0x120] sm:$0xff] }
 0x5ea   :  { %2122 = vmatpush.msra.mxu3 %v5320_v23  ;;  %v1935_v23 = vld [vmem:[%s6455_s11 + $0x8] sm:$0xff]  ;;  %2041 = vmatpush.msra.mxu0 %v1970_v24 }
 0x5eb   :  { %2001 = vmatpush.msra.mxu2 %v1938_v46  ;;  %2094 = vmatpush.msra.mxu1 %v1936_v1  ;;  %v1968_v46 = vld [vmem:[%s6455_s11 + $0x110] sm:$0xff] }
 0x5ec   :  { %2123 = vmatpush.msra.mxu3 %v5331_v35  ;;  %v1934_v35 = vld [vmem:[%s6455_s11] sm:$0xff]  ;;  %2042 = vmatpush.msra.mxu0 %v1969_v50 }
 0x5ed   :  { %2002 = vmatpush.msra.mxu2 %v1937_v27  ;;  %2095 = vmatpush.msra.mxu1 %v1935_v23 }
 0x5ee   :  { %2124 = vmatpush.msra.mxu3 %v5351_v9  ;;  %2043 = vmatpush.msra.mxu0 %v1968_v46 }
 0x5ef   :  { %2003 = vmatpush.msra.mxu2 %v1936_v1  ;;  %2096 = vmatpush.msra.mxu1 %v1934_v35  ;;  %v2185_v1 = vld [vmem:[%s6456_s12 + $0x30] sm:$0xff] }
 0x5f0   :  { %2125 = vmatpush.msra.mxu3 %v5372_v40 }
 0x5f1   :  { %2004 = vmatpush.msra.mxu2 %v1935_v23  ;;  %v2181_v23 = vld [vmem:[%s6456_s12 + $0x10] sm:$0xff] }
 0x5f2   :  { %2126 = vmatpush.msra.mxu3 %v5393_v11 }
 0x5f3   :  { %2005 = vmatpush.msra.mxu2 %v1934_v35 }
 0x5f4   :  { %2127 = vmatpush.msra.mxu3 %v1975_v58 }
 0x5f5   :  { %2101 = vmatpush.msrb.mxu2 %v5247_v25 }
 0x5f6   :  { %2128 = vmatpush.msra.mxu3 %v1974_v52  ;;  %v5525_v52 = vld [vmem:[%s6456_s12 + $0x20] sm:$0xff] }
 0x5f7   :  { %2102 = vmatpush.msrb.mxu2 %v5258_v29 }
 0x5f8   :  { %2129 = vmatpush.msra.mxu3 %v1973_v8  ;;  %v5534_v8 = vld [vmem:[%s6456_s12] sm:$0xff] }
 0x5f9   :  { %2103 = vmatpush.msrb.mxu2 %v5268_v26 }
 0x5fa   :  { %2130 = vmatpush.msra.mxu3 %v1972_v53 }
 0x5fb   :  { %2104 = vmatpush.msrb.mxu2 %v5276_v6 }
 0x5fc   :  { %2131 = vmatpush.msra.mxu3 %v1971_v54 }
 0x5fd   :  { %2105 = vmatpush.msrb.mxu2 %v5284_v32 }
 0x5fe   :  { %2132 = vmatpush.msra.mxu3 %v1970_v24 }
 0x5ff   :  { %2106 = vmatpush.msrb.mxu2 %v5292_v33 }
 0x600   :  { %2133 = vmatpush.msra.mxu3 %v1969_v50 }
 0x601   :  { %2107 = vmatpush.msrb.mxu2 %v5300_v60 }
 0x602   :  { %2134 = vmatpush.msra.mxu3 %v1968_v46  ;;  %v2186_v46 = vld [vmem:[%s6456_s12 + $0x38] sm:$0xff] }
 0x603   :  { %2108 = vmatpush.msrb.mxu2 %v5315_v37 }
 0x605   :  { %2109 = vmatpush.msrb.mxu2 %v5336_v17  ;;  %v3855_v17 = vmov 1352.0  }
 0x606   :  { %3823 = vrcp.f32 %v3855_v17  ;;  %v2464_v17 = vld [vmem:[%s6460_s16 + $0x168] sm:$0xff] }
 0x607   :  { %2110 = vmatpush.msrb.mxu2 %v5356_v30 }
 0x609   :  { %2111 = vmatpush.msrb.mxu2 %v5377_v12 }
 0x60b   :  { %2112 = vmatpush.msrb.mxu2 %v5398_v16 }
 0x60d   :  { %2113 = vmatpush.msrb.mxu2 %v5417_v39 }
 0x60f   :  { %2114 = vmatpush.msrb.mxu2 %v5431_v7  ;;  %v2184_v7 = vld [vmem:[%s6456_s12 + $0x28] sm:$0xff] }
 0x611   :  { %2115 = vmatpush.msrb.mxu2 %v5443_v59  ;;  %v2180_v59 = vld [vmem:[%s6456_s12 + $0x8] sm:$0xff] }
 0x613   :  { %2116 = vmatpush.msrb.mxu2 %v1950_v55  ;;  %v1967_v55 = vld [vmem:[%s6455_s11 + $0x108] sm:$0xff] }
 0x614   :  { %2044 = vmatpush.msra.mxu0 %v1967_v55  ;;  %2135 = vmatpush.msra.mxu3 %v1967_v55  ;;  %v2182_v55 = vld [vmem:[%s6456_s12 + $0x18] sm:$0xff] }
 0x616   :  { %2045 = vmatpush.msra.mxu0 %v1966_v56  ;;  %2136 = vmatpush.msra.mxu3 %v1966_v56 }
 0x618   :  { %2205 = vmatpush.msrb.mxu0 %v5525_v52 }
 0x61a   :  { %2206 = vmatpush.msrb.mxu0 %v5534_v8 }
 0x623   :  { %v1811_v25 = vpop.f32.mrf.mxu1 }
 0x624   :  { %3638 = vmatmul.msk.f32.vlgmr.msrb.gmra.mxu1 %vm1986_vm13, %v1811_v25 }
 0x625   :  { %v1911_v6 = vpop.f32.mrf.mxu0  ;;  %2225 = vmatpush.msrb.mxu1 %v2184_v7 }
 0x627   :  { %2226 = vmatpush.msrb.mxu1 %v2180_v59 }
 0x631   :  { %v1931_v60 = vpop.f32.mrf.mxu1 }
 0x63b   :  { %v1751_v29 = vpop.f32.mrf.mxu2 }
 0x63c   :  { %v1771_v26 = vpop.f32.mrf.mxu3  ;;  %2006 = vmatmul.f32.vlgmr.msra.gmra.mxu2 %v1751_v29 }
 0x63d   :  { %2026 = vmatmul.f32.vlgmr.msrb.gmra.mxu3 %v1771_v26  ;;  %2153 = vmatpush.msra.mxu2 %v5346_v10  ;;  %v3824_v10 = vpop.eup %3823  ;;  %v2450_v26 = vld [vmem:[%s6460_s16 + $0xf8] sm:$0xff] }
 0x63e   :  { %v2071_v9 = vmul.f32 1352.0, %v3824_v10  ;;  %vm2075_vm14 = vweird.f32 %v3824_v10  ;;  %2328 = vmatpush.msrb.mxu3 %v2185_v1 }
 0x63f   :  { %2154 = vmatpush.msra.mxu2 %v5367_v0 }
 0x640   :  { %v2072_v0 = vsub.f32 1.0, %v2071_v9  ;;  %2329 = vmatpush.msrb.mxu3 %v2181_v23  ;;  %v2447_v9 = vld [vmem:[%s6460_s16 + $0xe0] sm:$0xff] }
 0x641   :  { %2155 = vmatpush.msra.mxu2 %v5388_v49 }
 0x642   :  { %v2073_v49 = vmul.f32 %v3824_v10, %v2072_v0  ;;  %v2446_v0 = vld [vmem:[%s6460_s16 + $0xd8] sm:$0xff] }
 0x643   :  { %2156 = vmatpush.msra.mxu2 %v5409_v31 }
 0x644   :  { %v2074_v62 = vadd.f32 %v3824_v10, %v2073_v49  ;;  %v2461_v49 = vld [vmem:[%s6460_s16 + $0x150] sm:$0xff] }
 0x645   :  { %2137 = vmatmul.f32.vlgmr.msra.gmra.mxu3 %v1911_v6  ;;  %v2466_v6 = vld [vmem:[%s6460_s16 + $0x178] sm:$0xff] }
 0x646   :  { %v2076_v58 = vsel %vm2075_vm14, %v3824_v10, %v2074_v62  ;;  %2568 = vmatpush.msra.mxu3 %v2466_v6  ;;  %v2460_v62 = vld [vmem:[%s6460_s16 + $0x148] sm:$0xff]  ;;  %v2426_v6 = vld [vmem:[%s6460_s16 + $0x38] sm:$0xff] }
 0x649   :  { %v1791_v33 = vpop.f32.mrf.mxu2 }
 0x64a   :  { %v1891_v32 = vpop.f32.mrf.mxu3  ;;  %2046 = vmatmul.f32.vlgmr.msra.gmra.mxu0 %v1791_v33  ;;  %v2465_v33 = vld [vmem:[%s6460_s16 + $0x170] sm:$0xff] }
 0x64b   :  { %2117 = vmatmul.f32.vlgmr.msrb.gmra.mxu2 %v1891_v32  ;;  %2245 = vmatpush.msra.mxu0 %v2185_v1  ;;  %v2449_v32 = vld [vmem:[%s6460_s16 + $0xf0] sm:$0xff]  ;;  %v2434_v1 = vld [vmem:[%s6460_s16 + $0x78] sm:$0xff] }
 0x64c   :  { %2308 = vmatpush.msrb.mxu2 %v2184_v7  ;;  %2569 = vmatpush.msra.mxu3 %v2465_v33  ;;  %v2455_v33 = vld [vmem:[%s6460_s16 + $0x120] sm:$0xff] }
 0x64d   :  { %2246 = vmatpush.msra.mxu0 %v2181_v23  ;;  %v2430_v23 = vld [vmem:[%s6460_s16 + $0x58] sm:$0xff] }
 0x64e   :  { %2309 = vmatpush.msrb.mxu2 %v2180_v59  ;;  %2570 = vmatpush.msra.mxu3 %v2464_v17  ;;  %v1718_v59 = vld [vmem:[%s6458_s14] sm:$0x1]  ;;  %v2454_v17 = vld [vmem:[%s6460_s16 + $0x118] sm:$0xff] }
 0x653   :  { %3639 = vmatmul.msk.f32.vlgmr.msra.gmra.mxu2 %vm1986_vm13, %v1931_v60 }
 0x654   :  { %2530 = vmatpush.msra.mxu2 %v2450_v26  ;;  %v2456_v26 = vld [vmem:[%s6460_s16 + $0x128] sm:$0xff] }
 0x656   :  { %2531 = vmatpush.msra.mxu2 %v2449_v32  ;;  %v2439_v32 = vld [vmem:[%s6460_s16 + $0xa0] sm:$0xff] }
 0x657   :  { %v1871_v37 = vpop.f32.mrf.mxu2 }
 0x658   :  { %2097 = vmatmul.f32.vlgmr.msra.gmra.mxu1 %v1871_v37  ;;  %v2448_v37 = vld [vmem:[%s6460_s16 + $0xe8] sm:$0xff] }
 0x659   :  { %2265 = vmatpush.msra.mxu1 %v2186_v46  ;;  %2532 = vmatpush.msra.mxu2 %v2448_v37  ;;  %v2438_v37 = vld [vmem:[%s6460_s16 + $0x98] sm:$0xff] }
 0x65b   :  { %2266 = vmatpush.msra.mxu1 %v2182_v55  ;;  %2533 = vmatpush.msra.mxu2 %v2447_v9  ;;  %v2437_v9 = vld [vmem:[%s6460_s16 + $0x90] sm:$0xff] }
 0x65d   :  { %2534 = vmatpush.msra.mxu2 %v2446_v0  ;;  %v2436_v0 = vld [vmem:[%s6460_s16 + $0x88] sm:$0xff] }
 0x6a1   :  { %v2067_v48 = vpop.f32.mrf.mxu1 }
 0x6bf   :  { %v2007_v30 = vpop.f32.mrf.mxu2 }
 0x6c0   :  { %v2027_v14 = vpop.f32.mrf.mxu3 }
 0x6c1   :  { %v2028_v40 = vadd.f32 %v2027_v14, %v2007_v30  ;;  %v2463_v30 = vld [vmem:[%s6460_s16 + $0x160] sm:$0xff] }
 0x6c2   :  { %2571 = vmatpush.msra.mxu3 %v2463_v30  ;;  %v2453_v30 = vld [vmem:[%s6460_s16 + $0x110] sm:$0xff] }
 0x6c7   :  { %v2047_v12 = vpop.f32.mrf.mxu0 }
 0x6c8   :  { %v2048_v16 = vadd.f32 %v2047_v12, %v2028_v40  ;;  %v2138_v28 = vpop.f32.mrf.mxu3  ;;  %v2462_v40 = vld [vmem:[%s6460_s16 + $0x158] sm:$0xff] }
 0x6c9   :  { %2572 = vmatpush.msra.mxu3 %v2462_v40  ;;  %v2452_v40 = vld [vmem:[%s6460_s16 + $0x108] sm:$0xff] }
 0x6ca   :  { %v2068_v31 = vadd.f32 %v2067_v48, %v2048_v16  ;;  %v2445_v48 = vld [vmem:[%s6460_s16 + $0xd0] sm:$0xff]  ;;  %v2444_v16 = vld [vmem:[%s6460_s16 + $0xc8] sm:$0xff] }
 0x6cb   :  { %2535 = vmatpush.msra.mxu2 %v2445_v48  ;;  %2573 = vmatpush.msra.mxu3 %v2461_v49  ;;  %v2435_v48 = vld [vmem:[%s6460_s16 + $0x80] sm:$0xff] }
 0x6cc   :  { %v5539_v54 = vmul.f32 %v2076_v58, %v2068_v31  ;;  %v1717_v31 = vld [vmem:[%s6457_s13] sm:$0x1] }
 0x6cd   :  { %2536 = vmatpush.msra.mxu2 %v2444_v16  ;;  %2574 = vmatpush.msra.mxu3 %v2460_v62  ;;  %v2451_v49 = vld [vmem:[%s6460_s16 + $0x100] sm:$0xff]  ;;  %v2421_v16 = vld [vmem:[%s6460_s16 + $0x10] sm:$0xff] }
 0x6ce   :  { %v2118_v11 = vpop.f32.mrf.mxu2  ;;  %v2162_v24 = vmul.f32 %v5539_v54, %v5539_v54  ;;  %v2469_v62 = vld [vmem:[%s6460_s16 + $0x190] sm:$0xff] }
 0x6d5   :  { %v2098_v39 = vpop.f32.mrf.mxu1 }
 0x6d6   :  { %v2119_v47 = vadd.f32 %v2118_v11, %v2098_v39  ;;  %v2158_v53 = vpop.f32.mrf.mxu2  ;;  %v2443_v39 = vld [vmem:[%s6460_s16 + $0xc0] sm:$0xff] }
 0x6d7   :  { %2537 = vmatpush.msra.mxu2 %v2443_v39  ;;  %v2419_v39 = vld [vmem:[%s6460_s16] sm:$0xff] }
 0x6d8   :  { %v2139_v27 = vadd.f32 %v2138_v28, %v2119_v47  ;;  %v2459_v28 = vld [vmem:[%s6460_s16 + $0x140] sm:$0xff] }
 0x6d9   :  { %2575 = vmatpush.msra.mxu3 %v2459_v28  ;;  %v2467_v28 = vld [vmem:[%s6460_s16 + $0x180] sm:$0xff] }
 0x6da   :  { %v2159_v35 = vadd.f32 %v2158_v53, %v2139_v27 }
 0x6dc   :  { %v2161_v50 = vmul.f32 %v2159_v35, %v2076_v58  ;;  %v2429_v35 = vld [vmem:[%s6460_s16 + $0x50] sm:$0xff] }
 0x6de   :  { %v2163_v56 = vsub.f32 %v2161_v50, %v2162_v24  ;;  %v2442_v24 = vld [vmem:[%s6460_s16 + $0xb8] sm:$0xff] }
 0x6df   :  { %v2458_v50 = vld [vmem:[%s6460_s16 + $0x138] sm:$0xff]  ;;  %2538 = vmatpush.msra.mxu2 %v2442_v24 }
 0x6e0   :  { %v2164_v25 = vmax.f32 %v2163_v56, 0.0  ;;  %v2457_v56 = vld [vmem:[%s6460_s16 + $0x130] sm:$0xff]  ;;  %2576 = vmatpush.msra.mxu3 %v2458_v50 }
 0x6e2   :  { %v2165_v29 = vadd.f32 1e-05, %v2164_v25  ;;  %v2427_v25 = vld [vmem:[%s6460_s16 + $0x40] sm:$0xff]  ;;  %2577 = vmatpush.msra.mxu3 %v2457_v56 }
 0x6e4   :  { %3825 = vrsqrt.f32 %v2165_v29  ;;  %vm2172_vm2 = vweird.f32 %v2165_v29  ;;  %2578 = vmatpush.msra.mxu3 %v2456_v26 }
 0x6e6   :  { %2579 = vmatpush.msra.mxu3 %v2455_v33  ;;  %v3685_v33 = vld [vmem:[%s6460_s16 + $0x290] sm:$0xff] }
 0x6e8   :  { %2580 = vmatpush.msra.mxu3 %v2454_v17 }
 0x6ea   :  { %v3826_v60 = vpop.eup %3825  ;;  %2581 = vmatpush.msra.mxu3 %v2453_v30 }
 0x6eb   :  { %v2167_v10 = vmul.f32 %v3826_v60, %v2165_v29  ;;  %vm2173_vm15 = vweird.f32 %v3826_v60  ;;  %v2440_v29 = vld [vmem:[%s6460_s16 + $0xa8] sm:$0xff] }
 0x6ec   :  { %vm2174_vm3 = vmor %vm2172_vm2, %vm2173_vm15  ;;  %2582 = vmatpush.msra.mxu3 %v2452_v40 }
 0x6ed   :  { %v2168_v14 = vmul.f32 %v3826_v60, %v2167_v10  ;;  %v2424_v10 = vld [vmem:[%s6460_s16 + $0x28] sm:$0xff] }
 0x6ee   :  { %2583 = vmatpush.msra.mxu3 %v2451_v49 }
 0x6ef   :  { %v2169_v12 = vmul.f32 0.5, %v2168_v14  ;;  %v2423_v14 = vld [vmem:[%s6460_s16 + $0x20] sm:$0xff] }
 0x6f1   :  { %v2170_v11 = vsub.f32 1.5, %v2169_v12  ;;  %v2422_v12 = vld [vmem:[%s6460_s16 + $0x18] sm:$0xff] }
 0x6f3   :  { %v2171_v58 = vmul.f32 %v3826_v60, %v2170_v11  ;;  %v2470_v11 = vld [vmem:[%s6460_s16 + $0x198] sm:$0xff] }
 0x6f5   :  { %v2175_v7 = vsel %vm2174_vm3, %v3826_v60, %v2171_v58  ;;  %v2425_v60 = vld [vmem:[%s6460_s16 + $0x30] sm:$0xff]  ;;  %v2468_v58 = vld [vmem:[%s6460_s16 + $0x188] sm:$0xff] }
 0x6f6   :  { %v2176_v47 = vmul.f32 %v2175_v7, %v1717_v31  ;;  %v2420_v31 = vld [vmem:[%s6460_s16 + $0x8] sm:$0xff] }
 0x6f8   :  { %3640 = vmatmul.msk.f32.vlgmr.msrb.gmra.mxu0 %vm2187_vm4, %v2176_v47  ;;  %3641 = vmatmul.msk.f32.vlgmr.msrb.gmra.mxu1 %vm2187_vm4, %v2176_v47  ;;  %v2177_v53 = vmul.f32 %v2176_v47, %v5539_v54  ;;  %v2431_v54 = vld [vmem:[%s6460_s16 + $0x60] sm:$0xff] }
 0x6f9   :  { %2288 = vmatpush.msrb.mxu0 %v5525_v52  ;;  %2348 = vmatpush.msrb.mxu1 %v2186_v46  ;;  %v2433_v52 = vld [vmem:[%s6460_s16 + $0x70] sm:$0xff]  ;;  %v2428_v46 = vld [vmem:[%s6460_s16 + $0x48] sm:$0xff] }
 0x6fa   :  { %v2178_v27 = vsub.f32 %v1718_v59, %v2177_v53  ;;  %v3702_v53 = vld [vmem:[%s6460_s16 + $0x318] sm:$0xff] }
 0x6fb   :  { %2289 = vmatpush.msrb.mxu0 %v5534_v8  ;;  %2349 = vmatpush.msrb.mxu1 %v2182_v55  ;;  %v2432_v8 = vld [vmem:[%s6460_s16 + $0x68] sm:$0xff]  ;;  %v2441_v55 = vld [vmem:[%s6460_s16 + $0xb0] sm:$0xff] }
 0x6fc   :  { %3645 = vmatmul.msk.f32.vlgmr.msrb.gmra.mxu2 %vm2187_vm4, %v2178_v27  ;;  %3646 = vmatmul.msk.f32.vlgmr.msrb.gmra.mxu3 %vm2187_vm4, %v2178_v27 }
 0x6fd   :  { %2539 = vmatpush.msra.mxu2 %v2441_v55 }
 0x6ff   :  { %2540 = vmatpush.msra.mxu2 %v2440_v29 }
 0x700   :  { %3642 = vmatmul.msk.f32.vlgmr.msra.gmra.mxu0 %vm2187_vm4, %v2176_v47  ;;  %3643 = vmatmul.msk.f32.vlgmr.msra.gmra.mxu1 %vm2187_vm4, %v2176_v47 }
 0x701   :  { %2492 = vmatpush.msra.mxu0 %v2434_v1  ;;  %2541 = vmatpush.msra.mxu2 %v2439_v32  ;;  %v3669_v32 = vld [vmem:[%s6460_s16 + $0x210] sm:$0xff] }
 0x702   :  { %2618 = vmatpush.msra.mxu1 %v2470_v11 }
 0x703   :  { %2493 = vmatpush.msra.mxu0 %v2433_v52  ;;  %2542 = vmatpush.msra.mxu2 %v2438_v37 }
 0x704   :  { %2619 = vmatpush.msra.mxu1 %v2469_v62  ;;  %v3696_v62 = vld [vmem:[%s6460_s16 + $0x2e8] sm:$0xff] }
 0x705   :  { %2494 = vmatpush.msra.mxu0 %v2432_v8  ;;  %2543 = vmatpush.msra.mxu2 %v2437_v9  ;;  %v3668_v9 = vld [vmem:[%s6460_s16 + $0x208] sm:$0xff] }
 0x706   :  { %2620 = vmatpush.msra.mxu1 %v2468_v58  ;;  %v3682_v58 = vld [vmem:[%s6460_s16 + $0x278] sm:$0xff] }
 0x707   :  { %2495 = vmatpush.msra.mxu0 %v2431_v54  ;;  %2544 = vmatpush.msra.mxu2 %v2436_v0  ;;  %v3700_v54 = vld [vmem:[%s6460_s16 + $0x308] sm:$0xff] }
 0x708   :  { %3644 = vmatmul.msk.f32.vlgmr.msrb.gmra.mxu0 %vm2187_vm4, %v2178_v27  ;;  %3647 = vmatmul.msk.f32.vlgmr.msrb.gmra.mxu1 %vm2187_vm4, %v2178_v27  ;;  %v3701_v27 = vld [vmem:[%s6460_s16 + $0x310] sm:$0xff] }
 0x709   :  { %2496 = vmatpush.msra.mxu0 %v2430_v23  ;;  %2545 = vmatpush.msra.mxu2 %v2435_v48 }
 0x70a   :  { %2621 = vmatpush.msra.mxu1 %v2467_v28  ;;  %v3665_v28 = vld [vmem:[%s6460_s16 + $0x1f0] sm:$0xff] }
 0x70b   :  { %2497 = vmatpush.msra.mxu0 %v2429_v35  ;;  %2780 = vmatpush.msrb.mxu2 %v3702_v53 }
 0x70d   :  { %2498 = vmatpush.msra.mxu0 %v2428_v46  ;;  %2781 = vmatpush.msrb.mxu2 %v3701_v27  ;;  %v3681_v27 = vld [vmem:[%s6460_s16 + $0x270] sm:$0xff] }
 0x70f   :  { %2499 = vmatpush.msra.mxu0 %v2427_v25  ;;  %2782 = vmatpush.msrb.mxu2 %v3700_v54  ;;  %v3680_v54 = vld [vmem:[%s6460_s16 + $0x268] sm:$0xff] }
 0x711   :  { %2500 = vmatpush.msra.mxu0 %v2426_v6  ;;  %v3670_v6 = vld [vmem:[%s6460_s16 + $0x218] sm:$0xff] }
 0x712   :  { %2704 = vmatpush.msrb.mxu1 %v3670_v6  ;;  %v3706_v6 = vld [vmem:[%s6460_s16 + $0x338] sm:$0xff] }
 0x713   :  { %2501 = vmatpush.msra.mxu0 %v2425_v60  ;;  %v3698_v60 = vld [vmem:[%s6460_s16 + $0x2f8] sm:$0xff]  ;;  %2830 = vmatpush.msrb.mxu3 %v3706_v6 }
 0x714   :  { %2705 = vmatpush.msrb.mxu1 %v3669_v32  ;;  %v3678_v32 = vld [vmem:[%s6460_s16 + $0x258] sm:$0xff] }
 0x715   :  { %2502 = vmatpush.msra.mxu0 %v2424_v10 }
 0x716   :  { %2706 = vmatpush.msrb.mxu1 %v3668_v9 }
 0x717   :  { %2503 = vmatpush.msra.mxu0 %v2423_v14 }
 0x719   :  { %2504 = vmatpush.msra.mxu0 %v2422_v12 }
 0x71b   :  { %2505 = vmatpush.msra.mxu0 %v2421_v16  ;;  %v3683_v16 = vld [vmem:[%s6460_s16 + $0x280] sm:$0xff] }
 0x71d   :  { %2506 = vmatpush.msra.mxu0 %v2420_v31  ;;  %v3666_v31 = vld [vmem:[%s6460_s16 + $0x1f8] sm:$0xff] }
 0x71f   :  { %2507 = vmatpush.msra.mxu0 %v2419_v39  ;;  %v3695_v39 = vld [vmem:[%s6460_s16 + $0x2e0] sm:$0xff] }
 0x775   :  { %v2208_v7 = vpop.f32.mrf.mxu0  ;;  %v2228_v47 = vpop.f32.mrf.mxu1 }
 0x776   :  { %v5729_v59 = vperm.slane %v2228_v47, 0  ;;  %v5750_v56 = vperm.slane %v2208_v7, 0 }
 0x778   :  { %v2359_v46 = vmul.f32 %v5729_v59, %v5212_v21  ;;  %v3686_v21 = vld [vmem:[%s6460_s16 + $0x298] sm:$0xff]  ;;  %v2358_v10 = vmul.f32 %v5750_v56, %v5210_v18  ;;  %v3684_v18 = vld [vmem:[%s6460_s16 + $0x288] sm:$0xff]  ;;  %v2363_v49 = vmul.f32 %v5729_v59, %v5204_v13  ;;  %v2362_v7 = vmul.f32 %v5750_v56, %v5202_v42 }
 0x779   :  { %2742 = vmatpush.msrb.mxu0 %v3686_v21  ;;  %v3692_v21 = vld [vmem:[%s6460_s16 + $0x2c8] sm:$0xff]  ;;  %v2371_v9 = vmul.f32 %v5729_v59, %v5189_v43  ;;  %v2374_v6 = vmul.f32 %v5750_v56, %v5178_v36  ;;  %v2379_v36 = vmul.f32 %v5729_v59, %v5168_v3 }
 0x77a   :  { %v6525_v3 = vld [vmem:[#allocation27_spill] sm:$0xff] }
 0x77b   :  { %2743 = vmatpush.msrb.mxu0 %v3685_v33  ;;  %v2366_v33 = vmul.f32 %v5750_v56, %v5196_v15  ;;  %v3705_v15 = vld [vmem:[%s6460_s16 + $0x330] sm:$0xff] }
 0x77c   :  { %2831 = vmatpush.msrb.mxu3 %v3705_v15 }
 0x77d   :  { %v2248_v1 = vpop.f32.mrf.mxu0  ;;  %v2268_v52 = vpop.f32.mrf.mxu1  ;;  %2744 = vmatpush.msrb.mxu0 %v3684_v18 }
 0x77e   :  { %v5737_v8 = vperm.slane %v2248_v1, 0  ;;  %v5752_v25 = vperm.slane %v2268_v52, 0  ;;  %v3694_v1 = vld [vmem:[%s6460_s16 + $0x2d8] sm:$0xff] }
 0x77f   :  { %v2311_v23 = vpop.f32.mrf.mxu2  ;;  %v2331_v35 = vpop.f32.mrf.mxu3  ;;  %2745 = vmatpush.msrb.mxu0 %v3683_v16  ;;  %v3704_v16 = vld [vmem:[%s6460_s16 + $0x328] sm:$0xff] }
 0x780   :  { %v5742_v24 = vperm.slane %v2311_v23, 0  ;;  %v5744_v50 = vperm.slane %v2331_v35, 0  ;;  %v2360_v55 = vmul.f32 %v5737_v8, %v5102_v51  ;;  %v3699_v51 = vld [vmem:[%s6460_s16 + $0x300] sm:$0xff]  ;;  %v2361_v0 = vmul.f32 %v5752_v25, %v5123_v63  ;;  %v3693_v35 = vld [vmem:[%s6460_s16 + $0x2d0] sm:$0xff]  ;;  %2832 = vmatpush.msrb.mxu3 %v3704_v16 }
 0x781   :  { %2783 = vmatpush.msrb.mxu2 %v3699_v51  ;;  %v2364_v40 = vmul.f32 %v5737_v8, %v5089_v38  ;;  %v3697_v38 = vld [vmem:[%s6460_s16 + $0x2f0] sm:$0xff]  ;;  %v3667_v63 = vld [vmem:[%s6460_s16 + $0x200] sm:$0xff]  ;;  %v2365_v47 = vmul.f32 %v5752_v25, %v5109_v4  ;;  %v2368_v53 = vmul.f32 %v5737_v8, %v5074_v19  ;;  %2746 = vmatpush.msrb.mxu0 %v3682_v58  ;;  %v3664_v4 = vld [vmem:[%s6460_s16 + $0x1e8] sm:$0xff] }
 0x782   :  { %v5755_v29 = vadd.f32 %v5742_v24, %v2359_v46  ;;  %v5758_v26 = vadd.f32 %v5744_v50, %v2360_v55  ;;  %v5814_v11 = vadd.f32 %v5742_v24, %v2363_v49  ;;  %2707 = vmatpush.msrb.mxu1 %v3667_v63  ;;  %v2367_v19 = vmul.f32 %v5729_v59, %v5198_v57  ;;  %v3663_v46 = vld [vmem:[%s6460_s16 + $0x1e0] sm:$0xff]  ;;  %v3662_v51 = vld [vmem:[%s6460_s16 + $0x1d8] sm:$0xff]  ;;  %v3660_v49 = vld [vmem:[%s6460_s16 + $0x1c8] sm:$0xff] }
 0x783   :  { %2784 = vmatpush.msrb.mxu2 %v3698_v60  ;;  %v5817_v13 = vadd.f32 %v5744_v50, %v2364_v40  ;;  %2747 = vmatpush.msrb.mxu0 %v3681_v27  ;;  %v5872_v57 = vadd.f32 %v5744_v50, %v2368_v53  ;;  %v3679_v55 = vld [vmem:[%s6460_s16 + $0x260] sm:$0xff]  ;;  %v2369_v60 = vmul.f32 %v5752_v25, %v5092_v2  ;;  %v3690_v40 = vld [vmem:[%s6460_s16 + $0x2b8] sm:$0xff]  ;;  %v3689_v63 = vld [vmem:[%s6460_s16 + $0x2b0] sm:$0xff] }
 0x784   :  { %2546 = vmatmul.f32.vlgmr.msra.gmra.mxu2 %v5755_v29  ;;  %2584 = vmatmul.f32.vlgmr.msra.gmra.mxu3 %v5758_v26  ;;  %v5869_v23 = vadd.f32 %v5742_v24, %v2367_v19  ;;  %v5930_v18 = vadd.f32 %v5742_v24, %v2371_v9  ;;  %v3688_v58 = vld [vmem:[%s6460_s16 + $0x2a8] sm:$0xff]  ;;  %v3658_v53 = vld [vmem:[%s6460_s16 + $0x1b8] sm:$0xff]  ;;  %v3657_v19 = vld [vmem:[%s6460_s16 + $0x1b0] sm:$0xff] }
 0x785   :  { %v2291_v37 = vpop.f32.mrf.mxu0  ;;  %v2351_v17 = vpop.f32.mrf.mxu1  ;;  %2785 = vmatpush.msrb.mxu2 %v3697_v38  ;;  %2708 = vmatpush.msrb.mxu1 %v3666_v31  ;;  %v3676_v38 = vld [vmem:[%s6460_s16 + $0x248] sm:$0xff]  ;;  %v3675_v31 = vld [vmem:[%s6460_s16 + $0x240] sm:$0xff]  ;;  %v3674_v27 = vld [vmem:[%s6460_s16 + $0x238] sm:$0xff] }
 0x786   :  { %v5785_v30 = vperm.slane %v2291_v37, 0  ;;  %v5787_v14 = vperm.slane %v2351_v17, 0  ;;  %2748 = vmatpush.msrb.mxu0 %v3680_v54  ;;  %v2372_v37 = vmul.f32 %v5737_v8, %v5062_v34  ;;  %v3691_v17 = vld [vmem:[%s6460_s16 + $0x2c0] sm:$0xff]  ;;  %v3673_v54 = vld [vmem:[%s6460_s16 + $0x230] sm:$0xff] }
 0x787   :  { %2786 = vmatpush.msrb.mxu2 %v3696_v62  ;;  %2709 = vmatpush.msrb.mxu1 %v3665_v28  ;;  %v3659_v62 = vld [vmem:[%s6460_s16 + $0x1c0] sm:$0xff]  ;;  %v2370_v28 = vmul.f32 %v5750_v56, %v5187_v44 }
 0x788   :  { %v5797_v12 = vadd.f32 %v5785_v30, %v2358_v10  ;;  %v5800_v48 = vadd.f32 %v5787_v14, %v2361_v0  ;;  %v5852_v52 = vadd.f32 %v5785_v30, %v2362_v7  ;;  %v5855_v42 = vadd.f32 %v5787_v14, %v2365_v47  ;;  %2749 = vmatpush.msrb.mxu0 %v3679_v55  ;;  %v3661_v10 = vld [vmem:[%s6460_s16 + $0x1d0] sm:$0xff]  ;;  %v3655_v55 = vld [vmem:[%s6460_s16 + $0x1a0] sm:$0xff] }
 0x789   :  { %2787 = vmatpush.msrb.mxu2 %v3695_v39  ;;  %2710 = vmatpush.msrb.mxu1 %v3664_v4  ;;  %v5913_v2 = vadd.f32 %v5785_v30, %v2366_v33  ;;  %v5916_v34 = vadd.f32 %v5787_v14, %v2369_v60  ;;  %v3677_v0 = vld [vmem:[%s6460_s16 + $0x250] sm:$0xff]  ;;  %v5933_v43 = vadd.f32 %v5744_v50, %v2372_v37  ;;  %v3703_v39 = vld [vmem:[%s6460_s16 + $0x320] sm:$0xff] }
 0x78a   :  { %2508 = vmatmul.f32.vlgmr.msra.gmra.mxu0 %v5797_v12  ;;  %3648 = vmatmul.msk.f32.vlgmr.msra.gmra.mxu1 %vm1986_vm13, %v5800_v48  ;;  %v2373_v7 = vmul.f32 %v5752_v25, %v5077_v41  ;;  %v2376_v47 = vmul.f32 %v5737_v8, %v5053_v61  ;;  %v5974_v44 = vadd.f32 %v5785_v30, %v2370_v28 }
 0x78b   :  { %2788 = vmatpush.msrb.mxu2 %v3694_v1  ;;  %2711 = vmatpush.msrb.mxu1 %v3663_v46  ;;  %v2375_v61 = vmul.f32 %v5729_v59, %v5180_v22  ;;  %v3687_v1 = vld [vmem:[%s6460_s16 + $0x2a0] sm:$0xff]  ;;  %v3672_v46 = vld [vmem:[%s6460_s16 + $0x228] sm:$0xff]  ;;  %v6020_v33 = vadd.f32 %v5785_v30, %v2374_v6  ;;  %v2378_v37 = vmul.f32 %v5750_v56, %v5166_v5 }
 0x78c   :  { %2549 = vmatmul.f32.gmra.mxu2 %v5814_v11  ;;  %2587 = vmatmul.f32.gmra.mxu3 %v5817_v13  ;;  %v5977_v41 = vadd.f32 %v5787_v14, %v2373_v7  ;;  %v5994_v22 = vadd.f32 %v5744_v50, %v2376_v47  ;;  %v3747_v47 = vld [vmem:[%s6460_s16 + $0x390] sm:$0xff]  ;;  %v3742_v6 = vld [vmem:[%s6460_s16 + $0x368] sm:$0xff] }
 0x78d   :  { %2789 = vmatpush.msrb.mxu2 %v3693_v35  ;;  %2712 = vmatpush.msrb.mxu1 %v3662_v51  ;;  %v5991_v4 = vadd.f32 %v5742_v24, %v2375_v61  ;;  %v3656_v35 = vld [vmem:[%s6460_s16 + $0x1a8] sm:$0xff]  ;;  %v2380_v51 = vmul.f32 %v5737_v8, %v5045_v45  ;;  %v6031_v45 = vadd.f32 %v5742_v24, %v2379_v36  ;;  %v3740_v36 = vld [vmem:[%s6460_s16 + $0x358] sm:$0xff] }
 0x78e   :  { %2750 = vmatpush.msrb.mxu0 %v3678_v32  ;;  %2833 = vmatpush.msrb.mxu3 %v3703_v39  ;;  %v3671_v32 = vld [vmem:[%s6460_s16 + $0x220] sm:$0xff]  ;;  %v6045_v9 = vadd.f32 %v5785_v30, %v2378_v37  ;;  %v3766_v39 = vld [vmem:[%s6460_s16 + $0x428] sm:$0xff]  ;;  %v3756_v37 = vld [vmem:[%s6460_s16 + $0x3d8] sm:$0xff] }
 0x78f   :  { %2790 = vmatpush.msrb.mxu2 %v3692_v21  ;;  %2713 = vmatpush.msrb.mxu1 %v3661_v10  ;;  %v2377_v21 = vmul.f32 %v5752_v25, %v5066_v20  ;;  %v6034_v20 = vadd.f32 %v5744_v50, %v2380_v51  ;;  %v6526_v10 = vld [vmem:[#allocation25_spill] sm:$0xff]  ;;  %v3762_v61 = vld [vmem:[%s6460_s16 + $0x408] sm:$0xff]  ;;  %v3741_v51 = vld [vmem:[%s6460_s16 + $0x360] sm:$0xff] }
 0x790   :  { %2751 = vmatpush.msrb.mxu0 %v3677_v0  ;;  %v2384_v15 = vmul.f32 %v5737_v8, %v6526_v10  ;;  %v3752_v8 = vld [vmem:[%s6460_s16 + $0x3b8] sm:$0xff]  ;;  %v3738_v10 = vld [vmem:[%s6460_s16 + $0x348] sm:$0xff] }
 0x791   :  { %2791 = vmatpush.msrb.mxu2 %v3691_v17  ;;  %2714 = vmatpush.msrb.mxu1 %v3660_v49  ;;  %v6023_v60 = vadd.f32 %v5787_v14, %v2377_v21  ;;  %v2381_v17 = vmul.f32 %v5752_v25, %v6525_v3  ;;  %v3758_v21 = vld [vmem:[%s6460_s16 + $0x3e8] sm:$0xff]  ;;  %v3739_v3 = vld [vmem:[%s6460_s16 + $0x350] sm:$0xff] }
 0x792   :  { %2511 = vmatmul.f32.gmra.mxu0 %v5852_v52  ;;  %3649 = vmatmul.msk.f32.gmra.mxu1 %vm1986_vm13, %v5855_v42 }
 0x793   :  { %2792 = vmatpush.msrb.mxu2 %v3690_v40  ;;  %2752 = vmatpush.msrb.mxu0 %v3676_v38  ;;  %v6048_v0 = vadd.f32 %v5787_v14, %v2381_v17  ;;  %v6527_v40 = vld [vmem:[#allocation12_spill] sm:$0xff]  ;;  %v6059_v38 = vadd.f32 %v5744_v50, %v2384_v15  ;;  %v3754_v15 = vld [vmem:[%s6460_s16 + $0x3c8] sm:$0xff] }
 0x794   :  { %2552 = vmatmul.f32.gmra.mxu2 %v5869_v23  ;;  %2590 = vmatmul.f32.gmra.mxu3 %v5872_v57  ;;  %v2383_v49 = vmul.f32 %v5729_v59, %v6527_v40  ;;  %v3768_v59 = vld [vmem:[%s6460_s16 + $0x438] sm:$0xff]  ;;  %v3767_v50 = vld [vmem:[%s6460_s16 + $0x430] sm:$0xff]  ;;  %v3737_v40 = vld [vmem:[%s6460_s16 + $0x340] sm:$0xff] }
 0x795   :  { %2793 = vmatpush.msrb.mxu2 %v3689_v63  ;;  %2715 = vmatpush.msrb.mxu1 %v3659_v62  ;;  %v6528_v63 = vld [vmem:[#allocation6_spill] sm:$0xff]  ;;  %v3755_v17 = vld [vmem:[%s6460_s16 + $0x3d0] sm:$0xff] }
 0x796   :  { %2753 = vmatpush.msrb.mxu0 %v3675_v31  ;;  %v6056_v5 = vadd.f32 %v5742_v24, %v2383_v49  ;;  %v3751_v24 = vld [vmem:[%s6460_s16 + $0x3b0] sm:$0xff]  ;;  %3079 = vmatpush.msra.mxu3 %v3768_v59  ;;  %v2382_v16 = vmul.f32 %v5750_v56, %v6528_v63  ;;  %v6529_v62 = vld [vmem:[#allocation26_spill] sm:$0xff] }
 0x797   :  { %2794 = vmatpush.msrb.mxu2 %v3688_v58  ;;  %2716 = vmatpush.msrb.mxu1 %v3658_v53  ;;  %v2385_v31 = vmul.f32 %v5752_v25, %v6529_v62  ;;  %v3750_v58 = vld [vmem:[%s6460_s16 + $0x3a8] sm:$0xff]  ;;  %v3749_v56 = vld [vmem:[%s6460_s16 + $0x3a0] sm:$0xff]  ;;  %v3763_v53 = vld [vmem:[%s6460_s16 + $0x410] sm:$0xff] }
 0x798   :  { %2754 = vmatpush.msrb.mxu0 %v3674_v27  ;;  %3080 = vmatpush.msra.mxu3 %v3767_v50  ;;  %v6086_v28 = vadd.f32 %v5785_v30, %v2382_v16  ;;  %v3765_v25 = vld [vmem:[%s6460_s16 + $0x420] sm:$0xff]  ;;  %v3748_v30 = vld [vmem:[%s6460_s16 + $0x398] sm:$0xff]  ;;  %v3746_v27 = vld [vmem:[%s6460_s16 + $0x388] sm:$0xff] }
 0x799   :  { %2795 = vmatpush.msrb.mxu2 %v3687_v1  ;;  %2717 = vmatpush.msrb.mxu1 %v3657_v19  ;;  %v6089_v7 = vadd.f32 %v5787_v14, %v2385_v31  ;;  %v3764_v14 = vld [vmem:[%s6460_s16 + $0x418] sm:$0xff]  ;;  %v3745_v1 = vld [vmem:[%s6460_s16 + $0x380] sm:$0xff] }
 0x79a   :  { %2514 = vmatmul.f32.gmra.mxu0 %v5913_v2  ;;  %3650 = vmatmul.msk.f32.gmra.mxu1 %vm1986_vm13, %v5916_v34  ;;  %v3761_v19 = vld [vmem:[%s6460_s16 + $0x400] sm:$0xff] }
 0x79b   :  { %2755 = vmatpush.msrb.mxu0 %v3673_v54  ;;  %2718 = vmatpush.msrb.mxu1 %v3656_v35  ;;  %v3744_v54 = vld [vmem:[%s6460_s16 + $0x378] sm:$0xff]  ;;  %v3753_v49 = vld [vmem:[%s6460_s16 + $0x3c0] sm:$0xff] }
 0x79c   :  { %2555 = vmatmul.f32.gmra.mxu2 %v5930_v18  ;;  %2593 = vmatmul.f32.gmra.mxu3 %v5933_v43  ;;  %v3760_v35 = vld [vmem:[%s6460_s16 + $0x3f8] sm:$0xff] }
 0x79d   :  { %2756 = vmatpush.msrb.mxu0 %v3672_v46  ;;  %2719 = vmatpush.msrb.mxu1 %v3655_v55  ;;  %v3743_v46 = vld [vmem:[%s6460_s16 + $0x370] sm:$0xff] }
 0x79e   :  { %3041 = vmatpush.msra.mxu2 %v3752_v8  ;;  %3081 = vmatpush.msra.mxu3 %v3766_v39  ;;  %v3759_v55 = vld [vmem:[%s6460_s16 + $0x3f0] sm:$0xff] }
 0x79f   :  { %2757 = vmatpush.msrb.mxu0 %v3671_v32  ;;  %v3757_v32 = vld [vmem:[%s6460_s16 + $0x3e0] sm:$0xff] }
 0x7a0   :  { %3042 = vmatpush.msra.mxu2 %v3751_v24  ;;  %3082 = vmatpush.msra.mxu3 %v3765_v25 }
 0x7a2   :  { %2517 = vmatmul.f32.gmra.mxu0 %v5974_v44  ;;  %3651 = vmatmul.msk.f32.gmra.mxu1 %vm1986_vm13, %v5977_v41 }
 0x7a3   :  { %3043 = vmatpush.msra.mxu2 %v3750_v58  ;;  %3083 = vmatpush.msra.mxu3 %v3764_v14 }
 0x7a4   :  { %2558 = vmatmul.f32.gmra.mxu2 %v5991_v4  ;;  %2596 = vmatmul.f32.gmra.mxu3 %v5994_v22 }
 0x7a5   :  { %3044 = vmatpush.msra.mxu2 %v3749_v56  ;;  %3084 = vmatpush.msra.mxu3 %v3763_v53 }
 0x7a7   :  { %3045 = vmatpush.msra.mxu2 %v3748_v30  ;;  %3085 = vmatpush.msra.mxu3 %v3762_v61 }
 0x7a9   :  { %3046 = vmatpush.msra.mxu2 %v3747_v47  ;;  %3086 = vmatpush.msra.mxu3 %v3761_v19 }
 0x7aa   :  { %2520 = vmatmul.f32.gmra.mxu0 %v6020_v33  ;;  %3652 = vmatmul.msk.f32.gmra.mxu1 %vm1986_vm13, %v6023_v60 }
 0x7ab   :  { %3047 = vmatpush.msra.mxu2 %v3746_v27  ;;  %3087 = vmatpush.msra.mxu3 %v3760_v35 }
 0x7ac   :  { %2561 = vmatmul.f32.gmra.mxu2 %v6031_v45  ;;  %2599 = vmatmul.f32.gmra.mxu3 %v6034_v20 }
 0x7ad   :  { %3048 = vmatpush.msra.mxu2 %v3745_v1  ;;  %3088 = vmatpush.msra.mxu3 %v3759_v55 }
 0x7af   :  { %3049 = vmatpush.msra.mxu2 %v3744_v54  ;;  %3089 = vmatpush.msra.mxu3 %v3758_v21 }
 0x7b1   :  { %3050 = vmatpush.msra.mxu2 %v3743_v46  ;;  %3090 = vmatpush.msra.mxu3 %v3757_v32 }
 0x7b2   :  { %2523 = vmatmul.f32.gmra.mxu0 %v6045_v9  ;;  %3653 = vmatmul.msk.f32.gmra.mxu1 %vm1986_vm13, %v6048_v0 }
 0x7b3   :  { %3051 = vmatpush.msra.mxu2 %v3742_v6  ;;  %3091 = vmatpush.msra.mxu3 %v3756_v37 }
 0x7b4   :  { %2564 = vmatmul.f32.gmra.mxu2 %v6056_v5  ;;  %2602 = vmatmul.f32.gmra.mxu3 %v6059_v38 }
 0x7b5   :  { %3052 = vmatpush.msra.mxu2 %v3741_v51  ;;  %3092 = vmatpush.msra.mxu3 %v3755_v17 }
 0x7b7   :  { %3053 = vmatpush.msra.mxu2 %v3740_v36  ;;  %3093 = vmatpush.msra.mxu3 %v3754_v15 }
 0x7b9   :  { %3054 = vmatpush.msra.mxu2 %v3739_v3  ;;  %3094 = vmatpush.msra.mxu3 %v3753_v49 }
 0x7ba   :  { %2526 = vmatmul.f32.gmra.mxu0 %v6086_v28  ;;  %3654 = vmatmul.msk.f32.gmra.mxu1 %vm1986_vm13, %v6089_v7 }
 0x7bb   :  { %3055 = vmatpush.msra.mxu2 %v3738_v10 }
 0x7bc   :  { %2796 = vmatmul.f32.vlgmr.msrb.gmra.mxu2 %v5758_v26  ;;  %3707 = vmatmul.msk.f32.vlgmr.msrb.gmra.mxu3 %vm1986_vm13, %v5800_v48 }
 0x7bd   :  { %3056 = vmatpush.msra.mxu2 %v3737_v40 }
 0x7c2   :  { %2720 = vmatmul.f32.vlgmr.msrb.gmra.mxu1 %v5797_v12  ;;  %2758 = vmatmul.f32.vlgmr.msrb.gmra.mxu0 %v5755_v29 }
 0x7c4   :  { %2799 = vmatmul.f32.gmra.mxu2 %v5817_v13  ;;  %3708 = vmatmul.msk.f32.gmra.mxu3 %vm1986_vm13, %v5855_v42 }
 0x7ca   :  { %2723 = vmatmul.f32.gmra.mxu1 %v5852_v52  ;;  %2761 = vmatmul.f32.gmra.mxu0 %v5814_v11 }
 0x7cc   :  { %2802 = vmatmul.f32.gmra.mxu2 %v5872_v57  ;;  %3709 = vmatmul.msk.f32.gmra.mxu3 %vm1986_vm13, %v5916_v34 }
 0x7d2   :  { %2726 = vmatmul.f32.gmra.mxu1 %v5913_v2  ;;  %2764 = vmatmul.f32.gmra.mxu0 %v5869_v23 }
 0x7d4   :  { %2805 = vmatmul.f32.gmra.mxu2 %v5933_v43  ;;  %3710 = vmatmul.msk.f32.gmra.mxu3 %vm1986_vm13, %v5977_v41 }
 0x7da   :  { %2729 = vmatmul.f32.gmra.mxu1 %v5974_v44  ;;  %2767 = vmatmul.f32.gmra.mxu0 %v5930_v18 }
 0x7dc   :  { %2808 = vmatmul.f32.gmra.mxu2 %v5994_v22  ;;  %3711 = vmatmul.msk.f32.gmra.mxu3 %vm1986_vm13, %v6023_v60 }
 0x7e2   :  { %2732 = vmatmul.f32.gmra.mxu1 %v6020_v33  ;;  %2770 = vmatmul.f32.gmra.mxu0 %v5991_v4 }
 0x7e4   :  { %2811 = vmatmul.f32.gmra.mxu2 %v6034_v20  ;;  %3712 = vmatmul.msk.f32.gmra.mxu3 %vm1986_vm13, %v6048_v0 }
 0x7ea   :  { %2735 = vmatmul.f32.gmra.mxu1 %v6045_v9  ;;  %2773 = vmatmul.f32.gmra.mxu0 %v6031_v45 }
 0x7ec   :  { %2814 = vmatmul.f32.gmra.mxu2 %v6059_v38  ;;  %3713 = vmatmul.msk.f32.gmra.mxu3 %vm1986_vm13, %v6089_v7 }
 0x7f2   :  { %2738 = vmatmul.f32.gmra.mxu1 %v6086_v28  ;;  %2776 = vmatmul.f32.gmra.mxu0 %v6056_v5 }
 0x7f4   :  { %3057 = vmatmul.f32.vlgmr.msra.gmra.mxu2 %v5797_v12  ;;  %3095 = vmatmul.f32.vlgmr.msra.gmra.mxu3 %v5755_v29 }
 0x7fc   :  { %3060 = vmatmul.f32.gmra.mxu2 %v5852_v52  ;;  %3098 = vmatmul.f32.gmra.mxu3 %v5814_v11 }
 0x804   :  { %3063 = vmatmul.f32.gmra.mxu2 %v5913_v2  ;;  %3101 = vmatmul.f32.gmra.mxu3 %v5869_v23 }
 0x807   :  { %v2509_v8 = vpop.f32.mrf.mxu0  ;;  %v2547_v59 = vpop.f32.mrf.mxu2 }
 0x808   :  { %v2585_v24 = vpop.f32.mrf.mxu3  ;;  %v6213_v50 = vpop.f32.mrf.mxu1  ;;  %v2548_v36 = vadd.f32 %v2547_v59, %v2509_v8 }
 0x80a   :  { %v2586_v49 = vadd.f32 %v2585_v24, %v2548_v36 }
 0x80c   :  { %3066 = vmatmul.f32.gmra.mxu2 %v5974_v44  ;;  %3104 = vmatmul.f32.gmra.mxu3 %v5930_v18  ;;  %v2624_v8 = vadd.f32 %v6213_v50, %v2586_v49 }
 0x80f   :  { %v2512_v12 = vpop.f32.mrf.mxu0  ;;  %v2550_v63 = vpop.f32.mrf.mxu2 }
 0x810   :  { %v2588_v29 = vpop.f32.mrf.mxu3  ;;  %v2626_v16 = vpop.f32.mrf.mxu1  ;;  %v2551_v55 = vadd.f32 %v2550_v63, %v2512_v12 }
 0x812   :  { %v2589_v15 = vadd.f32 %v2588_v29, %v2551_v55  ;;  %v2644_v29 = vld [vmem:[%s6459_s15] sm:$0xff] }
 0x814   :  { %3069 = vmatmul.f32.gmra.mxu2 %v6020_v33  ;;  %3107 = vmatmul.f32.gmra.mxu3 %v5991_v4  ;;  %v2627_v63 = vadd.f32 %v2626_v16, %v2589_v15 }
 0x817   :  { %v2515_v11 = vpop.f32.mrf.mxu0  ;;  %v2553_v52 = vpop.f32.mrf.mxu2 }
 0x818   :  { %v2591_v23 = vpop.f32.mrf.mxu3  ;;  %v2629_v2 = vpop.f32.mrf.mxu1  ;;  %v2554_v35 = vadd.f32 %v2553_v52, %v2515_v11 }
 0x81a   :  { %v2592_v37 = vadd.f32 %v2591_v23, %v2554_v35 }
 0x81c   :  { %3072 = vmatmul.f32.gmra.mxu2 %v6045_v9  ;;  %3110 = vmatmul.f32.gmra.mxu3 %v6031_v45  ;;  %v2630_v12 = vadd.f32 %v2629_v2, %v2592_v37 }
 0x81f   :  { %v2518_v62 = vpop.f32.mrf.mxu0  ;;  %v2556_v44 = vpop.f32.mrf.mxu2 }
 0x820   :  { %v2594_v31 = vpop.f32.mrf.mxu3  ;;  %v2632_v18 = vpop.f32.mrf.mxu1  ;;  %v2557_v19 = vadd.f32 %v2556_v44, %v2518_v62  ;;  %v2645_v44 = vld [vmem:[%s6459_s15 + $0x8] sm:$0xff] }
 0x822   :  { %v2595_v6 = vadd.f32 %v2594_v31, %v2557_v19 }
 0x824   :  { %3075 = vmatmul.f32.gmra.mxu2 %v6086_v28  ;;  %3113 = vmatmul.f32.gmra.mxu3 %v6056_v5  ;;  %v2633_v40 = vadd.f32 %v2632_v18, %v2595_v6 }
 0x827   :  { %v2521_v58 = vpop.f32.mrf.mxu0  ;;  %v2559_v33 = vpop.f32.mrf.mxu2 }
 0x828   :  { %v2597_v39 = vpop.f32.mrf.mxu3  ;;  %v2635_v4 = vpop.f32.mrf.mxu1  ;;  %v2560_v45 = vadd.f32 %v2559_v33, %v2521_v58  ;;  %v2646_v33 = vld [vmem:[%s6459_s15 + $0x10] sm:$0xff] }
 0x82a   :  { %v2598_v5 = vadd.f32 %v2597_v39, %v2560_v45  ;;  %v3788_v39 = vld [vmem:[%s6460_s16 + $0x4d8] sm:$0xff] }
 0x82c   :  { %v2636_v3 = vadd.f32 %v2635_v4, %v2598_v5  ;;  %v2649_v5 = vld [vmem:[%s6459_s15 + $0x28] sm:$0xff] }
 0x82f   :  { %v2524_v56 = vpop.f32.mrf.mxu0  ;;  %v2562_v25 = vpop.f32.mrf.mxu2 }
 0x830   :  { %v2600_v30 = vpop.f32.mrf.mxu3  ;;  %v2638_v14 = vpop.f32.mrf.mxu1  ;;  %v2563_v47 = vadd.f32 %v2562_v25, %v2524_v56  ;;  %v3787_v25 = vld [vmem:[%s6460_s16 + $0x4d0] sm:$0xff] }
 0x832   :  { %v2601_v54 = vadd.f32 %v2600_v30, %v2563_v47  ;;  %v2647_v47 = vld [vmem:[%s6459_s15 + $0x18] sm:$0xff] }
 0x834   :  { %v2639_v21 = vadd.f32 %v2638_v14, %v2601_v54 }
 0x837   :  { %v2527_v9 = vpop.f32.mrf.mxu0  ;;  %v2565_v53 = vpop.f32.mrf.mxu2 }
 0x838   :  { %v2566_v27 = vadd.f32 %v2565_v53, %v2527_v9  ;;  %v2603_v61 = vpop.f32.mrf.mxu3  ;;  %v2641_v1 = vpop.f32.mrf.mxu1  ;;  %v3786_v9 = vld [vmem:[%s6460_s16 + $0x4c8] sm:$0xff]  ;;  %v3785_v53 = vld [vmem:[%s6460_s16 + $0x4c0] sm:$0xff] }
 0x83a   :  { %v2604_v28 = vadd.f32 %v2603_v61, %v2566_v27 }
 0x83c   :  { %v2642_v46 = vadd.f32 %v2641_v1, %v2604_v28  ;;  %v2648_v1 = vld [vmem:[%s6459_s15 + $0x20] sm:$0xff] }
 0x83e   :  { %3729 = vmatpush.msk.msra.mxu0 %vm74_vm0, %v2642_v46 }
 0x83f   :  { %v6224_v51 = vpop.f32.mrf.mxu0  ;;  %v6226_v32 = vpop.f32.mrf.mxu2 }
 0x840   :  { %v6228_v17 = vpop.f32.mrf.mxu1  ;;  %v6230_v10 = vpop.f32.mrf.mxu3  ;;  %2960 = vmatpush.msra.mxu0 %v2639_v21 }
 0x842   :  { %2961 = vmatpush.msra.mxu0 %v2636_v3 }
 0x844   :  { %2962 = vmatpush.msra.mxu0 %v2633_v40 }
 0x846   :  { %2963 = vmatpush.msra.mxu0 %v2630_v12 }
 0x847   :  { %v2762_v11 = vpop.f32.mrf.mxu0  ;;  %v6232_v52 = vpop.f32.mrf.mxu2 }
 0x848   :  { %v2724_v59 = vpop.f32.mrf.mxu1  ;;  %v6235_v23 = vpop.f32.mrf.mxu3  ;;  %2964 = vmatpush.msra.mxu0 %v2627_v63 }
 0x849   :  { %v2763_v12 = vadd.f32 %v2762_v11, %v2724_v59 }
 0x84a   :  { %2965 = vmatpush.msra.mxu0 %v2624_v8 }
 0x84b   :  { %3730 = vmatmul.msk.f32.vlgmr.msra.gmra.mxu0 %vm1719_vm12, %v2644_v29  ;;  %v2650_v29 = vld [vmem:[%s6459_s15 + $0x30] sm:$0xff] }
 0x84c   :  { %3167 = vmatpush.msrb.mxu0 %v3788_v39  ;;  %v3776_v39 = vld [vmem:[%s6460_s16 + $0x478] sm:$0xff] }
 0x84e   :  { %3168 = vmatpush.msrb.mxu0 %v3787_v25  ;;  %v3773_v25 = vld [vmem:[%s6460_s16 + $0x460] sm:$0xff] }
 0x84f   :  { %v2765_v24 = vpop.f32.mrf.mxu0  ;;  %v2803_v2 = vpop.f32.mrf.mxu2 }
 0x850   :  { %v2727_v16 = vpop.f32.mrf.mxu1  ;;  %v2841_v62 = vpop.f32.mrf.mxu3  ;;  %3169 = vmatpush.msrb.mxu0 %v3786_v9  ;;  %v3769_v9 = vld [vmem:[%s6460_s16 + $0x440] sm:$0xff] }
 0x851   :  { %v2766_v15 = vadd.f32 %v2765_v24, %v2727_v16 }
 0x852   :  { %3170 = vmatpush.msrb.mxu0 %v3785_v53  ;;  %v3719_v53 = vld [vmem:[%s6459_s15 + $0x60] sm:$0xff] }
 0x853   :  { %3731 = vmatmul.msk.f32.gmra.mxu0 %vm1719_vm12, %v2645_v44  ;;  %v2760_v44 = vadd.f32 %v6224_v51, %v6228_v17  ;;  %v3714_v51 = vld [vmem:[%s6459_s15 + $0x38] sm:$0xff] }
 0x854   :  { %v3784_v17 = vld [vmem:[%s6460_s16 + $0x4b8] sm:$0xff] }
 0x855   :  { %v2798_v11 = vadd.f32 %v6226_v32, %v2760_v44  ;;  %v3783_v32 = vld [vmem:[%s6460_s16 + $0x4b0] sm:$0xff] }
 0x857   :  { %v2768_v50 = vpop.f32.mrf.mxu0  ;;  %v2806_v31 = vpop.f32.mrf.mxu2 }
 0x858   :  { %v2730_v18 = vpop.f32.mrf.mxu1  ;;  %v2844_v58 = vpop.f32.mrf.mxu3 }
 0x859   :  { %v2769_v21 = vadd.f32 %v2768_v50, %v2730_v18  ;;  %v2804_v50 = vadd.f32 %v2803_v2, %v2766_v15  ;;  %v3779_v2 = vld [vmem:[%s6460_s16 + $0x490] sm:$0xff] }
 0x85b   :  { %3732 = vmatmul.msk.f32.gmra.mxu0 %vm1719_vm12, %v2646_v33  ;;  %v2807_v63 = vadd.f32 %v2806_v31, %v2769_v21  ;;  %v2801_v33 = vadd.f32 %v6232_v52, %v2763_v12  ;;  %v2842_v59 = vadd.f32 %v2841_v62, %v2804_v50  ;;  %v2836_v31 = vadd.f32 %v6230_v10, %v2798_v11  ;;  %v3782_v10 = vld [vmem:[%s6460_s16 + $0x4a8] sm:$0xff]  ;;  %v3781_v52 = vld [vmem:[%s6460_s16 + $0x4a0] sm:$0xff] }
 0x85c   :  { %v3778_v62 = vld [vmem:[%s6460_s16 + $0x488] sm:$0xff] }
 0x85d   :  { %v2845_v24 = vadd.f32 %v2844_v58, %v2807_v63  ;;  %v2839_v16 = vadd.f32 %v6235_v23, %v2801_v33  ;;  %v3780_v23 = vld [vmem:[%s6460_s16 + $0x498] sm:$0xff]  ;;  %v3777_v58 = vld [vmem:[%s6460_s16 + $0x480] sm:$0xff] }
 0x85f   :  { %v2771_v4 = vpop.f32.mrf.mxu0  ;;  %v2809_v56 = vpop.f32.mrf.mxu2 }
 0x860   :  { %v2733_v30 = vpop.f32.mrf.mxu1  ;;  %v2847_v14 = vpop.f32.mrf.mxu3 }
 0x861   :  { %v2772_v46 = vadd.f32 %v2771_v4, %v2733_v30  ;;  %v3775_v4 = vld [vmem:[%s6460_s16 + $0x470] sm:$0xff]  ;;  %v3772_v30 = vld [vmem:[%s6460_s16 + $0x458] sm:$0xff] }
 0x863   :  { %3733 = vmatmul.msk.f32.gmra.mxu0 %vm1719_vm12, %v2647_v47  ;;  %v2810_v40 = vadd.f32 %v2809_v56, %v2772_v46  ;;  %v3774_v56 = vld [vmem:[%s6460_s16 + $0x468] sm:$0xff] }
 0x864   :  { %v3770_v47 = vld [vmem:[%s6460_s16 + $0x448] sm:$0xff] }
 0x865   :  { %v2848_v18 = vadd.f32 %v2847_v14, %v2810_v40  ;;  %v3771_v14 = vld [vmem:[%s6460_s16 + $0x450] sm:$0xff] }
 0x867   :  { %v2774_v45 = vpop.f32.mrf.mxu0  ;;  %v2812_v61 = vpop.f32.mrf.mxu2 }
 0x868   :  { %v2736_v27 = vpop.f32.mrf.mxu1  ;;  %v2850_v19 = vpop.f32.mrf.mxu3 }
 0x869   :  { %v2775_v54 = vadd.f32 %v2774_v45, %v2736_v27  ;;  %v3720_v45 = vld [vmem:[%s6459_s15 + $0x68] sm:$0xff] }
 0x86b   :  { %3734 = vmatmul.msk.f32.gmra.mxu0 %vm1719_vm12, %v2648_v1  ;;  %v2813_v36 = vadd.f32 %v2812_v61, %v2775_v54 }
 0x86d   :  { %v2851_v8 = vadd.f32 %v2850_v19, %v2813_v36 }
 0x86f   :  { %v2777_v28 = vpop.f32.mrf.mxu0  ;;  %v2815_v6 = vpop.f32.mrf.mxu2 }
 0x870   :  { %v2739_v35 = vpop.f32.mrf.mxu1  ;;  %v2853_v3 = vpop.f32.mrf.mxu3 }
 0x871   :  { %v2778_v55 = vadd.f32 %v2777_v28, %v2739_v35 }
 0x873   :  { %v2816_v37 = vadd.f32 %v2815_v6, %v2778_v55  ;;  %3735 = vmatmul.msk.f32.gmra.mxu0 %vm1719_vm12, %v2649_v5 }
 0x875   :  { %v2854_v49 = vadd.f32 %v2853_v3, %v2816_v37 }
 0x877   :  { %3721 = vmatpush.msk.msra.mxu1 %vm74_vm0, %v2854_v49  ;;  %v3058_v5 = vpop.f32.mrf.mxu2 }
 0x878   :  { %v3096_v46 = vpop.f32.mrf.mxu3 }
 0x879   :  { %2898 = vmatpush.msra.mxu1 %v2851_v8 }
 0x87b   :  { %2899 = vmatpush.msra.mxu1 %v2848_v18  ;;  %3736 = vmatmul.msk.f32.gmra.mxu0 %vm1719_vm12, %v2650_v29 }
 0x87d   :  { %2900 = vmatpush.msra.mxu1 %v2845_v24 }
 0x87f   :  { %2901 = vmatpush.msra.mxu1 %v2842_v59  ;;  %v3061_v37 = vpop.f32.mrf.mxu2 }
 0x880   :  { %v3099_v15 = vpop.f32.mrf.mxu3 }
 0x881   :  { %2902 = vmatpush.msra.mxu1 %v2839_v16 }
 0x883   :  { %2903 = vmatpush.msra.mxu1 %v2836_v31  ;;  %3789 = vmatmul.msk.f32.vlgmr.msrb.gmra.mxu0 %vm1986_vm13, %v5800_v48  ;;  %v3715_v48 = vld [vmem:[%s6459_s15 + $0x40] sm:$0xff] }
 0x884   :  { %3722 = vmatmul.msk.f32.vlgmr.msra.gmra.mxu1 %vm1719_vm12, %v3714_v51 }
 0x885   :  { %3117 = vmatpush.msrb.mxu1 %v3784_v17 }
 0x887   :  { %3118 = vmatpush.msrb.mxu1 %v3783_v32  ;;  %v3064_v12 = vpop.f32.mrf.mxu2 }
 0x888   :  { %v3102_v63 = vpop.f32.mrf.mxu3 }
 0x889   :  { %3119 = vmatpush.msrb.mxu1 %v3782_v10 }
 0x88b   :  { %3790 = vmatmul.msk.f32.gmra.mxu0 %vm1986_vm13, %v5855_v42  ;;  %3120 = vmatpush.msrb.mxu1 %v3781_v52  ;;  %v3716_v42 = vld [vmem:[%s6459_s15 + $0x48] sm:$0xff] }
 0x88c   :  { %3723 = vmatmul.msk.f32.gmra.mxu1 %vm1719_vm12, %v3715_v48 }
 0x88d   :  { %3121 = vmatpush.msrb.mxu1 %v3780_v23 }
 0x88f   :  { %3122 = vmatpush.msrb.mxu1 %v3779_v2  ;;  %v3067_v44 = vpop.f32.mrf.mxu2 }
 0x890   :  { %v3105_v50 = vpop.f32.mrf.mxu3 }
 0x891   :  { %3123 = vmatpush.msrb.mxu1 %v3778_v62 }
 0x893   :  { %3791 = vmatmul.msk.f32.gmra.mxu0 %vm1986_vm13, %v5916_v34  ;;  %3124 = vmatpush.msrb.mxu1 %v3777_v58  ;;  %v3717_v34 = vld [vmem:[%s6459_s15 + $0x50] sm:$0xff] }
 0x894   :  { %3724 = vmatmul.msk.f32.gmra.mxu1 %vm1719_vm12, %v3716_v42 }
 0x895   :  { %3125 = vmatpush.msrb.mxu1 %v3776_v39 }
 0x897   :  { %3126 = vmatpush.msrb.mxu1 %v3775_v4  ;;  %v3070_v24 = vpop.f32.mrf.mxu2 }
 0x898   :  { %v3108_v11 = vpop.f32.mrf.mxu3 }
 0x899   :  { %3127 = vmatpush.msrb.mxu1 %v3774_v56  ;;  %v3109_v58 = vadd.f32 %v3108_v11, %v3070_v24  ;;  %v3106_v56 = vadd.f32 %v3105_v50, %v3067_v44 }
 0x89b   :  { %3792 = vmatmul.msk.f32.gmra.mxu0 %vm1986_vm13, %v5977_v41  ;;  %3128 = vmatpush.msrb.mxu1 %v3773_v25  ;;  %v3718_v41 = vld [vmem:[%s6459_s15 + $0x58] sm:$0xff] }
 0x89c   :  { %3725 = vmatmul.msk.f32.gmra.mxu1 %vm1719_vm12, %v3717_v34 }
 0x89d   :  { %3129 = vmatpush.msrb.mxu1 %v3772_v30  ;;  %v3103_v30 = vadd.f32 %v3102_v63, %v3064_v12 }
 0x89f   :  { %3130 = vmatpush.msrb.mxu1 %v3771_v14  ;;  %v3073_v51 = vpop.f32.mrf.mxu2 }
 0x8a0   :  { %v3111_v17 = vpop.f32.mrf.mxu3 }
 0x8a1   :  { %3131 = vmatpush.msrb.mxu1 %v3770_v47  ;;  %v3112_v23 = vadd.f32 %v3111_v17, %v3073_v51 }
 0x8a3   :  { %3793 = vmatmul.msk.f32.gmra.mxu0 %vm1986_vm13, %v6023_v60  ;;  %3132 = vmatpush.msrb.mxu1 %v3769_v9  ;;  %v3100_v9 = vadd.f32 %v3099_v15, %v3061_v37 }
 0x8a4   :  { %3726 = vmatmul.msk.f32.gmra.mxu1 %vm1719_vm12, %v3718_v41 }
 0x8a7   :  { %v3076_v52 = vpop.f32.mrf.mxu2 }
 0x8a8   :  { %v3114_v48 = vpop.f32.mrf.mxu3 }
 0x8a9   :  { %v3115_v2 = vadd.f32 %v3114_v48, %v3076_v52 }
 0x8ab   :  { %3794 = vmatmul.msk.f32.gmra.mxu0 %vm1986_vm13, %v6048_v0 }
 0x8ac   :  { %3727 = vmatmul.msk.f32.gmra.mxu1 %vm1719_vm12, %v3719_v53 }
 0x8b3   :  { %3795 = vmatmul.msk.f32.gmra.mxu0 %vm1986_vm13, %v6089_v7 }
 0x8b4   :  { %3728 = vmatmul.msk.f32.gmra.mxu1 %vm1719_vm12, %v3720_v45  ;;  %v3097_v45 = vadd.f32 %v3096_v46, %v3058_v5  ;;  %v3802_v5 = vld [vmem:[%s6459_s15 + $0xa0] sm:$0xff] }
 0x8b5   :  { %v3818_v46 = vld [vmem:[%s6461_s17] ss:$0 sm:$0xff] }
 0x8bc   :  { %3133 = vmatmul.f32.vlgmr.msrb.gmra.mxu1 %v5758_v26 }
 0x8c4   :  { %3136 = vmatmul.f32.gmra.mxu1 %v5817_v13 }
 0x8c8   :  { %v2967_v60 = vpop.f32.mrf.mxu0 }
 0x8cc   :  { %3139 = vmatmul.f32.gmra.mxu1 %v5872_v57 }
 0x8d0   :  { %v2970_v0 = vpop.f32.mrf.mxu0 }
 0x8d4   :  { %3142 = vmatmul.f32.gmra.mxu1 %v5933_v43 }
 0x8d8   :  { %v2973_v27 = vpop.f32.mrf.mxu0 }
 0x8dc   :  { %3145 = vmatmul.f32.gmra.mxu1 %v5994_v22 }
 0x8e0   :  { %v2976_v1 = vpop.f32.mrf.mxu0 }
 0x8e4   :  { %3148 = vmatmul.f32.gmra.mxu1 %v6034_v20 }
 0x8e8   :  { %v2979_v13 = vpop.f32.mrf.mxu0 }
 0x8ec   :  { %3151 = vmatmul.f32.gmra.mxu1 %v6059_v38 }
 0x8f0   :  { %v2982_v20 = vpop.f32.mrf.mxu0 }
 0x8f8   :  { %v2985_v38 = vpop.f32.mrf.mxu0 }
 0x900   :  { %v3172_v21 = vpop.f32.mrf.mxu0 }
 0x901   :  { %v2905_v7 = vpop.f32.mrf.mxu1 }
 0x902   :  { %v6381_v61 = vadd.f32 %v2967_v60, %v2905_v7 }
 0x908   :  { %v3175_v40 = vpop.f32.mrf.mxu0 }
 0x909   :  { %v2908_v26 = vpop.f32.mrf.mxu1 }
 0x90a   :  { %v6383_v19 = vadd.f32 %v2970_v0, %v2908_v26 }
 0x910   :  { %v3178_v29 = vpop.f32.mrf.mxu0 }
 0x911   :  { %v2911_v57 = vpop.f32.mrf.mxu1 }
 0x912   :  { %v6385_v54 = vadd.f32 %v2973_v27, %v2911_v57  ;;  %v3797_v57 = vld [vmem:[%s6459_s15 + $0x78] sm:$0xff] }
 0x918   :  { %v3181_v33 = vpop.f32.mrf.mxu0 }
 0x919   :  { %v2914_v43 = vpop.f32.mrf.mxu1 }
 0x91a   :  { %v6387_v22 = vadd.f32 %v2976_v1, %v2914_v43  ;;  %v3798_v43 = vld [vmem:[%s6459_s15 + $0x80] sm:$0xff] }
 0x920   :  { %v3184_v16 = vpop.f32.mrf.mxu0 }
 0x921   :  { %v2917_v28 = vpop.f32.mrf.mxu1 }
 0x922   :  { %v6389_v35 = vadd.f32 %v2979_v13, %v2917_v28  ;;  %v3796_v13 = vld [vmem:[%s6459_s15 + $0x70] sm:$0xff] }
 0x923   :  { %v3800_v28 = vld [vmem:[%s6459_s15 + $0x90] sm:$0xff] }
 0x928   :  { %v3187_v32 = vpop.f32.mrf.mxu0 }
 0x929   :  { %v2920_v55 = vpop.f32.mrf.mxu1 }
 0x92a   :  { %v6391_v6 = vadd.f32 %v2982_v20, %v2920_v55  ;;  %v3799_v20 = vld [vmem:[%s6459_s15 + $0x88] sm:$0xff] }
 0x930   :  { %v3190_v4 = vpop.f32.mrf.mxu0 }
 0x931   :  { %v2923_v36 = vpop.f32.mrf.mxu1 }
 0x932   :  { %v6393_v3 = vadd.f32 %v2985_v38, %v2923_v36  ;;  %v3801_v38 = vld [vmem:[%s6459_s15 + $0x98] sm:$0xff]  ;;  %s3856_s15 = smov [#allocation2]  }
 0x933   :  { %s3298_s17 = sshll.u32 %s3856_s15, 4  ;;  %s3299_s17 = int_to_ptr.vmem [resolvable:$true] %s3298_s17 }
 0x939   :  { %v3134_v49 = vpop.f32.mrf.mxu1 }
 0x93a   :  { %v3135_v27 = vadd.f32 %v3134_v49, %v3097_v45 }
 0x93c   :  { %v3173_v26 = vadd.f32 %v3172_v21, %v3135_v27 }
 0x941   :  { %v3137_v8 = vpop.f32.mrf.mxu1 }
 0x942   :  { %v3138_v60 = vadd.f32 %v3137_v8, %v3100_v9 }
 0x944   :  { %v3176_v1 = vadd.f32 %v3175_v40, %v3138_v60 }
 0x949   :  { %v3140_v18 = vpop.f32.mrf.mxu1 }
 0x94a   :  { %v3141_v41 = vadd.f32 %v3140_v18, %v3103_v30 }
 0x94c   :  { %v3179_v7 = vadd.f32 %v3178_v29, %v3141_v41 }
 0x951   :  { %v3143_v59 = vpop.f32.mrf.mxu1 }
 0x952   :  { %v3144_v14 = vadd.f32 %v3143_v59, %v3106_v56 }
 0x954   :  { %v3182_v0 = vadd.f32 %v3181_v33, %v3144_v14 }
 0x959   :  { %v3146_v31 = vpop.f32.mrf.mxu1 }
 0x95a   :  { %v3147_v25 = vadd.f32 %v3146_v31, %v3109_v58 }
 0x95c   :  { %v3185_v53 = vadd.f32 %v3184_v16, %v3147_v25 }
 0x961   :  { %v3149_v10 = vpop.f32.mrf.mxu1 }
 0x962   :  { %v3150_v42 = vadd.f32 %v3149_v10, %v3112_v23 }
 0x964   :  { %v3188_v47 = vadd.f32 %v3187_v32, %v3150_v42 }
 0x969   :  { %v3152_v62 = vpop.f32.mrf.mxu1 }
 0x96a   :  { %v3153_v39 = vadd.f32 %v3152_v62, %v3115_v2 }
 0x96c   :  { %v3191_v34 = vadd.f32 %v3190_v4, %v3153_v39 }
 0x96e   :  { %3803 = vmatpush.msk.msrb.mxu2 %vm74_vm0, %v3191_v34 }
 0x970   :  { %3235 = vmatpush.msrb.mxu2 %v3188_v47 }
 0x972   :  { %3236 = vmatpush.msrb.mxu2 %v3185_v53 }
 0x974   :  { %3237 = vmatpush.msrb.mxu2 %v3182_v0 }
 0x976   :  { %3238 = vmatpush.msrb.mxu2 %v3179_v7 }
 0x978   :  { %3239 = vmatpush.msrb.mxu2 %v3176_v1 }
 0x97a   :  { %3240 = vmatpush.msrb.mxu2 %v3173_v26 }
 0x97b   :  { %3804 = vmatmul.msk.f32.vlgmr.msrb.gmra.mxu2 %vm1719_vm12, %v3796_v13 }
 0x983   :  { %3805 = vmatmul.msk.f32.gmra.mxu2 %vm1719_vm12, %v3797_v57 }
 0x98b   :  { %3806 = vmatmul.msk.f32.gmra.mxu2 %vm1719_vm12, %v3798_v43 }
 0x993   :  { %3807 = vmatmul.msk.f32.gmra.mxu2 %vm1719_vm12, %v3799_v20 }
 0x99b   :  { %3808 = vmatmul.msk.f32.gmra.mxu2 %vm1719_vm12, %v3800_v28 }
 0x9a3   :  { %3809 = vmatmul.msk.f32.gmra.mxu2 %vm1719_vm12, %v3801_v38 }
 0x9ab   :  { %3810 = vmatmul.msk.f32.gmra.mxu2 %vm1719_vm12, %v3802_v5 }
 0x9fe   :  { %v3242_v55 = vpop.f32.mrf.mxu2 }
 0x9ff   :  { %v3263_v21 = vadd.f32 %v3242_v55, %v6381_v61 }
 0xa01   :  { %v3273_v36 = vadd.f32 %v3818_v46, %v3263_v21 }
 0xa03   :  { %v3280_v37 = vmax.f32 %v3273_v36, 0.0 }
 0xa05   :  { %3287 = vst.msk [vmem:[#allocation2] sm:$0xff] %vm67_vm1, %v3280_v37 }
 0xa06   :  { %v3245_v15 = vpop.f32.mrf.mxu2 }
 0xa07   :  { %v3264_v40 = vadd.f32 %v3245_v15, %v6383_v19 }
 0xa09   :  { %v3274_v49 = vadd.f32 %v3818_v46, %v3264_v40 }
 0xa0b   :  { %v3281_v12 = vmax.f32 %v3274_v49, 0.0 }
 0xa0d   :  { %3288 = vst.msk [vmem:[#allocation2 + $0x8] sm:$0xff] %vm67_vm1, %v3281_v12 }
 0xa0e   :  { %v3248_v63 = vpop.f32.mrf.mxu2 }
 0xa0f   :  { %v3265_v8 = vadd.f32 %v3248_v63, %v6385_v54 }
 0xa11   :  { %v3275_v29 = vadd.f32 %v3818_v46, %v3265_v8 }
 0xa13   :  { %v3282_v44 = vmax.f32 %v3275_v29, 0.0 }
 0xa15   :  { %3289 = vst.msk [vmem:[#allocation2 + $0x10] sm:$0xff] %vm67_vm1, %v3282_v44 }
 0xa16   :  { %v3251_v50 = vpop.f32.mrf.mxu2 }
 0xa17   :  { %v3266_v61 = vadd.f32 %v3251_v50, %v6387_v22 }
 0xa19   :  { %v3276_v18 = vadd.f32 %v3818_v46, %v3266_v61 }
 0xa1b   :  { %v3283_v33 = vmax.f32 %v3276_v18, 0.0 }
 0xa1d   :  { %3290 = vst.msk [vmem:[#allocation2 + $0x18] sm:$0xff] %vm67_vm1, %v3283_v33 }
 0xa1e   :  { %v3254_v24 = vpop.f32.mrf.mxu2 }
 0xa1f   :  { %v3267_v19 = vadd.f32 %v3254_v24, %v6389_v35 }
 0xa21   :  { %v3277_v11 = vadd.f32 %v3818_v46, %v3267_v19 }
 0xa23   :  { %v3284_v59 = vmax.f32 %v3277_v11, 0.0 }
 0xa25   :  { %3291 = vst.msk [vmem:[#allocation2 + $0x20] sm:$0xff] %vm67_vm1, %v3284_v59 }
 0xa26   :  { %v3257_v16 = vpop.f32.mrf.mxu2 }
 0xa27   :  { %v3268_v54 = vadd.f32 %v3257_v16, %v6391_v6 }
 0xa29   :  { %v3278_v31 = vadd.f32 %v3818_v46, %v3268_v54 }
 0xa2b   :  { %v3285_v51 = vmax.f32 %v3278_v31, 0.0 }
 0xa2d   :  { %3292 = vst.msk [vmem:[#allocation2 + $0x28] sm:$0xff] %vm67_vm1, %v3285_v51 }
 0xa2e   :  { %v3260_v17 = vpop.f32.mrf.mxu2 }
 0xa2f   :  { %v3269_v22 = vadd.f32 %v3260_v17, %v6393_v3 }
 0xa31   :  { %v3279_v35 = vadd.f32 %v3818_v46, %v3269_v22 }
 0xa33   :  { %v3286_v32 = vmax.f32 %v3279_v35, 0.0 }
 0xa35   :  { %3293 = vst.msk [vmem:[#allocation2 + $0x30] sm:$0xff] %vm67_vm1, %v3286_v32 }
 0xa36   :  { %3306 = dma.vmem_to_hbm [thread:$0]  %s3299_s17, 896, %s3301_s20, [#allocation3], %s3857_s21, %s3857_s21, %s3858_s6  }
 0xa37   :  { %3851 = dma.done.wait [#allocation3], 896  }
 0xa38   :  { %3852 = vsyncadd [#allocation3], 4294966400 }
 0xa39   :  { %3311 = vsyncpa [#allocation3], 1 }

</bundles_post_ra>
